<compile_context>
chip_gen: v5e
topology: v5e:2x2
jax: 0.10.0
libtpu: 0.0.40
codegen_flags: <defaults>
</compile_context>

<pallas_src>
import functools
import numpy as np
import jax
import jax.numpy as jnp
from jax.experimental import pallas as pl
from jax.experimental.pallas import tpu as pltpu

CP = 128   # lane-padded channel width used for every activation / weight tile

# ----------------------------- hyper-parameters ------------------------------
HPARAMS = dict(
    input_normalizing_constant=None,   # None -> runtime normalization is a no-op
    n_cg_blocks=2,
    do_initial_linear_projection=True,
    ch_initial_linear_projection=8,
    lmax_list=[1, 0],
    ch_size_list=[8, 8],
    ls_nonlin_rule_list=["full", "full"],
    ch_nonlin_rule_list=["elementwise", "elementwise"],
    use_additive_skip_connections=True,
    weights_initializer="uniform",
    use_batch_norm=False,              # norm path disabled -> norm_* hparams unused
    linearity_first=False,
    filter_symmetric=True,
    n_fc_blocks=1,
    fc_h_dim=16,
    fc_nonlin="relu",
    dropout_rate=0.0,                  # eval mode / no dropout
    use_batch_norm_in_fc=False,
    output_dim=5,
    inv_conditioning_dim=8,
    inv_conditioning_hidden_dim=4,
    vec_conditioning_dim=8,
    vec_conditioning_hidden_dim=4,
)
# irreps_in = "4x0e + 4x1e + 4x2e"  ->  {l: multiplicity}
IRREPS_IN = {0: 4, 1: 4, 2: 4}


def _round_up(n, m):
    return ((n + m - 1) // m) * m


def cg_tp_paths(in_ls, lmax_out, filter_symmetric=True):
    paths = {l3: [] for l3 in range(lmax_out + 1)}
    for l1 in in_ls:
        for l2 in in_ls:
            if filter_symmetric and l2 < l1:
                continue
            for l3 in range(abs(l1 - l2), l1 + l2 + 1):
                if l3 <= lmax_out:
                    paths[l3].append((l1, l2))
    return paths


# ------------------------------ fused kernel ---------------------------------
def _fused_forward_kernel(*refs, plan):
    """Whole forward pass in one kernel.

    refs = (x_l refs for l=0..lmax_in) + (c_inv, c_vec, W_stack, b_stack, out)
      x_l    : (2l+1, BP, CP) f32, channels zero-padded to CP lanes
      c_inv  : (BP, CP)
      c_vec  : (3, BP, CP)
      W_stack: (n_w, CP, CP)    b_stack: (8, CP)
      out    : (BP, CP)
    """
    H = HPARAMS
    n_l = plan["n_in_ls"]
    x_refs = refs[:n_l]
    cinv_ref, cvec_ref, w_ref, b_ref, o_ref = refs[n_l:]

    widx, bidx, w3j = plan["widx"], plan["bidx"], plan["w3j"]
    b_all = b_ref[...]                                     # (8, CP)

    def mm(x, name):                                       # (BP,CP)@(CP,CP) on the MXU
        return jnp.dot(x, w_ref[widx[name]], preferred_element_type=jnp.float32)

    def bias(name):
        i = bidx[name]
        return b_all[i:i + 1, :]                           # (1, CP), broadcasts over rows

    # ---- conditioning projections (Linear on invariants, SO3 linearity on l=1) ----
    ci = mm(cinv_ref[...], "inv_proj") + bias("inv_proj")  # (BP, CP)
    cv = [mm(cvec_ref[m], "vec_proj") for m in range(3)]   # 3 x (BP, CP), no bias (l=1)

    # ---- conditioned features -> initial SO(3) linear projection ----
    # concat([x, cond], ch) @ W  ==  x @ W[:cx] + cond @ W[cx:]  (weights pre-split),
    # so the torch.cat on the channel dim never has to be materialized.
    h, nch = {}, {}
    for l in range(plan["lmax_cond"] + 1):
        xs = [x_refs[l][m] for m in range(2 * l + 1)]
        if l == 0:
            h[l] = [mm(xs[0], "init_l0_x") + mm(ci, "init_l0_c") + bias("init_l0")]
        elif l == 1:
            h[l] = [mm(xs[m], "init_l1_x") + mm(cv[m], "init_l1_c") for m in range(3)]
        else:
            h[l] = [mm(xs[m], f"init_l{l}_x") for m in range(2 * l + 1)]
        nch[l] = H["ch_initial_linear_projection"]

    BP = h[0][0].shape[0]

    # ---- CG blocks: channel-wise CG tensor square -> per-l linearity -> skip ----
    # TODO(synk): nn.CGBlock source is not included in the reference; this follows the
    # documented interpretation for linearity_first=False, use_batch_norm=False,
    # ls_nonlin_rule='full', ch_nonlin_rule='elementwise', filter_symmetric=True.
    for bi, blk in enumerate(plan["blocks"]):
        lmax_out, ch_out, paths = blk["lmax_out"], blk["ch_out"], blk["paths"]
        h_new = {}
        for l3 in range(lmax_out + 1):
            rows = []
            for m3 in range(2 * l3 + 1):
                acc = jnp.zeros((BP, CP), jnp.float32)
                for p, (l1, l2) in enumerate(paths[l3]):
                    coeff = w3j[(l1, l2, l3)]
                    t = None
                    for m1 in range(2 * l1 + 1):
                        for m2 in range(2 * l2 + 1):
                            wv = float(coeff[m3, m1, m2])
                            if wv == 0.0:
                                continue
                            term = wv * (h[l1][m1] * h[l2][m2])
                            t = term if t is None else t + term
                    if t is not None:
                        # path output goes straight through its slice of the block weight
                        acc = acc + mm(t, f"cg{bi}_l{l3}_p{p}")
                if l3 == 0 and f"cg{bi}_l0" in bidx:
                    acc = acc + bias(f"cg{bi}_l0")
                rows.append(acc)
            h_new[l3] = rows
        if H["use_additive_skip_connections"]:
            for l in h:
                if l in h_new:
                    for m in range(2 * l + 1):
                        s = h[l][m]
                        if nch[l] > ch_out:                # torch: h[l][:, :ch_out, :]
                            lane = jax.lax.broadcasted_iota(jnp.int32, (BP, CP), 1)
                            s = jnp.where(lane < ch_out, s, 0.0)
                        # nch[l] < ch_out: zero lane-padding already == F.pad on channels
                        h_new[l][m] = h_new[l][m] + s
        h = h_new
        nch = {l: ch_out for l in h}

    # ---- invariants -> FC blocks (Linear + ReLU) -> output head ----
    inv = h[0][0]                                          # == torch h[0].squeeze(-1)
    for fi in range(H["n_fc_blocks"]):
        inv = jnp.maximum(mm(inv, f"fc{fi}") + bias(f"fc{fi}"), 0.0)
    o_ref[...] = mm(inv, "head") + bias("head")


# --------------------------- parameters + plan --------------------------------
def build_model(key):
    """Builds logical weights, pads/splits them once into stacked (CP,CP) tiles,
    and returns (packed_device_arrays, static_plan)."""
    H = HPARAMS
    assert H["do_initial_linear_projection"]   # TODO(synk): False branch not implemented
    assert H["fc_nonlin"] == "relu"
    kit = iter(jax.random.split(key, 128))

    def lin_init(cin, cout, bias=True):
        s = 1.0 / np.sqrt(cin)
        W = np.asarray(jax.random.uniform(next(kit), (cin, cout), jnp.float32, -s, s))
        b = (np.asarray(jax.random.uniform(next(kit), (cout,), jnp.float32, -s, s))
             if bias else None)
        return W, b

    w_list, b_list, widx, bidx = [], [], {}, {}

    def add_w(name, w_np):                      # logical (cin, cout) -> padded (CP, CP)
        pad = np.zeros((CP, CP), np.float32)
        pad[:w_np.shape[0], :w_np.shape[1]] = w_np
        widx[name] = len(w_list)
        w_list.append(pad)

    def add_b(name, b_np):                      # logical (cout,) -> padded (CP,)
        pad = np.zeros((CP,), np.float32)
        pad[:b_np.shape[0]] = b_np
        bidx[name] = len(b_list)
        b_list.append(pad)

    # conditioning projections
    Wi, bi_ = lin_init(H["inv_conditioning_dim"], H["inv_conditioning_hidden_dim"], True)
    add_w("inv_proj", Wi); add_b("inv_proj", bi_)
    Wv, _ = lin_init(H["vec_conditioning_dim"], H["vec_conditioning_hidden_dim"], False)
    add_w("vec_proj", Wv)

    # channel bookkeeping after the conditioning concat
    ch = dict(IRREPS_IN)
    ch[0] += H["inv_conditioning_hidden_dim"]
    ch[1] += H["vec_conditioning_hidden_dim"]
    lmax_cond = max(ch)

    # initial SO(3) linear projection (bias on l=0 only); split rows per source
    for l in range(lmax_cond + 1):
        W, b = lin_init(ch[l], H["ch_initial_linear_projection"], bias=(l == 0))
        if l == 0:
            add_w("init_l0_x", W[:IRREPS_IN[0]]); add_w("init_l0_c", W[IRREPS_IN[0]:])
            add_b("init_l0", b)
        elif l == 1:
            add_w("init_l1_x", W[:IRREPS_IN[1]]); add_w("init_l1_c", W[IRREPS_IN[1]:])
        else:
            add_w(f"init_l{l}_x", W)
    ch = {l: H["ch_initial_linear_projection"] for l in range(lmax_cond + 1)}

    # synthetic deterministic Wigner-3j tensors (the torch module takes these as input)
    kw = next(kit)
    w3j = {}
    for l1 in range(lmax_cond + 1):
        for l2 in range(l1, lmax_cond + 1):
            for l3 in range(abs(l1 - l2), min(l1 + l2, lmax_cond) + 1):
                kw, sub = jax.random.split(kw)
                w = jax.random.normal(sub, (2 * l3 + 1, 2 * l1 + 1, 2 * l2 + 1), jnp.float32)
                w3j[(l1, l2, l3)] = np.asarray(w) / np.sqrt((2 * l1 + 1) * (2 * l2 + 1))

    # CG blocks: per-l3 linearity weights, split into one (cin, ch_out) slice per CG path
    blocks = []
    for i in range(H["n_cg_blocks"]):
        lmax_out, ch_out = H["lmax_list"][i], H["ch_size_list"][i]
        in_ls = sorted(ch.keys())
        assert len(set(ch[l] for l in in_ls)) == 1   # elementwise channel rule
        cin = ch[in_ls[0]]
        paths = cg_tp_paths(in_ls, lmax_out, H["filter_symmetric"])
        for l3 in range(lmax_out + 1):
            n_paths = len(paths[l3])
            if n_paths == 0:
                continue                                   # robust to empty path lists
            W, b = lin_init(cin * n_paths, ch_out, bias=(l3 == 0))
            for p in range(n_paths):
                add_w(f"cg{i}_l{l3}_p{p}", W[p * cin:(p + 1) * cin])
            if l3 == 0:
                add_b(f"cg{i}_l0", b)
        blocks.append(dict(lmax_out=lmax_out, ch_out=ch_out, paths=paths))
        ch = {l: ch_out for l in range(lmax_out + 1)}

    # FC blocks + output head
    prev = ch[0]
    for fi in range(H["n_fc_blocks"]):
        W, b = lin_init(prev, H["fc_h_dim"], True)
        add_w(f"fc{fi}", W); add_b(f"fc{fi}", b)
        prev = H["fc_h_dim"]
    W, b = lin_init(prev, H["output_dim"], True)
    add_w("head", W); add_b("head", b)

    w_stack = np.stack(w_list).astype(np.float32)                      # (n_w, CP, CP)
    b_stack = np.stack(b_list).astype(np.float32)                      # (n_b, CP)
    if b_stack.shape[0] < 8:                                           # keep (8,128)-friendly
        b_stack = np.concatenate(
            [b_stack, np.zeros((8 - b_stack.shape[0], CP), np.float32)], axis=0)

    packed = dict(W=jnp.asarray(w_stack), b=jnp.asarray(b_stack))
    plan = dict(widx=widx, bidx=bidx, w3j=w3j, blocks=blocks,
                lmax_cond=lmax_cond, n_in_ls=max(IRREPS_IN) + 1)
    return packed, plan


# ------------------------------ forward wrapper --------------------------------
def make_forward(plan):
    H = HPARAMS
    n_l = plan["n_in_ls"]
    kernel = functools.partial(_fused_forward_kernel, plan=plan)

    @jax.jit
    def forward(packed, x, c_inv, c_vec):
        B = c_inv.shape[0]
        BP = _round_up(max(B, 8), 8)

        def prep(v):                      # (B, C, 2l+1) -> (2l+1, BP, CP), done once at entry
            v = jnp.transpose(v.astype(jnp.float32), (2, 0, 1))
            d, b, c = v.shape
            return jnp.pad(v, ((0, 0), (0, BP - b), (0, CP - c)))

        # input_normalizing_constant is None -> runtime normalization is a no-op.
        feats = [prep(x[l]) for l in range(n_l)]
        cinvp = jnp.pad(c_inv.astype(jnp.float32),
                        ((0, BP - B), (0, CP - c_inv.shape[1])))
        cvecp = prep(c_vec)

        vmem = pl.BlockSpec(memory_space=pltpu.MemorySpace.VMEM)
        out = pl.pallas_call(
            kernel,
            out_shape=jax.ShapeDtypeStruct((BP, CP), jnp.float32),
            in_specs=[vmem] * (n_l + 4),
            out_specs=vmem,
        )(*feats, cinvp, cvecp, packed["W"], packed["b"])
        return out[:B, :H["output_dim"]]

    return forward


# ----------------------------------- main -------------------------------------
if __name__ == "__main__":
    key = jax.random.PRNGKey(0)
    kp, kx0, kx1, kx2, kci, kcv = jax.random.split(key, 6)
    packed, plan = build_model(kp)
    forward = make_forward(plan)

    B = 2
    x = {
        0: jax.random.normal(kx0, (B, IRREPS_IN[0], 1), jnp.float32),
        1: jax.random.normal(kx1, (B, IRREPS_IN[1], 3), jnp.float32),
        2: jax.random.normal(kx2, (B, IRREPS_IN[2], 5), jnp.float32),
    }
    c_inv = jax.random.normal(kci, (B, HPARAMS["inv_conditioning_dim"]), jnp.float32)
    c_vec = jax.random.normal(kcv, (B, HPARAMS["vec_conditioning_dim"], 3), jnp.float32)

    out = jax.block_until_ready(forward(packed, x, c_inv, c_vec))
    assert out.shape == (B, HPARAMS["output_dim"])
    assert bool(jnp.all(jnp.isfinite(out)))
    print("KERNEL_OK")
</pallas_src>

<mosaic_0001>
module attributes {stable_mosaic.version = 11 : i64} {
  func.func @_fused_forward_kernel(%arg0: memref<1x8x128xf32, #tpu.memory_space<vmem>>, %arg1: memref<3x8x128xf32, #tpu.memory_space<vmem>>, %arg2: memref<5x8x128xf32, #tpu.memory_space<vmem>>, %arg3: memref<8x128xf32, #tpu.memory_space<vmem>>, %arg4: memref<3x8x128xf32, #tpu.memory_space<vmem>>, %arg5: memref<18x128x128xf32, #tpu.memory_space<vmem>>, %arg6: memref<8x128xf32, #tpu.memory_space<vmem>>, %arg7: memref<8x128xf32, #tpu.memory_space<vmem>>) attributes {dimension_semantics = [], scalar_prefetch = 0 : i64, scratch_operands = 0 : i64, tpu.core_type = #tpu.core_type<tc>} {
    %c0 = arith.constant 0 : index
    %c0_0 = arith.constant 0 : index
    %0 = vector.load %arg6[%c0, %c0_0] : memref<8x128xf32, #tpu.memory_space<vmem>>, vector<8x128xf32>
    %c0_1 = arith.constant 0 : index
    %c0_2 = arith.constant 0 : index
    %1 = vector.load %arg3[%c0_1, %c0_2] : memref<8x128xf32, #tpu.memory_space<vmem>>, vector<8x128xf32>
    %c0_3 = arith.constant 0 : index
    %c0_4 = arith.constant 0 : index
    %c0_5 = arith.constant 0 : index
    %2 = vector.load %arg5[%c0_3, %c0_4, %c0_5] : memref<18x128x128xf32, #tpu.memory_space<vmem>>, vector<1x128x128xf32>
    %3 = vector.shape_cast %2 : vector<1x128x128xf32> to vector<128x128xf32>
    %cst = arith.constant dense<0.000000e+00> : vector<8x128xf32>
    %4 = tpu.matmul %1, %3, %cst {dimension_numbers = #tpu.dot_dimension_numbers<[1], [0], [0], [1], [0, 0, 1, 1], [], []>} : vector<8x128xf32>, vector<128x128xf32>, vector<8x128xf32> -> vector<8x128xf32>
    %5 = vector.extract_strided_slice %0 {offsets = [0, 0], sizes = [1, 128], strides = [1, 1]} : vector<8x128xf32> to vector<1x128xf32>
    %6 = vector.broadcast %5 : vector<1x128xf32> to vector<8x128xf32>
    %7 = arith.addf %4, %6 : vector<8x128xf32>
    %c0_6 = arith.constant 0 : index
    %c0_7 = arith.constant 0 : index
    %c0_8 = arith.constant 0 : index
    %8 = vector.load %arg4[%c0_6, %c0_7, %c0_8] : memref<3x8x128xf32, #tpu.memory_space<vmem>>, vector<1x8x128xf32>
    %9 = vector.shape_cast %8 : vector<1x8x128xf32> to vector<8x128xf32>
    %c1 = arith.constant 1 : index
    %c0_9 = arith.constant 0 : index
    %c0_10 = arith.constant 0 : index
    %10 = vector.load %arg5[%c1, %c0_9, %c0_10] : memref<18x128x128xf32, #tpu.memory_space<vmem>>, vector<1x128x128xf32>
    %11 = vector.shape_cast %10 : vector<1x128x128xf32> to vector<128x128xf32>
    %cst_11 = arith.constant dense<0.000000e+00> : vector<8x128xf32>
    %12 = tpu.matmul %9, %11, %cst_11 {dimension_numbers = #tpu.dot_dimension_numbers<[1], [0], [0], [1], [0, 0, 1, 1], [], []>} : vector<8x128xf32>, vector<128x128xf32>, vector<8x128xf32> -> vector<8x128xf32>
    %c1_12 = arith.constant 1 : index
    %c0_13 = arith.constant 0 : index
    %c0_14 = arith.constant 0 : index
    %13 = vector.load %arg4[%c1_12, %c0_13, %c0_14] : memref<3x8x128xf32, #tpu.memory_space<vmem>>, vector<1x8x128xf32>
    %14 = vector.shape_cast %13 : vector<1x8x128xf32> to vector<8x128xf32>
    %c1_15 = arith.constant 1 : index
    %c0_16 = arith.constant 0 : index
    %c0_17 = arith.constant 0 : index
    %15 = vector.load %arg5[%c1_15, %c0_16, %c0_17] : memref<18x128x128xf32, #tpu.memory_space<vmem>>, vector<1x128x128xf32>
    %16 = vector.shape_cast %15 : vector<1x128x128xf32> to vector<128x128xf32>
    %cst_18 = arith.constant dense<0.000000e+00> : vector<8x128xf32>
    %17 = tpu.matmul %14, %16, %cst_18 {dimension_numbers = #tpu.dot_dimension_numbers<[1], [0], [0], [1], [0, 0, 1, 1], [], []>} : vector<8x128xf32>, vector<128x128xf32>, vector<8x128xf32> -> vector<8x128xf32>
    %c2 = arith.constant 2 : index
    %c0_19 = arith.constant 0 : index
    %c0_20 = arith.constant 0 : index
    %18 = vector.load %arg4[%c2, %c0_19, %c0_20] : memref<3x8x128xf32, #tpu.memory_space<vmem>>, vector<1x8x128xf32>
    %19 = vector.shape_cast %18 : vector<1x8x128xf32> to vector<8x128xf32>
    %c1_21 = arith.constant 1 : index
    %c0_22 = arith.constant 0 : index
    %c0_23 = arith.constant 0 : index
    %20 = vector.load %arg5[%c1_21, %c0_22, %c0_23] : memref<18x128x128xf32, #tpu.memory_space<vmem>>, vector<1x128x128xf32>
    %21 = vector.shape_cast %20 : vector<1x128x128xf32> to vector<128x128xf32>
    %cst_24 = arith.constant dense<0.000000e+00> : vector<8x128xf32>
    %22 = tpu.matmul %19, %21, %cst_24 {dimension_numbers = #tpu.dot_dimension_numbers<[1], [0], [0], [1], [0, 0, 1, 1], [], []>} : vector<8x128xf32>, vector<128x128xf32>, vector<8x128xf32> -> vector<8x128xf32>
    %c0_25 = arith.constant 0 : index
    %c0_26 = arith.constant 0 : index
    %c0_27 = arith.constant 0 : index
    %23 = vector.load %arg0[%c0_25, %c0_26, %c0_27] : memref<1x8x128xf32, #tpu.memory_space<vmem>>, vector<1x8x128xf32>
    %24 = vector.shape_cast %23 : vector<1x8x128xf32> to vector<8x128xf32>
    %c2_28 = arith.constant 2 : index
    %c0_29 = arith.constant 0 : index
    %c0_30 = arith.constant 0 : index
    %25 = vector.load %arg5[%c2_28, %c0_29, %c0_30] : memref<18x128x128xf32, #tpu.memory_space<vmem>>, vector<1x128x128xf32>
    %26 = vector.shape_cast %25 : vector<1x128x128xf32> to vector<128x128xf32>
    %cst_31 = arith.constant dense<0.000000e+00> : vector<8x128xf32>
    %27 = tpu.matmul %24, %26, %cst_31 {dimension_numbers = #tpu.dot_dimension_numbers<[1], [0], [0], [1], [0, 0, 1, 1], [], []>} : vector<8x128xf32>, vector<128x128xf32>, vector<8x128xf32> -> vector<8x128xf32>
    %c3 = arith.constant 3 : index
    %c0_32 = arith.constant 0 : index
    %c0_33 = arith.constant 0 : index
    %28 = vector.load %arg5[%c3, %c0_32, %c0_33] : memref<18x128x128xf32, #tpu.memory_space<vmem>>, vector<1x128x128xf32>
    %29 = vector.shape_cast %28 : vector<1x128x128xf32> to vector<128x128xf32>
    %cst_34 = arith.constant dense<0.000000e+00> : vector<8x128xf32>
    %30 = tpu.matmul %7, %29, %cst_34 {dimension_numbers = #tpu.dot_dimension_numbers<[1], [0], [0], [1], [0, 0, 1, 1], [], []>} : vector<8x128xf32>, vector<128x128xf32>, vector<8x128xf32> -> vector<8x128xf32>
    %31 = arith.addf %27, %30 : vector<8x128xf32>
    %32 = vector.extract_strided_slice %0 {offsets = [1, 0], sizes = [1, 128], strides = [1, 1]} : vector<8x128xf32> to vector<1x128xf32>
    %33 = vector.broadcast %32 : vector<1x128xf32> to vector<8x128xf32>
    %34 = arith.addf %31, %33 : vector<8x128xf32>
    %c0_35 = arith.constant 0 : index
    %c0_36 = arith.constant 0 : index
    %c0_37 = arith.constant 0 : index
    %35 = vector.load %arg1[%c0_35, %c0_36, %c0_37] : memref<3x8x128xf32, #tpu.memory_space<vmem>>, vector<1x8x128xf32>
    %36 = vector.shape_cast %35 : vector<1x8x128xf32> to vector<8x128xf32>
    %c1_38 = arith.constant 1 : index
    %c0_39 = arith.constant 0 : index
    %c0_40 = arith.constant 0 : index
    %37 = vector.load %arg1[%c1_38, %c0_39, %c0_40] : memref<3x8x128xf32, #tpu.memory_space<vmem>>, vector<1x8x128xf32>
    %38 = vector.shape_cast %37 : vector<1x8x128xf32> to vector<8x128xf32>
    %c2_41 = arith.constant 2 : index
    %c0_42 = arith.constant 0 : index
    %c0_43 = arith.constant 0 : index
    %39 = vector.load %arg1[%c2_41, %c0_42, %c0_43] : memref<3x8x128xf32, #tpu.memory_space<vmem>>, vector<1x8x128xf32>
    %40 = vector.shape_cast %39 : vector<1x8x128xf32> to vector<8x128xf32>
    %c4 = arith.constant 4 : index
    %c0_44 = arith.constant 0 : index
    %c0_45 = arith.constant 0 : index
    %41 = vector.load %arg5[%c4, %c0_44, %c0_45] : memref<18x128x128xf32, #tpu.memory_space<vmem>>, vector<1x128x128xf32>
    %42 = vector.shape_cast %41 : vector<1x128x128xf32> to vector<128x128xf32>
    %cst_46 = arith.constant dense<0.000000e+00> : vector<8x128xf32>
    %43 = tpu.matmul %36, %42, %cst_46 {dimension_numbers = #tpu.dot_dimension_numbers<[1], [0], [0], [1], [0, 0, 1, 1], [], []>} : vector<8x128xf32>, vector<128x128xf32>, vector<8x128xf32> -> vector<8x128xf32>
    %c5 = arith.constant 5 : index
    %c0_47 = arith.constant 0 : index
    %c0_48 = arith.constant 0 : index
    %44 = vector.load %arg5[%c5, %c0_47, %c0_48] : memref<18x128x128xf32, #tpu.memory_space<vmem>>, vector<1x128x128xf32>
    %45 = vector.shape_cast %44 : vector<1x128x128xf32> to vector<128x128xf32>
    %cst_49 = arith.constant dense<0.000000e+00> : vector<8x128xf32>
    %46 = tpu.matmul %12, %45, %cst_49 {dimension_numbers = #tpu.dot_dimension_numbers<[1], [0], [0], [1], [0, 0, 1, 1], [], []>} : vector<8x128xf32>, vector<128x128xf32>, vector<8x128xf32> -> vector<8x128xf32>
    %47 = arith.addf %43, %46 : vector<8x128xf32>
    %c4_50 = arith.constant 4 : index
    %c0_51 = arith.constant 0 : index
    %c0_52 = arith.constant 0 : index
    %48 = vector.load %arg5[%c4_50, %c0_51, %c0_52] : memref<18x128x128xf32, #tpu.memory_space<vmem>>, vector<1x128x128xf32>
    %49 = vector.shape_cast %48 : vector<1x128x128xf32> to vector<128x128xf32>
    %cst_53 = arith.constant dense<0.000000e+00> : vector<8x128xf32>
    %50 = tpu.matmul %38, %49, %cst_53 {dimension_numbers = #tpu.dot_dimension_numbers<[1], [0], [0], [1], [0, 0, 1, 1], [], []>} : vector<8x128xf32>, vector<128x128xf32>, vector<8x128xf32> -> vector<8x128xf32>
    %c5_54 = arith.constant 5 : index
    %c0_55 = arith.constant 0 : index
    %c0_56 = arith.constant 0 : index
    %51 = vector.load %arg5[%c5_54, %c0_55, %c0_56] : memref<18x128x128xf32, #tpu.memory_space<vmem>>, vector<1x128x128xf32>
    %52 = vector.shape_cast %51 : vector<1x128x128xf32> to vector<128x128xf32>
    %cst_57 = arith.constant dense<0.000000e+00> : vector<8x128xf32>
    %53 = tpu.matmul %17, %52, %cst_57 {dimension_numbers = #tpu.dot_dimension_numbers<[1], [0], [0], [1], [0, 0, 1, 1], [], []>} : vector<8x128xf32>, vector<128x128xf32>, vector<8x128xf32> -> vector<8x128xf32>
    %54 = arith.addf %50, %53 : vector<8x128xf32>
    %c4_58 = arith.constant 4 : index
    %c0_59 = arith.constant 0 : index
    %c0_60 = arith.constant 0 : index
    %55 = vector.load %arg5[%c4_58, %c0_59, %c0_60] : memref<18x128x128xf32, #tpu.memory_space<vmem>>, vector<1x128x128xf32>
    %56 = vector.shape_cast %55 : vector<1x128x128xf32> to vector<128x128xf32>
    %cst_61 = arith.constant dense<0.000000e+00> : vector<8x128xf32>
    %57 = tpu.matmul %40, %56, %cst_61 {dimension_numbers = #tpu.dot_dimension_numbers<[1], [0], [0], [1], [0, 0, 1, 1], [], []>} : vector<8x128xf32>, vector<128x128xf32>, vector<8x128xf32> -> vector<8x128xf32>
    %c5_62 = arith.constant 5 : index
    %c0_63 = arith.constant 0 : index
    %c0_64 = arith.constant 0 : index
    %58 = vector.load %arg5[%c5_62, %c0_63, %c0_64] : memref<18x128x128xf32, #tpu.memory_space<vmem>>, vector<1x128x128xf32>
    %59 = vector.shape_cast %58 : vector<1x128x128xf32> to vector<128x128xf32>
    %cst_65 = arith.constant dense<0.000000e+00> : vector<8x128xf32>
    %60 = tpu.matmul %22, %59, %cst_65 {dimension_numbers = #tpu.dot_dimension_numbers<[1], [0], [0], [1], [0, 0, 1, 1], [], []>} : vector<8x128xf32>, vector<128x128xf32>, vector<8x128xf32> -> vector<8x128xf32>
    %61 = arith.addf %57, %60 : vector<8x128xf32>
    %c0_66 = arith.constant 0 : index
    %c0_67 = arith.constant 0 : index
    %c0_68 = arith.constant 0 : index
    %62 = vector.load %arg2[%c0_66, %c0_67, %c0_68] : memref<5x8x128xf32, #tpu.memory_space<vmem>>, vector<1x8x128xf32>
    %63 = vector.shape_cast %62 : vector<1x8x128xf32> to vector<8x128xf32>
    %c1_69 = arith.constant 1 : index
    %c0_70 = arith.constant 0 : index
    %c0_71 = arith.constant 0 : index
    %64 = vector.load %arg2[%c1_69, %c0_70, %c0_71] : memref<5x8x128xf32, #tpu.memory_space<vmem>>, vector<1x8x128xf32>
    %65 = vector.shape_cast %64 : vector<1x8x128xf32> to vector<8x128xf32>
    %c2_72 = arith.constant 2 : index
    %c0_73 = arith.constant 0 : index
    %c0_74 = arith.constant 0 : index
    %66 = vector.load %arg2[%c2_72, %c0_73, %c0_74] : memref<5x8x128xf32, #tpu.memory_space<vmem>>, vector<1x8x128xf32>
    %67 = vector.shape_cast %66 : vector<1x8x128xf32> to vector<8x128xf32>
    %c3_75 = arith.constant 3 : index
    %c0_76 = arith.constant 0 : index
    %c0_77 = arith.constant 0 : index
    %68 = vector.load %arg2[%c3_75, %c0_76, %c0_77] : memref<5x8x128xf32, #tpu.memory_space<vmem>>, vector<1x8x128xf32>
    %69 = vector.shape_cast %68 : vector<1x8x128xf32> to vector<8x128xf32>
    %c4_78 = arith.constant 4 : index
    %c0_79 = arith.constant 0 : index
    %c0_80 = arith.constant 0 : index
    %70 = vector.load %arg2[%c4_78, %c0_79, %c0_80] : memref<5x8x128xf32, #tpu.memory_space<vmem>>, vector<1x8x128xf32>
    %71 = vector.shape_cast %70 : vector<1x8x128xf32> to vector<8x128xf32>
    %c6 = arith.constant 6 : index
    %c0_81 = arith.constant 0 : index
    %c0_82 = arith.constant 0 : index
    %72 = vector.load %arg5[%c6, %c0_81, %c0_82] : memref<18x128x128xf32, #tpu.memory_space<vmem>>, vector<1x128x128xf32>
    %73 = vector.shape_cast %72 : vector<1x128x128xf32> to vector<128x128xf32>
    %cst_83 = arith.constant dense<0.000000e+00> : vector<8x128xf32>
    %74 = tpu.matmul %63, %73, %cst_83 {dimension_numbers = #tpu.dot_dimension_numbers<[1], [0], [0], [1], [0, 0, 1, 1], [], []>} : vector<8x128xf32>, vector<128x128xf32>, vector<8x128xf32> -> vector<8x128xf32>
    %c6_84 = arith.constant 6 : index
    %c0_85 = arith.constant 0 : index
    %c0_86 = arith.constant 0 : index
    %75 = vector.load %arg5[%c6_84, %c0_85, %c0_86] : memref<18x128x128xf32, #tpu.memory_space<vmem>>, vector<1x128x128xf32>
    %76 = vector.shape_cast %75 : vector<1x128x128xf32> to vector<128x128xf32>
    %cst_87 = arith.constant dense<0.000000e+00> : vector<8x128xf32>
    %77 = tpu.matmul %65, %76, %cst_87 {dimension_numbers = #tpu.dot_dimension_numbers<[1], [0], [0], [1], [0, 0, 1, 1], [], []>} : vector<8x128xf32>, vector<128x128xf32>, vector<8x128xf32> -> vector<8x128xf32>
    %c6_88 = arith.constant 6 : index
    %c0_89 = arith.constant 0 : index
    %c0_90 = arith.constant 0 : index
    %78 = vector.load %arg5[%c6_88, %c0_89, %c0_90] : memref<18x128x128xf32, #tpu.memory_space<vmem>>, vector<1x128x128xf32>
    %79 = vector.shape_cast %78 : vector<1x128x128xf32> to vector<128x128xf32>
    %cst_91 = arith.constant dense<0.000000e+00> : vector<8x128xf32>
    %80 = tpu.matmul %67, %79, %cst_91 {dimension_numbers = #tpu.dot_dimension_numbers<[1], [0], [0], [1], [0, 0, 1, 1], [], []>} : vector<8x128xf32>, vector<128x128xf32>, vector<8x128xf32> -> vector<8x128xf32>
    %c6_92 = arith.constant 6 : index
    %c0_93 = arith.constant 0 : index
    %c0_94 = arith.constant 0 : index
    %81 = vector.load %arg5[%c6_92, %c0_93, %c0_94] : memref<18x128x128xf32, #tpu.memory_space<vmem>>, vector<1x128x128xf32>
    %82 = vector.shape_cast %81 : vector<1x128x128xf32> to vector<128x128xf32>
    %cst_95 = arith.constant dense<0.000000e+00> : vector<8x128xf32>
    %83 = tpu.matmul %69, %82, %cst_95 {dimension_numbers = #tpu.dot_dimension_numbers<[1], [0], [0], [1], [0, 0, 1, 1], [], []>} : vector<8x128xf32>, vector<128x128xf32>, vector<8x128xf32> -> vector<8x128xf32>
    %c6_96 = arith.constant 6 : index
    %c0_97 = arith.constant 0 : index
    %c0_98 = arith.constant 0 : index
    %84 = vector.load %arg5[%c6_96, %c0_97, %c0_98] : memref<18x128x128xf32, #tpu.memory_space<vmem>>, vector<1x128x128xf32>
    %85 = vector.shape_cast %84 : vector<1x128x128xf32> to vector<128x128xf32>
    %cst_99 = arith.constant dense<0.000000e+00> : vector<8x128xf32>
    %86 = tpu.matmul %71, %85, %cst_99 {dimension_numbers = #tpu.dot_dimension_numbers<[1], [0], [0], [1], [0, 0, 1, 1], [], []>} : vector<8x128xf32>, vector<128x128xf32>, vector<8x128xf32> -> vector<8x128xf32>
    %cst_100 = arith.constant 0.000000e+00 : f32
    %87 = vector.broadcast %cst_100 : f32 to vector<8x128xf32>
    %88 = arith.mulf %34, %34 : vector<8x128xf32>
    %cst_101 = arith.constant -0.953165113 : f32
    %89 = vector.broadcast %cst_101 : f32 to vector<8x128xf32>
    %90 = arith.mulf %89, %88 : vector<8x128xf32>
    %c7 = arith.constant 7 : index
    %c0_102 = arith.constant 0 : index
    %c0_103 = arith.constant 0 : index
    %91 = vector.load %arg5[%c7, %c0_102, %c0_103] : memref<18x128x128xf32, #tpu.memory_space<vmem>>, vector<1x128x128xf32>
    %92 = vector.shape_cast %91 : vector<1x128x128xf32> to vector<128x128xf32>
    %cst_104 = arith.constant dense<0.000000e+00> : vector<8x128xf32>
    %93 = tpu.matmul %90, %92, %cst_104 {dimension_numbers = #tpu.dot_dimension_numbers<[1], [0], [0], [1], [0, 0, 1, 1], [], []>} : vector<8x128xf32>, vector<128x128xf32>, vector<8x128xf32> -> vector<8x128xf32>
    %94 = arith.addf %87, %93 : vector<8x128xf32>
    %95 = arith.mulf %47, %47 : vector<8x128xf32>
    %cst_105 = arith.constant 0.169371247 : f32
    %96 = vector.broadcast %cst_105 : f32 to vector<8x128xf32>
    %97 = arith.mulf %96, %95 : vector<8x128xf32>
    %98 = arith.mulf %47, %54 : vector<8x128xf32>
    %cst_106 = arith.constant 0.137970462 : f32
    %99 = vector.broadcast %cst_106 : f32 to vector<8x128xf32>
    %100 = arith.mulf %99, %98 : vector<8x128xf32>
    %101 = arith.addf %97, %100 : vector<8x128xf32>
    %102 = arith.mulf %47, %61 : vector<8x128xf32>
    %cst_107 = arith.constant 0.165783718 : f32
    %103 = vector.broadcast %cst_107 : f32 to vector<8x128xf32>
    %104 = arith.mulf %103, %102 : vector<8x128xf32>
    %105 = arith.addf %101, %104 : vector<8x128xf32>
    %106 = arith.mulf %54, %47 : vector<8x128xf32>
    %cst_108 = arith.constant 0.240564331 : f32
    %107 = vector.broadcast %cst_108 : f32 to vector<8x128xf32>
    %108 = arith.mulf %107, %106 : vector<8x128xf32>
    %109 = arith.addf %105, %108 : vector<8x128xf32>
    %110 = arith.mulf %54, %54 : vector<8x128xf32>
    %cst_109 = arith.constant 0.203870535 : f32
    %111 = vector.broadcast %cst_109 : f32 to vector<8x128xf32>
    %112 = arith.mulf %111, %110 : vector<8x128xf32>
    %113 = arith.addf %109, %112 : vector<8x128xf32>
    %114 = arith.mulf %54, %61 : vector<8x128xf32>
    %cst_110 = arith.constant -0.237153694 : f32
    %115 = vector.broadcast %cst_110 : f32 to vector<8x128xf32>
    %116 = arith.mulf %115, %114 : vector<8x128xf32>
    %117 = arith.addf %113, %116 : vector<8x128xf32>
    %118 = arith.mulf %61, %47 : vector<8x128xf32>
    %cst_111 = arith.constant 0.425187081 : f32
    %119 = vector.broadcast %cst_111 : f32 to vector<8x128xf32>
    %120 = arith.mulf %119, %118 : vector<8x128xf32>
    %121 = arith.addf %117, %120 : vector<8x128xf32>
    %122 = arith.mulf %61, %54 : vector<8x128xf32>
    %cst_112 = arith.constant 0.117993794 : f32
    %123 = vector.broadcast %cst_112 : f32 to vector<8x128xf32>
    %124 = arith.mulf %123, %122 : vector<8x128xf32>
    %125 = arith.addf %121, %124 : vector<8x128xf32>
    %126 = arith.mulf %61, %61 : vector<8x128xf32>
    %cst_113 = arith.constant -0.478820801 : f32
    %127 = vector.broadcast %cst_113 : f32 to vector<8x128xf32>
    %128 = arith.mulf %127, %126 : vector<8x128xf32>
    %129 = arith.addf %125, %128 : vector<8x128xf32>
    %c8 = arith.constant 8 : index
    %c0_114 = arith.constant 0 : index
    %c0_115 = arith.constant 0 : index
    %130 = vector.load %arg5[%c8, %c0_114, %c0_115] : memref<18x128x128xf32, #tpu.memory_space<vmem>>, vector<1x128x128xf32>
    %131 = vector.shape_cast %130 : vector<1x128x128xf32> to vector<128x128xf32>
    %cst_116 = arith.constant dense<0.000000e+00> : vector<8x128xf32>
    %132 = tpu.matmul %129, %131, %cst_116 {dimension_numbers = #tpu.dot_dimension_numbers<[1], [0], [0], [1], [0, 0, 1, 1], [], []>} : vector<8x128xf32>, vector<128x128xf32>, vector<8x128xf32> -> vector<8x128xf32>
    %133 = arith.addf %94, %132 : vector<8x128xf32>
    %134 = arith.mulf %74, %74 : vector<8x128xf32>
    %cst_117 = arith.constant -0.120467164 : f32
    %135 = vector.broadcast %cst_117 : f32 to vector<8x128xf32>
    %136 = arith.mulf %135, %134 : vector<8x128xf32>
    %137 = arith.mulf %74, %77 : vector<8x128xf32>
    %cst_118 = arith.constant -0.0357439667 : f32
    %138 = vector.broadcast %cst_118 : f32 to vector<8x128xf32>
    %139 = arith.mulf %138, %137 : vector<8x128xf32>
    %140 = arith.addf %136, %139 : vector<8x128xf32>
    %141 = arith.mulf %74, %80 : vector<8x128xf32>
    %cst_119 = arith.constant 0.0959046557 : f32
    %142 = vector.broadcast %cst_119 : f32 to vector<8x128xf32>
    %143 = arith.mulf %142, %141 : vector<8x128xf32>
    %144 = arith.addf %140, %143 : vector<8x128xf32>
    %145 = arith.mulf %74, %83 : vector<8x128xf32>
    %cst_120 = arith.constant -0.399783283 : f32
    %146 = vector.broadcast %cst_120 : f32 to vector<8x128xf32>
    %147 = arith.mulf %146, %145 : vector<8x128xf32>
    %148 = arith.addf %144, %147 : vector<8x128xf32>
    %149 = arith.mulf %74, %86 : vector<8x128xf32>
    %cst_121 = arith.constant 0.106661782 : f32
    %150 = vector.broadcast %cst_121 : f32 to vector<8x128xf32>
    %151 = arith.mulf %150, %149 : vector<8x128xf32>
    %152 = arith.addf %148, %151 : vector<8x128xf32>
    %153 = arith.mulf %77, %74 : vector<8x128xf32>
    %cst_122 = arith.constant 0.172449708 : f32
    %154 = vector.broadcast %cst_122 : f32 to vector<8x128xf32>
    %155 = arith.mulf %154, %153 : vector<8x128xf32>
    %156 = arith.addf %152, %155 : vector<8x128xf32>
    %157 = arith.mulf %77, %77 : vector<8x128xf32>
    %cst_123 = arith.constant 0.225934505 : f32
    %158 = vector.broadcast %cst_123 : f32 to vector<8x128xf32>
    %159 = arith.mulf %158, %157 : vector<8x128xf32>
    %160 = arith.addf %156, %159 : vector<8x128xf32>
    %161 = arith.mulf %77, %80 : vector<8x128xf32>
    %cst_124 = arith.constant 0.371126324 : f32
    %162 = vector.broadcast %cst_124 : f32 to vector<8x128xf32>
    %163 = arith.mulf %162, %161 : vector<8x128xf32>
    %164 = arith.addf %160, %163 : vector<8x128xf32>
    %165 = arith.mulf %77, %83 : vector<8x128xf32>
    %cst_125 = arith.constant 0.219415709 : f32
    %166 = vector.broadcast %cst_125 : f32 to vector<8x128xf32>
    %167 = arith.mulf %166, %165 : vector<8x128xf32>
    %168 = arith.addf %164, %167 : vector<8x128xf32>
    %169 = arith.mulf %77, %86 : vector<8x128xf32>
    %cst_126 = arith.constant -0.00281764916 : f32
    %170 = vector.broadcast %cst_126 : f32 to vector<8x128xf32>
    %171 = arith.mulf %170, %169 : vector<8x128xf32>
    %172 = arith.addf %168, %171 : vector<8x128xf32>
    %173 = arith.mulf %80, %74 : vector<8x128xf32>
    %cst_127 = arith.constant 0.0846888944 : f32
    %174 = vector.broadcast %cst_127 : f32 to vector<8x128xf32>
    %175 = arith.mulf %174, %173 : vector<8x128xf32>
    %176 = arith.addf %172, %175 : vector<8x128xf32>
    %177 = arith.mulf %80, %77 : vector<8x128xf32>
    %cst_128 = arith.constant -0.0256050937 : f32
    %178 = vector.broadcast %cst_128 : f32 to vector<8x128xf32>
    %179 = arith.mulf %178, %177 : vector<8x128xf32>
    %180 = arith.addf %176, %179 : vector<8x128xf32>
    %181 = arith.mulf %80, %80 : vector<8x128xf32>
    %cst_129 = arith.constant -0.123893812 : f32
    %182 = vector.broadcast %cst_129 : f32 to vector<8x128xf32>
    %183 = arith.mulf %182, %181 : vector<8x128xf32>
    %184 = arith.addf %180, %183 : vector<8x128xf32>
    %185 = arith.mulf %80, %83 : vector<8x128xf32>
    %cst_130 = arith.constant -0.0954564661 : f32
    %186 = vector.broadcast %cst_130 : f32 to vector<8x128xf32>
    %187 = arith.mulf %186, %185 : vector<8x128xf32>
    %188 = arith.addf %184, %187 : vector<8x128xf32>
    %189 = arith.mulf %80, %86 : vector<8x128xf32>
    %cst_131 = arith.constant -0.118265346 : f32
    %190 = vector.broadcast %cst_131 : f32 to vector<8x128xf32>
    %191 = arith.mulf %190, %189 : vector<8x128xf32>
    %192 = arith.addf %188, %191 : vector<8x128xf32>
    %193 = arith.mulf %83, %74 : vector<8x128xf32>
    %cst_132 = arith.constant 4.177940e-01 : f32
    %194 = vector.broadcast %cst_132 : f32 to vector<8x128xf32>
    %195 = arith.mulf %194, %193 : vector<8x128xf32>
    %196 = arith.addf %192, %195 : vector<8x128xf32>
    %197 = arith.mulf %83, %77 : vector<8x128xf32>
    %cst_133 = arith.constant 0.135787711 : f32
    %198 = vector.broadcast %cst_133 : f32 to vector<8x128xf32>
    %199 = arith.mulf %198, %197 : vector<8x128xf32>
    %200 = arith.addf %196, %199 : vector<8x128xf32>
    %201 = arith.mulf %83, %80 : vector<8x128xf32>
    %cst_134 = arith.constant -0.152645141 : f32
    %202 = vector.broadcast %cst_134 : f32 to vector<8x128xf32>
    %203 = arith.mulf %202, %201 : vector<8x128xf32>
    %204 = arith.addf %200, %203 : vector<8x128xf32>
    %205 = arith.mulf %83, %83 : vector<8x128xf32>
    %cst_135 = arith.constant 0.328950524 : f32
    %206 = vector.broadcast %cst_135 : f32 to vector<8x128xf32>
    %207 = arith.mulf %206, %205 : vector<8x128xf32>
    %208 = arith.addf %204, %207 : vector<8x128xf32>
    %209 = arith.mulf %83, %86 : vector<8x128xf32>
    %cst_136 = arith.constant -0.0625698268 : f32
    %210 = vector.broadcast %cst_136 : f32 to vector<8x128xf32>
    %211 = arith.mulf %210, %209 : vector<8x128xf32>
    %212 = arith.addf %208, %211 : vector<8x128xf32>
    %213 = arith.mulf %86, %74 : vector<8x128xf32>
    %cst_137 = arith.constant -0.0357035846 : f32
    %214 = vector.broadcast %cst_137 : f32 to vector<8x128xf32>
    %215 = arith.mulf %214, %213 : vector<8x128xf32>
    %216 = arith.addf %212, %215 : vector<8x128xf32>
    %217 = arith.mulf %86, %77 : vector<8x128xf32>
    %cst_138 = arith.constant -0.0494319461 : f32
    %218 = vector.broadcast %cst_138 : f32 to vector<8x128xf32>
    %219 = arith.mulf %218, %217 : vector<8x128xf32>
    %220 = arith.addf %216, %219 : vector<8x128xf32>
    %221 = arith.mulf %86, %80 : vector<8x128xf32>
    %cst_139 = arith.constant 0.0198908765 : f32
    %222 = vector.broadcast %cst_139 : f32 to vector<8x128xf32>
    %223 = arith.mulf %222, %221 : vector<8x128xf32>
    %224 = arith.addf %220, %223 : vector<8x128xf32>
    %225 = arith.mulf %86, %83 : vector<8x128xf32>
    %cst_140 = arith.constant 0.426464468 : f32
    %226 = vector.broadcast %cst_140 : f32 to vector<8x128xf32>
    %227 = arith.mulf %226, %225 : vector<8x128xf32>
    %228 = arith.addf %224, %227 : vector<8x128xf32>
    %229 = arith.mulf %86, %86 : vector<8x128xf32>
    %cst_141 = arith.constant 0.15289095 : f32
    %230 = vector.broadcast %cst_141 : f32 to vector<8x128xf32>
    %231 = arith.mulf %230, %229 : vector<8x128xf32>
    %232 = arith.addf %228, %231 : vector<8x128xf32>
    %c9 = arith.constant 9 : index
    %c0_142 = arith.constant 0 : index
    %c0_143 = arith.constant 0 : index
    %233 = vector.load %arg5[%c9, %c0_142, %c0_143] : memref<18x128x128xf32, #tpu.memory_space<vmem>>, vector<1x128x128xf32>
    %234 = vector.shape_cast %233 : vector<1x128x128xf32> to vector<128x128xf32>
    %cst_144 = arith.constant dense<0.000000e+00> : vector<8x128xf32>
    %235 = tpu.matmul %232, %234, %cst_144 {dimension_numbers = #tpu.dot_dimension_numbers<[1], [0], [0], [1], [0, 0, 1, 1], [], []>} : vector<8x128xf32>, vector<128x128xf32>, vector<8x128xf32> -> vector<8x128xf32>
    %236 = arith.addf %133, %235 : vector<8x128xf32>
    %237 = vector.extract_strided_slice %0 {offsets = [2, 0], sizes = [1, 128], strides = [1, 1]} : vector<8x128xf32> to vector<1x128xf32>
    %238 = vector.broadcast %237 : vector<1x128xf32> to vector<8x128xf32>
    %239 = arith.addf %236, %238 : vector<8x128xf32>
    %cst_145 = arith.constant 0.000000e+00 : f32
    %240 = vector.broadcast %cst_145 : f32 to vector<8x128xf32>
    %241 = arith.mulf %34, %47 : vector<8x128xf32>
    %cst_146 = arith.constant 0.336595416 : f32
    %242 = vector.broadcast %cst_146 : f32 to vector<8x128xf32>
    %243 = arith.mulf %242, %241 : vector<8x128xf32>
    %244 = arith.mulf %34, %54 : vector<8x128xf32>
    %cst_147 = arith.constant 0.646006524 : f32
    %245 = vector.broadcast %cst_147 : f32 to vector<8x128xf32>
    %246 = arith.mulf %245, %244 : vector<8x128xf32>
    %247 = arith.addf %243, %246 : vector<8x128xf32>
    %248 = arith.mulf %34, %61 : vector<8x128xf32>
    %cst_148 = arith.constant -0.104573302 : f32
    %249 = vector.broadcast %cst_148 : f32 to vector<8x128xf32>
    %250 = arith.mulf %249, %248 : vector<8x128xf32>
    %251 = arith.addf %247, %250 : vector<8x128xf32>
    %c10 = arith.constant 10 : index
    %c0_149 = arith.constant 0 : index
    %c0_150 = arith.constant 0 : index
    %252 = vector.load %arg5[%c10, %c0_149, %c0_150] : memref<18x128x128xf32, #tpu.memory_space<vmem>>, vector<1x128x128xf32>
    %253 = vector.shape_cast %252 : vector<1x128x128xf32> to vector<128x128xf32>
    %cst_151 = arith.constant dense<0.000000e+00> : vector<8x128xf32>
    %254 = tpu.matmul %251, %253, %cst_151 {dimension_numbers = #tpu.dot_dimension_numbers<[1], [0], [0], [1], [0, 0, 1, 1], [], []>} : vector<8x128xf32>, vector<128x128xf32>, vector<8x128xf32> -> vector<8x128xf32>
    %255 = arith.addf %240, %254 : vector<8x128xf32>
    %256 = arith.mulf %47, %47 : vector<8x128xf32>
    %cst_152 = arith.constant -0.157583058 : f32
    %257 = vector.broadcast %cst_152 : f32 to vector<8x128xf32>
    %258 = arith.mulf %257, %256 : vector<8x128xf32>
    %259 = arith.mulf %47, %54 : vector<8x128xf32>
    %cst_153 = arith.constant 1.531990e-02 : f32
    %260 = vector.broadcast %cst_153 : f32 to vector<8x128xf32>
    %261 = arith.mulf %260, %259 : vector<8x128xf32>
    %262 = arith.addf %258, %261 : vector<8x128xf32>
    %263 = arith.mulf %47, %61 : vector<8x128xf32>
    %cst_154 = arith.constant 0.04645136 : f32
    %264 = vector.broadcast %cst_154 : f32 to vector<8x128xf32>
    %265 = arith.mulf %264, %263 : vector<8x128xf32>
    %266 = arith.addf %262, %265 : vector<8x128xf32>
    %267 = arith.mulf %54, %47 : vector<8x128xf32>
    %cst_155 = arith.constant 0.149309412 : f32
    %268 = vector.broadcast %cst_155 : f32 to vector<8x128xf32>
    %269 = arith.mulf %268, %267 : vector<8x128xf32>
    %270 = arith.addf %266, %269 : vector<8x128xf32>
    %271 = arith.mulf %54, %54 : vector<8x128xf32>
    %cst_156 = arith.constant -0.351670861 : f32
    %272 = vector.broadcast %cst_156 : f32 to vector<8x128xf32>
    %273 = arith.mulf %272, %271 : vector<8x128xf32>
    %274 = arith.addf %270, %273 : vector<8x128xf32>
    %275 = arith.mulf %54, %61 : vector<8x128xf32>
    %cst_157 = arith.constant 0.19383584 : f32
    %276 = vector.broadcast %cst_157 : f32 to vector<8x128xf32>
    %277 = arith.mulf %276, %275 : vector<8x128xf32>
    %278 = arith.addf %274, %277 : vector<8x128xf32>
    %279 = arith.mulf %61, %47 : vector<8x128xf32>
    %cst_158 = arith.constant 0.376659155 : f32
    %280 = vector.broadcast %cst_158 : f32 to vector<8x128xf32>
    %281 = arith.mulf %280, %279 : vector<8x128xf32>
    %282 = arith.addf %278, %281 : vector<8x128xf32>
    %283 = arith.mulf %61, %54 : vector<8x128xf32>
    %cst_159 = arith.constant -0.586823165 : f32
    %284 = vector.broadcast %cst_159 : f32 to vector<8x128xf32>
    %285 = arith.mulf %284, %283 : vector<8x128xf32>
    %286 = arith.addf %282, %285 : vector<8x128xf32>
    %287 = arith.mulf %61, %61 : vector<8x128xf32>
    %cst_160 = arith.constant -6.063830e-03 : f32
    %288 = vector.broadcast %cst_160 : f32 to vector<8x128xf32>
    %289 = arith.mulf %288, %287 : vector<8x128xf32>
    %290 = arith.addf %286, %289 : vector<8x128xf32>
    %c11 = arith.constant 11 : index
    %c0_161 = arith.constant 0 : index
    %c0_162 = arith.constant 0 : index
    %291 = vector.load %arg5[%c11, %c0_161, %c0_162] : memref<18x128x128xf32, #tpu.memory_space<vmem>>, vector<1x128x128xf32>
    %292 = vector.shape_cast %291 : vector<1x128x128xf32> to vector<128x128xf32>
    %cst_163 = arith.constant dense<0.000000e+00> : vector<8x128xf32>
    %293 = tpu.matmul %290, %292, %cst_163 {dimension_numbers = #tpu.dot_dimension_numbers<[1], [0], [0], [1], [0, 0, 1, 1], [], []>} : vector<8x128xf32>, vector<128x128xf32>, vector<8x128xf32> -> vector<8x128xf32>
    %294 = arith.addf %255, %293 : vector<8x128xf32>
    %295 = arith.mulf %47, %74 : vector<8x128xf32>
    %cst_164 = arith.constant -0.129245147 : f32
    %296 = vector.broadcast %cst_164 : f32 to vector<8x128xf32>
    %297 = arith.mulf %296, %295 : vector<8x128xf32>
    %298 = arith.mulf %47, %77 : vector<8x128xf32>
    %cst_165 = arith.constant -0.111093506 : f32
    %299 = vector.broadcast %cst_165 : f32 to vector<8x128xf32>
    %300 = arith.mulf %299, %298 : vector<8x128xf32>
    %301 = arith.addf %297, %300 : vector<8x128xf32>
    %302 = arith.mulf %47, %80 : vector<8x128xf32>
    %cst_166 = arith.constant -0.524890244 : f32
    %303 = vector.broadcast %cst_166 : f32 to vector<8x128xf32>
    %304 = arith.mulf %303, %302 : vector<8x128xf32>
    %305 = arith.addf %301, %304 : vector<8x128xf32>
    %306 = arith.mulf %47, %83 : vector<8x128xf32>
    %cst_167 = arith.constant -0.0288443621 : f32
    %307 = vector.broadcast %cst_167 : f32 to vector<8x128xf32>
    %308 = arith.mulf %307, %306 : vector<8x128xf32>
    %309 = arith.addf %305, %308 : vector<8x128xf32>
    %310 = arith.mulf %47, %86 : vector<8x128xf32>
    %cst_168 = arith.constant -0.160226569 : f32
    %311 = vector.broadcast %cst_168 : f32 to vector<8x128xf32>
    %312 = arith.mulf %311, %310 : vector<8x128xf32>
    %313 = arith.addf %309, %312 : vector<8x128xf32>
    %314 = arith.mulf %54, %74 : vector<8x128xf32>
    %cst_169 = arith.constant 0.021897573 : f32
    %315 = vector.broadcast %cst_169 : f32 to vector<8x128xf32>
    %316 = arith.mulf %315, %314 : vector<8x128xf32>
    %317 = arith.addf %313, %316 : vector<8x128xf32>
    %318 = arith.mulf %54, %77 : vector<8x128xf32>
    %cst_170 = arith.constant -0.020165801 : f32
    %319 = vector.broadcast %cst_170 : f32 to vector<8x128xf32>
    %320 = arith.mulf %319, %318 : vector<8x128xf32>
    %321 = arith.addf %317, %320 : vector<8x128xf32>
    %322 = arith.mulf %54, %80 : vector<8x128xf32>
    %cst_171 = arith.constant -0.100423142 : f32
    %323 = vector.broadcast %cst_171 : f32 to vector<8x128xf32>
    %324 = arith.mulf %323, %322 : vector<8x128xf32>
    %325 = arith.addf %321, %324 : vector<8x128xf32>
    %326 = arith.mulf %54, %83 : vector<8x128xf32>
    %cst_172 = arith.constant 0.314846933 : f32
    %327 = vector.broadcast %cst_172 : f32 to vector<8x128xf32>
    %328 = arith.mulf %327, %326 : vector<8x128xf32>
    %329 = arith.addf %325, %328 : vector<8x128xf32>
    %330 = arith.mulf %54, %86 : vector<8x128xf32>
    %cst_173 = arith.constant 0.198599026 : f32
    %331 = vector.broadcast %cst_173 : f32 to vector<8x128xf32>
    %332 = arith.mulf %331, %330 : vector<8x128xf32>
    %333 = arith.addf %329, %332 : vector<8x128xf32>
    %334 = arith.mulf %61, %74 : vector<8x128xf32>
    %cst_174 = arith.constant -0.224689722 : f32
    %335 = vector.broadcast %cst_174 : f32 to vector<8x128xf32>
    %336 = arith.mulf %335, %334 : vector<8x128xf32>
    %337 = arith.addf %333, %336 : vector<8x128xf32>
    %338 = arith.mulf %61, %77 : vector<8x128xf32>
    %cst_175 = arith.constant 0.458820641 : f32
    %339 = vector.broadcast %cst_175 : f32 to vector<8x128xf32>
    %340 = arith.mulf %339, %338 : vector<8x128xf32>
    %341 = arith.addf %337, %340 : vector<8x128xf32>
    %342 = arith.mulf %61, %80 : vector<8x128xf32>
    %cst_176 = arith.constant 0.137699053 : f32
    %343 = vector.broadcast %cst_176 : f32 to vector<8x128xf32>
    %344 = arith.mulf %343, %342 : vector<8x128xf32>
    %345 = arith.addf %341, %344 : vector<8x128xf32>
    %346 = arith.mulf %61, %83 : vector<8x128xf32>
    %cst_177 = arith.constant 0.143663451 : f32
    %347 = vector.broadcast %cst_177 : f32 to vector<8x128xf32>
    %348 = arith.mulf %347, %346 : vector<8x128xf32>
    %349 = arith.addf %345, %348 : vector<8x128xf32>
    %350 = arith.mulf %61, %86 : vector<8x128xf32>
    %cst_178 = arith.constant 0.269842654 : f32
    %351 = vector.broadcast %cst_178 : f32 to vector<8x128xf32>
    %352 = arith.mulf %351, %350 : vector<8x128xf32>
    %353 = arith.addf %349, %352 : vector<8x128xf32>
    %c12 = arith.constant 12 : index
    %c0_179 = arith.constant 0 : index
    %c0_180 = arith.constant 0 : index
    %354 = vector.load %arg5[%c12, %c0_179, %c0_180] : memref<18x128x128xf32, #tpu.memory_space<vmem>>, vector<1x128x128xf32>
    %355 = vector.shape_cast %354 : vector<1x128x128xf32> to vector<128x128xf32>
    %cst_181 = arith.constant dense<0.000000e+00> : vector<8x128xf32>
    %356 = tpu.matmul %353, %355, %cst_181 {dimension_numbers = #tpu.dot_dimension_numbers<[1], [0], [0], [1], [0, 0, 1, 1], [], []>} : vector<8x128xf32>, vector<128x128xf32>, vector<8x128xf32> -> vector<8x128xf32>
    %357 = arith.addf %294, %356 : vector<8x128xf32>
    %358 = arith.mulf %74, %74 : vector<8x128xf32>
    %cst_182 = arith.constant -4.678480e-02 : f32
    %359 = vector.broadcast %cst_182 : f32 to vector<8x128xf32>
    %360 = arith.mulf %359, %358 : vector<8x128xf32>
    %361 = arith.mulf %74, %77 : vector<8x128xf32>
    %cst_183 = arith.constant 0.145008594 : f32
    %362 = vector.broadcast %cst_183 : f32 to vector<8x128xf32>
    %363 = arith.mulf %362, %361 : vector<8x128xf32>
    %364 = arith.addf %360, %363 : vector<8x128xf32>
    %365 = arith.mulf %74, %80 : vector<8x128xf32>
    %cst_184 = arith.constant -0.0805829912 : f32
    %366 = vector.broadcast %cst_184 : f32 to vector<8x128xf32>
    %367 = arith.mulf %366, %365 : vector<8x128xf32>
    %368 = arith.addf %364, %367 : vector<8x128xf32>
    %369 = arith.mulf %74, %83 : vector<8x128xf32>
    %cst_185 = arith.constant -0.00609134044 : f32
    %370 = vector.broadcast %cst_185 : f32 to vector<8x128xf32>
    %371 = arith.mulf %370, %369 : vector<8x128xf32>
    %372 = arith.addf %368, %371 : vector<8x128xf32>
    %373 = arith.mulf %74, %86 : vector<8x128xf32>
    %cst_186 = arith.constant 0.0231064409 : f32
    %374 = vector.broadcast %cst_186 : f32 to vector<8x128xf32>
    %375 = arith.mulf %374, %373 : vector<8x128xf32>
    %376 = arith.addf %372, %375 : vector<8x128xf32>
    %377 = arith.mulf %77, %74 : vector<8x128xf32>
    %cst_187 = arith.constant 0.460975498 : f32
    %378 = vector.broadcast %cst_187 : f32 to vector<8x128xf32>
    %379 = arith.mulf %378, %377 : vector<8x128xf32>
    %380 = arith.addf %376, %379 : vector<8x128xf32>
    %381 = arith.mulf %77, %77 : vector<8x128xf32>
    %cst_188 = arith.constant 0.055959411 : f32
    %382 = vector.broadcast %cst_188 : f32 to vector<8x128xf32>
    %383 = arith.mulf %382, %381 : vector<8x128xf32>
    %384 = arith.addf %380, %383 : vector<8x128xf32>
    %385 = arith.mulf %77, %80 : vector<8x128xf32>
    %cst_189 = arith.constant -0.303982735 : f32
    %386 = vector.broadcast %cst_189 : f32 to vector<8x128xf32>
    %387 = arith.mulf %386, %385 : vector<8x128xf32>
    %388 = arith.addf %384, %387 : vector<8x128xf32>
    %389 = arith.mulf %77, %83 : vector<8x128xf32>
    %cst_190 = arith.constant 0.088053748 : f32
    %390 = vector.broadcast %cst_190 : f32 to vector<8x128xf32>
    %391 = arith.mulf %390, %389 : vector<8x128xf32>
    %392 = arith.addf %388, %391 : vector<8x128xf32>
    %393 = arith.mulf %77, %86 : vector<8x128xf32>
    %cst_191 = arith.constant -0.0755398124 : f32
    %394 = vector.broadcast %cst_191 : f32 to vector<8x128xf32>
    %395 = arith.mulf %394, %393 : vector<8x128xf32>
    %396 = arith.addf %392, %395 : vector<8x128xf32>
    %397 = arith.mulf %80, %74 : vector<8x128xf32>
    %cst_192 = arith.constant 0.343608409 : f32
    %398 = vector.broadcast %cst_192 : f32 to vector<8x128xf32>
    %399 = arith.mulf %398, %397 : vector<8x128xf32>
    %400 = arith.addf %396, %399 : vector<8x128xf32>
    %401 = arith.mulf %80, %77 : vector<8x128xf32>
    %cst_193 = arith.constant 0.3316603 : f32
    %402 = vector.broadcast %cst_193 : f32 to vector<8x128xf32>
    %403 = arith.mulf %402, %401 : vector<8x128xf32>
    %404 = arith.addf %400, %403 : vector<8x128xf32>
    %405 = arith.mulf %80, %80 : vector<8x128xf32>
    %cst_194 = arith.constant 0.00358865713 : f32
    %406 = vector.broadcast %cst_194 : f32 to vector<8x128xf32>
    %407 = arith.mulf %406, %405 : vector<8x128xf32>
    %408 = arith.addf %404, %407 : vector<8x128xf32>
    %409 = arith.mulf %80, %83 : vector<8x128xf32>
    %cst_195 = arith.constant 0.125439972 : f32
    %410 = vector.broadcast %cst_195 : f32 to vector<8x128xf32>
    %411 = arith.mulf %410, %409 : vector<8x128xf32>
    %412 = arith.addf %408, %411 : vector<8x128xf32>
    %413 = arith.mulf %80, %86 : vector<8x128xf32>
    %cst_196 = arith.constant -0.117733538 : f32
    %414 = vector.broadcast %cst_196 : f32 to vector<8x128xf32>
    %415 = arith.mulf %414, %413 : vector<8x128xf32>
    %416 = arith.addf %412, %415 : vector<8x128xf32>
    %417 = arith.mulf %83, %74 : vector<8x128xf32>
    %cst_197 = arith.constant 0.210114762 : f32
    %418 = vector.broadcast %cst_197 : f32 to vector<8x128xf32>
    %419 = arith.mulf %418, %417 : vector<8x128xf32>
    %420 = arith.addf %416, %419 : vector<8x128xf32>
    %421 = arith.mulf %83, %77 : vector<8x128xf32>
    %cst_198 = arith.constant -0.0100391889 : f32
    %422 = vector.broadcast %cst_198 : f32 to vector<8x128xf32>
    %423 = arith.mulf %422, %421 : vector<8x128xf32>
    %424 = arith.addf %420, %423 : vector<8x128xf32>
    %425 = arith.mulf %83, %80 : vector<8x128xf32>
    %cst_199 = arith.constant -0.0699402243 : f32
    %426 = vector.broadcast %cst_199 : f32 to vector<8x128xf32>
    %427 = arith.mulf %426, %425 : vector<8x128xf32>
    %428 = arith.addf %424, %427 : vector<8x128xf32>
    %429 = arith.mulf %83, %83 : vector<8x128xf32>
    %cst_200 = arith.constant 0.0479330048 : f32
    %430 = vector.broadcast %cst_200 : f32 to vector<8x128xf32>
    %431 = arith.mulf %430, %429 : vector<8x128xf32>
    %432 = arith.addf %428, %431 : vector<8x128xf32>
    %433 = arith.mulf %83, %86 : vector<8x128xf32>
    %cst_201 = arith.constant 0.322110474 : f32
    %434 = vector.broadcast %cst_201 : f32 to vector<8x128xf32>
    %435 = arith.mulf %434, %433 : vector<8x128xf32>
    %436 = arith.addf %432, %435 : vector<8x128xf32>
    %437 = arith.mulf %86, %74 : vector<8x128xf32>
    %cst_202 = arith.constant -0.0314349532 : f32
    %438 = vector.broadcast %cst_202 : f32 to vector<8x128xf32>
    %439 = arith.mulf %438, %437 : vector<8x128xf32>
    %440 = arith.addf %436, %439 : vector<8x128xf32>
    %441 = arith.mulf %86, %77 : vector<8x128xf32>
    %cst_203 = arith.constant 0.300313056 : f32
    %442 = vector.broadcast %cst_203 : f32 to vector<8x128xf32>
    %443 = arith.mulf %442, %441 : vector<8x128xf32>
    %444 = arith.addf %440, %443 : vector<8x128xf32>
    %445 = arith.mulf %86, %80 : vector<8x128xf32>
    %cst_204 = arith.constant 0.104981102 : f32
    %446 = vector.broadcast %cst_204 : f32 to vector<8x128xf32>
    %447 = arith.mulf %446, %445 : vector<8x128xf32>
    %448 = arith.addf %444, %447 : vector<8x128xf32>
    %449 = arith.mulf %86, %83 : vector<8x128xf32>
    %cst_205 = arith.constant 0.130535319 : f32
    %450 = vector.broadcast %cst_205 : f32 to vector<8x128xf32>
    %451 = arith.mulf %450, %449 : vector<8x128xf32>
    %452 = arith.addf %448, %451 : vector<8x128xf32>
    %453 = arith.mulf %86, %86 : vector<8x128xf32>
    %cst_206 = arith.constant -1.597790e-01 : f32
    %454 = vector.broadcast %cst_206 : f32 to vector<8x128xf32>
    %455 = arith.mulf %454, %453 : vector<8x128xf32>
    %456 = arith.addf %452, %455 : vector<8x128xf32>
    %c13 = arith.constant 13 : index
    %c0_207 = arith.constant 0 : index
    %c0_208 = arith.constant 0 : index
    %457 = vector.load %arg5[%c13, %c0_207, %c0_208] : memref<18x128x128xf32, #tpu.memory_space<vmem>>, vector<1x128x128xf32>
    %458 = vector.shape_cast %457 : vector<1x128x128xf32> to vector<128x128xf32>
    %cst_209 = arith.constant dense<0.000000e+00> : vector<8x128xf32>
    %459 = tpu.matmul %456, %458, %cst_209 {dimension_numbers = #tpu.dot_dimension_numbers<[1], [0], [0], [1], [0, 0, 1, 1], [], []>} : vector<8x128xf32>, vector<128x128xf32>, vector<8x128xf32> -> vector<8x128xf32>
    %460 = arith.addf %357, %459 : vector<8x128xf32>
    %cst_210 = arith.constant 0.000000e+00 : f32
    %461 = vector.broadcast %cst_210 : f32 to vector<8x128xf32>
    %462 = arith.mulf %34, %47 : vector<8x128xf32>
    %cst_211 = arith.constant -0.12703146 : f32
    %463 = vector.broadcast %cst_211 : f32 to vector<8x128xf32>
    %464 = arith.mulf %463, %462 : vector<8x128xf32>
    %465 = arith.mulf %34, %54 : vector<8x128xf32>
    %cst_212 = arith.constant 0.587578475 : f32
    %466 = vector.broadcast %cst_212 : f32 to vector<8x128xf32>
    %467 = arith.mulf %466, %465 : vector<8x128xf32>
    %468 = arith.addf %464, %467 : vector<8x128xf32>
    %469 = arith.mulf %34, %61 : vector<8x128xf32>
    %cst_213 = arith.constant 0.458481759 : f32
    %470 = vector.broadcast %cst_213 : f32 to vector<8x128xf32>
    %471 = arith.mulf %470, %469 : vector<8x128xf32>
    %472 = arith.addf %468, %471 : vector<8x128xf32>
    %c10_214 = arith.constant 10 : index
    %c0_215 = arith.constant 0 : index
    %c0_216 = arith.constant 0 : index
    %473 = vector.load %arg5[%c10_214, %c0_215, %c0_216] : memref<18x128x128xf32, #tpu.memory_space<vmem>>, vector<1x128x128xf32>
    %474 = vector.shape_cast %473 : vector<1x128x128xf32> to vector<128x128xf32>
    %cst_217 = arith.constant dense<0.000000e+00> : vector<8x128xf32>
    %475 = tpu.matmul %472, %474, %cst_217 {dimension_numbers = #tpu.dot_dimension_numbers<[1], [0], [0], [1], [0, 0, 1, 1], [], []>} : vector<8x128xf32>, vector<128x128xf32>, vector<8x128xf32> -> vector<8x128xf32>
    %476 = arith.addf %461, %475 : vector<8x128xf32>
    %477 = arith.mulf %47, %47 : vector<8x128xf32>
    %cst_218 = arith.constant -0.574495494 : f32
    %478 = vector.broadcast %cst_218 : f32 to vector<8x128xf32>
    %479 = arith.mulf %478, %477 : vector<8x128xf32>
    %480 = arith.mulf %47, %54 : vector<8x128xf32>
    %cst_219 = arith.constant -0.217515901 : f32
    %481 = vector.broadcast %cst_219 : f32 to vector<8x128xf32>
    %482 = arith.mulf %481, %480 : vector<8x128xf32>
    %483 = arith.addf %479, %482 : vector<8x128xf32>
    %484 = arith.mulf %47, %61 : vector<8x128xf32>
    %cst_220 = arith.constant -0.11432606 : f32
    %485 = vector.broadcast %cst_220 : f32 to vector<8x128xf32>
    %486 = arith.mulf %485, %484 : vector<8x128xf32>
    %487 = arith.addf %483, %486 : vector<8x128xf32>
    %488 = arith.mulf %54, %47 : vector<8x128xf32>
    %cst_221 = arith.constant 0.257643253 : f32
    %489 = vector.broadcast %cst_221 : f32 to vector<8x128xf32>
    %490 = arith.mulf %489, %488 : vector<8x128xf32>
    %491 = arith.addf %487, %490 : vector<8x128xf32>
    %492 = arith.mulf %54, %54 : vector<8x128xf32>
    %cst_222 = arith.constant -0.108406089 : f32
    %493 = vector.broadcast %cst_222 : f32 to vector<8x128xf32>
    %494 = arith.mulf %493, %492 : vector<8x128xf32>
    %495 = arith.addf %491, %494 : vector<8x128xf32>
    %496 = arith.mulf %54, %61 : vector<8x128xf32>
    %cst_223 = arith.constant -0.387071252 : f32
    %497 = vector.broadcast %cst_223 : f32 to vector<8x128xf32>
    %498 = arith.mulf %497, %496 : vector<8x128xf32>
    %499 = arith.addf %495, %498 : vector<8x128xf32>
    %500 = arith.mulf %61, %47 : vector<8x128xf32>
    %cst_224 = arith.constant 0.194307253 : f32
    %501 = vector.broadcast %cst_224 : f32 to vector<8x128xf32>
    %502 = arith.mulf %501, %500 : vector<8x128xf32>
    %503 = arith.addf %499, %502 : vector<8x128xf32>
    %504 = arith.mulf %61, %54 : vector<8x128xf32>
    %cst_225 = arith.constant -0.144110203 : f32
    %505 = vector.broadcast %cst_225 : f32 to vector<8x128xf32>
    %506 = arith.mulf %505, %504 : vector<8x128xf32>
    %507 = arith.addf %503, %506 : vector<8x128xf32>
    %508 = arith.mulf %61, %61 : vector<8x128xf32>
    %cst_226 = arith.constant 0.589986205 : f32
    %509 = vector.broadcast %cst_226 : f32 to vector<8x128xf32>
    %510 = arith.mulf %509, %508 : vector<8x128xf32>
    %511 = arith.addf %507, %510 : vector<8x128xf32>
    %c11_227 = arith.constant 11 : index
    %c0_228 = arith.constant 0 : index
    %c0_229 = arith.constant 0 : index
    %512 = vector.load %arg5[%c11_227, %c0_228, %c0_229] : memref<18x128x128xf32, #tpu.memory_space<vmem>>, vector<1x128x128xf32>
    %513 = vector.shape_cast %512 : vector<1x128x128xf32> to vector<128x128xf32>
    %cst_230 = arith.constant dense<0.000000e+00> : vector<8x128xf32>
    %514 = tpu.matmul %511, %513, %cst_230 {dimension_numbers = #tpu.dot_dimension_numbers<[1], [0], [0], [1], [0, 0, 1, 1], [], []>} : vector<8x128xf32>, vector<128x128xf32>, vector<8x128xf32> -> vector<8x128xf32>
    %515 = arith.addf %476, %514 : vector<8x128xf32>
    %516 = arith.mulf %47, %74 : vector<8x128xf32>
    %cst_231 = arith.constant 0.131018177 : f32
    %517 = vector.broadcast %cst_231 : f32 to vector<8x128xf32>
    %518 = arith.mulf %517, %516 : vector<8x128xf32>
    %519 = arith.mulf %47, %77 : vector<8x128xf32>
    %cst_232 = arith.constant 0.0605303533 : f32
    %520 = vector.broadcast %cst_232 : f32 to vector<8x128xf32>
    %521 = arith.mulf %520, %519 : vector<8x128xf32>
    %522 = arith.addf %518, %521 : vector<8x128xf32>
    %523 = arith.mulf %47, %80 : vector<8x128xf32>
    %cst_233 = arith.constant 0.107709095 : f32
    %524 = vector.broadcast %cst_233 : f32 to vector<8x128xf32>
    %525 = arith.mulf %524, %523 : vector<8x128xf32>
    %526 = arith.addf %522, %525 : vector<8x128xf32>
    %527 = arith.mulf %47, %83 : vector<8x128xf32>
    %cst_234 = arith.constant -0.256063968 : f32
    %528 = vector.broadcast %cst_234 : f32 to vector<8x128xf32>
    %529 = arith.mulf %528, %527 : vector<8x128xf32>
    %530 = arith.addf %526, %529 : vector<8x128xf32>
    %531 = arith.mulf %47, %86 : vector<8x128xf32>
    %cst_235 = arith.constant -0.459044397 : f32
    %532 = vector.broadcast %cst_235 : f32 to vector<8x128xf32>
    %533 = arith.mulf %532, %531 : vector<8x128xf32>
    %534 = arith.addf %530, %533 : vector<8x128xf32>
    %535 = arith.mulf %54, %74 : vector<8x128xf32>
    %cst_236 = arith.constant 0.00645309687 : f32
    %536 = vector.broadcast %cst_236 : f32 to vector<8x128xf32>
    %537 = arith.mulf %536, %535 : vector<8x128xf32>
    %538 = arith.addf %534, %537 : vector<8x128xf32>
    %539 = arith.mulf %54, %77 : vector<8x128xf32>
    %cst_237 = arith.constant 0.418112457 : f32
    %540 = vector.broadcast %cst_237 : f32 to vector<8x128xf32>
    %541 = arith.mulf %540, %539 : vector<8x128xf32>
    %542 = arith.addf %538, %541 : vector<8x128xf32>
    %543 = arith.mulf %54, %80 : vector<8x128xf32>
    %cst_238 = arith.constant -0.0398756675 : f32
    %544 = vector.broadcast %cst_238 : f32 to vector<8x128xf32>
    %545 = arith.mulf %544, %543 : vector<8x128xf32>
    %546 = arith.addf %542, %545 : vector<8x128xf32>
    %547 = arith.mulf %54, %83 : vector<8x128xf32>
    %cst_239 = arith.constant -0.159208074 : f32
    %548 = vector.broadcast %cst_239 : f32 to vector<8x128xf32>
    %549 = arith.mulf %548, %547 : vector<8x128xf32>
    %550 = arith.addf %546, %549 : vector<8x128xf32>
    %551 = arith.mulf %54, %86 : vector<8x128xf32>
    %cst_240 = arith.constant 0.142441556 : f32
    %552 = vector.broadcast %cst_240 : f32 to vector<8x128xf32>
    %553 = arith.mulf %552, %551 : vector<8x128xf32>
    %554 = arith.addf %550, %553 : vector<8x128xf32>
    %555 = arith.mulf %61, %74 : vector<8x128xf32>
    %cst_241 = arith.constant -0.162540704 : f32
    %556 = vector.broadcast %cst_241 : f32 to vector<8x128xf32>
    %557 = arith.mulf %556, %555 : vector<8x128xf32>
    %558 = arith.addf %554, %557 : vector<8x128xf32>
    %559 = arith.mulf %61, %77 : vector<8x128xf32>
    %cst_242 = arith.constant -0.256251663 : f32
    %560 = vector.broadcast %cst_242 : f32 to vector<8x128xf32>
    %561 = arith.mulf %560, %559 : vector<8x128xf32>
    %562 = arith.addf %558, %561 : vector<8x128xf32>
    %563 = arith.mulf %61, %80 : vector<8x128xf32>
    %cst_243 = arith.constant -0.0299948342 : f32
    %564 = vector.broadcast %cst_243 : f32 to vector<8x128xf32>
    %565 = arith.mulf %564, %563 : vector<8x128xf32>
    %566 = arith.addf %562, %565 : vector<8x128xf32>
    %567 = arith.mulf %61, %83 : vector<8x128xf32>
    %cst_244 = arith.constant 0.144320354 : f32
    %568 = vector.broadcast %cst_244 : f32 to vector<8x128xf32>
    %569 = arith.mulf %568, %567 : vector<8x128xf32>
    %570 = arith.addf %566, %569 : vector<8x128xf32>
    %571 = arith.mulf %61, %86 : vector<8x128xf32>
    %cst_245 = arith.constant 0.0549379028 : f32
    %572 = vector.broadcast %cst_245 : f32 to vector<8x128xf32>
    %573 = arith.mulf %572, %571 : vector<8x128xf32>
    %574 = arith.addf %570, %573 : vector<8x128xf32>
    %c12_246 = arith.constant 12 : index
    %c0_247 = arith.constant 0 : index
    %c0_248 = arith.constant 0 : index
    %575 = vector.load %arg5[%c12_246, %c0_247, %c0_248] : memref<18x128x128xf32, #tpu.memory_space<vmem>>, vector<1x128x128xf32>
    %576 = vector.shape_cast %575 : vector<1x128x128xf32> to vector<128x128xf32>
    %cst_249 = arith.constant dense<0.000000e+00> : vector<8x128xf32>
    %577 = tpu.matmul %574, %576, %cst_249 {dimension_numbers = #tpu.dot_dimension_numbers<[1], [0], [0], [1], [0, 0, 1, 1], [], []>} : vector<8x128xf32>, vector<128x128xf32>, vector<8x128xf32> -> vector<8x128xf32>
    %578 = arith.addf %515, %577 : vector<8x128xf32>
    %579 = arith.mulf %74, %74 : vector<8x128xf32>
    %cst_250 = arith.constant -0.0229475871 : f32
    %580 = vector.broadcast %cst_250 : f32 to vector<8x128xf32>
    %581 = arith.mulf %580, %579 : vector<8x128xf32>
    %582 = arith.mulf %74, %77 : vector<8x128xf32>
    %cst_251 = arith.constant -0.255402297 : f32
    %583 = vector.broadcast %cst_251 : f32 to vector<8x128xf32>
    %584 = arith.mulf %583, %582 : vector<8x128xf32>
    %585 = arith.addf %581, %584 : vector<8x128xf32>
    %586 = arith.mulf %74, %80 : vector<8x128xf32>
    %cst_252 = arith.constant -0.107773855 : f32
    %587 = vector.broadcast %cst_252 : f32 to vector<8x128xf32>
    %588 = arith.mulf %587, %586 : vector<8x128xf32>
    %589 = arith.addf %585, %588 : vector<8x128xf32>
    %590 = arith.mulf %74, %83 : vector<8x128xf32>
    %cst_253 = arith.constant -0.198816508 : f32
    %591 = vector.broadcast %cst_253 : f32 to vector<8x128xf32>
    %592 = arith.mulf %591, %590 : vector<8x128xf32>
    %593 = arith.addf %589, %592 : vector<8x128xf32>
    %594 = arith.mulf %74, %86 : vector<8x128xf32>
    %cst_254 = arith.constant -0.237050384 : f32
    %595 = vector.broadcast %cst_254 : f32 to vector<8x128xf32>
    %596 = arith.mulf %595, %594 : vector<8x128xf32>
    %597 = arith.addf %593, %596 : vector<8x128xf32>
    %598 = arith.mulf %77, %74 : vector<8x128xf32>
    %cst_255 = arith.constant -0.0866487696 : f32
    %599 = vector.broadcast %cst_255 : f32 to vector<8x128xf32>
    %600 = arith.mulf %599, %598 : vector<8x128xf32>
    %601 = arith.addf %597, %600 : vector<8x128xf32>
    %602 = arith.mulf %77, %77 : vector<8x128xf32>
    %cst_256 = arith.constant -0.145304546 : f32
    %603 = vector.broadcast %cst_256 : f32 to vector<8x128xf32>
    %604 = arith.mulf %603, %602 : vector<8x128xf32>
    %605 = arith.addf %601, %604 : vector<8x128xf32>
    %606 = arith.mulf %77, %80 : vector<8x128xf32>
    %cst_257 = arith.constant -0.132594302 : f32
    %607 = vector.broadcast %cst_257 : f32 to vector<8x128xf32>
    %608 = arith.mulf %607, %606 : vector<8x128xf32>
    %609 = arith.addf %605, %608 : vector<8x128xf32>
    %610 = arith.mulf %77, %83 : vector<8x128xf32>
    %cst_258 = arith.constant -0.0371173806 : f32
    %611 = vector.broadcast %cst_258 : f32 to vector<8x128xf32>
    %612 = arith.mulf %611, %610 : vector<8x128xf32>
    %613 = arith.addf %609, %612 : vector<8x128xf32>
    %614 = arith.mulf %77, %86 : vector<8x128xf32>
    %cst_259 = arith.constant -0.138039902 : f32
    %615 = vector.broadcast %cst_259 : f32 to vector<8x128xf32>
    %616 = arith.mulf %615, %614 : vector<8x128xf32>
    %617 = arith.addf %613, %616 : vector<8x128xf32>
    %618 = arith.mulf %80, %74 : vector<8x128xf32>
    %cst_260 = arith.constant -0.149640292 : f32
    %619 = vector.broadcast %cst_260 : f32 to vector<8x128xf32>
    %620 = arith.mulf %619, %618 : vector<8x128xf32>
    %621 = arith.addf %617, %620 : vector<8x128xf32>
    %622 = arith.mulf %80, %77 : vector<8x128xf32>
    %cst_261 = arith.constant 0.139821425 : f32
    %623 = vector.broadcast %cst_261 : f32 to vector<8x128xf32>
    %624 = arith.mulf %623, %622 : vector<8x128xf32>
    %625 = arith.addf %621, %624 : vector<8x128xf32>
    %626 = arith.mulf %80, %80 : vector<8x128xf32>
    %cst_262 = arith.constant 2.692160e-01 : f32
    %627 = vector.broadcast %cst_262 : f32 to vector<8x128xf32>
    %628 = arith.mulf %627, %626 : vector<8x128xf32>
    %629 = arith.addf %625, %628 : vector<8x128xf32>
    %630 = arith.mulf %80, %83 : vector<8x128xf32>
    %cst_263 = arith.constant 0.139563933 : f32
    %631 = vector.broadcast %cst_263 : f32 to vector<8x128xf32>
    %632 = arith.mulf %631, %630 : vector<8x128xf32>
    %633 = arith.addf %629, %632 : vector<8x128xf32>
    %634 = arith.mulf %80, %86 : vector<8x128xf32>
    %cst_264 = arith.constant 0.0752276927 : f32
    %635 = vector.broadcast %cst_264 : f32 to vector<8x128xf32>
    %636 = arith.mulf %635, %634 : vector<8x128xf32>
    %637 = arith.addf %633, %636 : vector<8x128xf32>
    %638 = arith.mulf %83, %74 : vector<8x128xf32>
    %cst_265 = arith.constant 0.280397117 : f32
    %639 = vector.broadcast %cst_265 : f32 to vector<8x128xf32>
    %640 = arith.mulf %639, %638 : vector<8x128xf32>
    %641 = arith.addf %637, %640 : vector<8x128xf32>
    %642 = arith.mulf %83, %77 : vector<8x128xf32>
    %cst_266 = arith.constant 0.0106128082 : f32
    %643 = vector.broadcast %cst_266 : f32 to vector<8x128xf32>
    %644 = arith.mulf %643, %642 : vector<8x128xf32>
    %645 = arith.addf %641, %644 : vector<8x128xf32>
    %646 = arith.mulf %83, %80 : vector<8x128xf32>
    %cst_267 = arith.constant -0.305218756 : f32
    %647 = vector.broadcast %cst_267 : f32 to vector<8x128xf32>
    %648 = arith.mulf %647, %646 : vector<8x128xf32>
    %649 = arith.addf %645, %648 : vector<8x128xf32>
    %650 = arith.mulf %83, %83 : vector<8x128xf32>
    %cst_268 = arith.constant -0.299713761 : f32
    %651 = vector.broadcast %cst_268 : f32 to vector<8x128xf32>
    %652 = arith.mulf %651, %650 : vector<8x128xf32>
    %653 = arith.addf %649, %652 : vector<8x128xf32>
    %654 = arith.mulf %83, %86 : vector<8x128xf32>
    %cst_269 = arith.constant 0.0354796909 : f32
    %655 = vector.broadcast %cst_269 : f32 to vector<8x128xf32>
    %656 = arith.mulf %655, %654 : vector<8x128xf32>
    %657 = arith.addf %653, %656 : vector<8x128xf32>
    %658 = arith.mulf %86, %74 : vector<8x128xf32>
    %cst_270 = arith.constant -0.129430324 : f32
    %659 = vector.broadcast %cst_270 : f32 to vector<8x128xf32>
    %660 = arith.mulf %659, %658 : vector<8x128xf32>
    %661 = arith.addf %657, %660 : vector<8x128xf32>
    %662 = arith.mulf %86, %77 : vector<8x128xf32>
    %cst_271 = arith.constant -0.095677264 : f32
    %663 = vector.broadcast %cst_271 : f32 to vector<8x128xf32>
    %664 = arith.mulf %663, %662 : vector<8x128xf32>
    %665 = arith.addf %661, %664 : vector<8x128xf32>
    %666 = arith.mulf %86, %80 : vector<8x128xf32>
    %cst_272 = arith.constant -0.312393606 : f32
    %667 = vector.broadcast %cst_272 : f32 to vector<8x128xf32>
    %668 = arith.mulf %667, %666 : vector<8x128xf32>
    %669 = arith.addf %665, %668 : vector<8x128xf32>
    %670 = arith.mulf %86, %83 : vector<8x128xf32>
    %cst_273 = arith.constant -0.021742383 : f32
    %671 = vector.broadcast %cst_273 : f32 to vector<8x128xf32>
    %672 = arith.mulf %671, %670 : vector<8x128xf32>
    %673 = arith.addf %669, %672 : vector<8x128xf32>
    %674 = arith.mulf %86, %86 : vector<8x128xf32>
    %cst_274 = arith.constant -0.359718591 : f32
    %675 = vector.broadcast %cst_274 : f32 to vector<8x128xf32>
    %676 = arith.mulf %675, %674 : vector<8x128xf32>
    %677 = arith.addf %673, %676 : vector<8x128xf32>
    %c13_275 = arith.constant 13 : index
    %c0_276 = arith.constant 0 : index
    %c0_277 = arith.constant 0 : index
    %678 = vector.load %arg5[%c13_275, %c0_276, %c0_277] : memref<18x128x128xf32, #tpu.memory_space<vmem>>, vector<1x128x128xf32>
    %679 = vector.shape_cast %678 : vector<1x128x128xf32> to vector<128x128xf32>
    %cst_278 = arith.constant dense<0.000000e+00> : vector<8x128xf32>
    %680 = tpu.matmul %677, %679, %cst_278 {dimension_numbers = #tpu.dot_dimension_numbers<[1], [0], [0], [1], [0, 0, 1, 1], [], []>} : vector<8x128xf32>, vector<128x128xf32>, vector<8x128xf32> -> vector<8x128xf32>
    %681 = arith.addf %578, %680 : vector<8x128xf32>
    %cst_279 = arith.constant 0.000000e+00 : f32
    %682 = vector.broadcast %cst_279 : f32 to vector<8x128xf32>
    %683 = arith.mulf %34, %47 : vector<8x128xf32>
    %cst_280 = arith.constant 0.275453806 : f32
    %684 = vector.broadcast %cst_280 : f32 to vector<8x128xf32>
    %685 = arith.mulf %684, %683 : vector<8x128xf32>
    %686 = arith.mulf %34, %54 : vector<8x128xf32>
    %cst_281 = arith.constant -0.871905565 : f32
    %687 = vector.broadcast %cst_281 : f32 to vector<8x128xf32>
    %688 = arith.mulf %687, %686 : vector<8x128xf32>
    %689 = arith.addf %685, %688 : vector<8x128xf32>
    %690 = arith.mulf %34, %61 : vector<8x128xf32>
    %cst_282 = arith.constant -0.469269454 : f32
    %691 = vector.broadcast %cst_282 : f32 to vector<8x128xf32>
    %692 = arith.mulf %691, %690 : vector<8x128xf32>
    %693 = arith.addf %689, %692 : vector<8x128xf32>
    %c10_283 = arith.constant 10 : index
    %c0_284 = arith.constant 0 : index
    %c0_285 = arith.constant 0 : index
    %694 = vector.load %arg5[%c10_283, %c0_284, %c0_285] : memref<18x128x128xf32, #tpu.memory_space<vmem>>, vector<1x128x128xf32>
    %695 = vector.shape_cast %694 : vector<1x128x128xf32> to vector<128x128xf32>
    %cst_286 = arith.constant dense<0.000000e+00> : vector<8x128xf32>
    %696 = tpu.matmul %693, %695, %cst_286 {dimension_numbers = #tpu.dot_dimension_numbers<[1], [0], [0], [1], [0, 0, 1, 1], [], []>} : vector<8x128xf32>, vector<128x128xf32>, vector<8x128xf32> -> vector<8x128xf32>
    %697 = arith.addf %682, %696 : vector<8x128xf32>
    %698 = arith.mulf %47, %47 : vector<8x128xf32>
    %cst_287 = arith.constant 0.217373893 : f32
    %699 = vector.broadcast %cst_287 : f32 to vector<8x128xf32>
    %700 = arith.mulf %699, %698 : vector<8x128xf32>
    %701 = arith.mulf %47, %54 : vector<8x128xf32>
    %cst_288 = arith.constant 0.170339465 : f32
    %702 = vector.broadcast %cst_288 : f32 to vector<8x128xf32>
    %703 = arith.mulf %702, %701 : vector<8x128xf32>
    %704 = arith.addf %700, %703 : vector<8x128xf32>
    %705 = arith.mulf %47, %61 : vector<8x128xf32>
    %cst_289 = arith.constant -0.0945965647 : f32
    %706 = vector.broadcast %cst_289 : f32 to vector<8x128xf32>
    %707 = arith.mulf %706, %705 : vector<8x128xf32>
    %708 = arith.addf %704, %707 : vector<8x128xf32>
    %709 = arith.mulf %54, %47 : vector<8x128xf32>
    %cst_290 = arith.constant 0.463548452 : f32
    %710 = vector.broadcast %cst_290 : f32 to vector<8x128xf32>
    %711 = arith.mulf %710, %709 : vector<8x128xf32>
    %712 = arith.addf %708, %711 : vector<8x128xf32>
    %713 = arith.mulf %54, %54 : vector<8x128xf32>
    %cst_291 = arith.constant 0.115790427 : f32
    %714 = vector.broadcast %cst_291 : f32 to vector<8x128xf32>
    %715 = arith.mulf %714, %713 : vector<8x128xf32>
    %716 = arith.addf %712, %715 : vector<8x128xf32>
    %717 = arith.mulf %54, %61 : vector<8x128xf32>
    %cst_292 = arith.constant 0.441887587 : f32
    %718 = vector.broadcast %cst_292 : f32 to vector<8x128xf32>
    %719 = arith.mulf %718, %717 : vector<8x128xf32>
    %720 = arith.addf %716, %719 : vector<8x128xf32>
    %721 = arith.mulf %61, %47 : vector<8x128xf32>
    %cst_293 = arith.constant -0.31806609 : f32
    %722 = vector.broadcast %cst_293 : f32 to vector<8x128xf32>
    %723 = arith.mulf %722, %721 : vector<8x128xf32>
    %724 = arith.addf %720, %723 : vector<8x128xf32>
    %725 = arith.mulf %61, %54 : vector<8x128xf32>
    %cst_294 = arith.constant 0.184080437 : f32
    %726 = vector.broadcast %cst_294 : f32 to vector<8x128xf32>
    %727 = arith.mulf %726, %725 : vector<8x128xf32>
    %728 = arith.addf %724, %727 : vector<8x128xf32>
    %729 = arith.mulf %61, %61 : vector<8x128xf32>
    %cst_295 = arith.constant 0.0903359577 : f32
    %730 = vector.broadcast %cst_295 : f32 to vector<8x128xf32>
    %731 = arith.mulf %730, %729 : vector<8x128xf32>
    %732 = arith.addf %728, %731 : vector<8x128xf32>
    %c11_296 = arith.constant 11 : index
    %c0_297 = arith.constant 0 : index
    %c0_298 = arith.constant 0 : index
    %733 = vector.load %arg5[%c11_296, %c0_297, %c0_298] : memref<18x128x128xf32, #tpu.memory_space<vmem>>, vector<1x128x128xf32>
    %734 = vector.shape_cast %733 : vector<1x128x128xf32> to vector<128x128xf32>
    %cst_299 = arith.constant dense<0.000000e+00> : vector<8x128xf32>
    %735 = tpu.matmul %732, %734, %cst_299 {dimension_numbers = #tpu.dot_dimension_numbers<[1], [0], [0], [1], [0, 0, 1, 1], [], []>} : vector<8x128xf32>, vector<128x128xf32>, vector<8x128xf32> -> vector<8x128xf32>
    %736 = arith.addf %697, %735 : vector<8x128xf32>
    %737 = arith.mulf %47, %74 : vector<8x128xf32>
    %cst_300 = arith.constant 0.0286100302 : f32
    %738 = vector.broadcast %cst_300 : f32 to vector<8x128xf32>
    %739 = arith.mulf %738, %737 : vector<8x128xf32>
    %740 = arith.mulf %47, %77 : vector<8x128xf32>
    %cst_301 = arith.constant 0.216896817 : f32
    %741 = vector.broadcast %cst_301 : f32 to vector<8x128xf32>
    %742 = arith.mulf %741, %740 : vector<8x128xf32>
    %743 = arith.addf %739, %742 : vector<8x128xf32>
    %744 = arith.mulf %47, %80 : vector<8x128xf32>
    %cst_302 = arith.constant 0.390601814 : f32
    %745 = vector.broadcast %cst_302 : f32 to vector<8x128xf32>
    %746 = arith.mulf %745, %744 : vector<8x128xf32>
    %747 = arith.addf %743, %746 : vector<8x128xf32>
    %748 = arith.mulf %47, %83 : vector<8x128xf32>
    %cst_303 = arith.constant -2.602060e-01 : f32
    %749 = vector.broadcast %cst_303 : f32 to vector<8x128xf32>
    %750 = arith.mulf %749, %748 : vector<8x128xf32>
    %751 = arith.addf %747, %750 : vector<8x128xf32>
    %752 = arith.mulf %47, %86 : vector<8x128xf32>
    %cst_304 = arith.constant -1.612360e-01 : f32
    %753 = vector.broadcast %cst_304 : f32 to vector<8x128xf32>
    %754 = arith.mulf %753, %752 : vector<8x128xf32>
    %755 = arith.addf %751, %754 : vector<8x128xf32>
    %756 = arith.mulf %54, %74 : vector<8x128xf32>
    %cst_305 = arith.constant 0.0711773634 : f32
    %757 = vector.broadcast %cst_305 : f32 to vector<8x128xf32>
    %758 = arith.mulf %757, %756 : vector<8x128xf32>
    %759 = arith.addf %755, %758 : vector<8x128xf32>
    %760 = arith.mulf %54, %77 : vector<8x128xf32>
    %cst_306 = arith.constant -0.0892860293 : f32
    %761 = vector.broadcast %cst_306 : f32 to vector<8x128xf32>
    %762 = arith.mulf %761, %760 : vector<8x128xf32>
    %763 = arith.addf %759, %762 : vector<8x128xf32>
    %764 = arith.mulf %54, %80 : vector<8x128xf32>
    %cst_307 = arith.constant 0.152114615 : f32
    %765 = vector.broadcast %cst_307 : f32 to vector<8x128xf32>
    %766 = arith.mulf %765, %764 : vector<8x128xf32>
    %767 = arith.addf %763, %766 : vector<8x128xf32>
    %768 = arith.mulf %54, %83 : vector<8x128xf32>
    %cst_308 = arith.constant 0.179948181 : f32
    %769 = vector.broadcast %cst_308 : f32 to vector<8x128xf32>
    %770 = arith.mulf %769, %768 : vector<8x128xf32>
    %771 = arith.addf %767, %770 : vector<8x128xf32>
    %772 = arith.mulf %54, %86 : vector<8x128xf32>
    %cst_309 = arith.constant -0.365947604 : f32
    %773 = vector.broadcast %cst_309 : f32 to vector<8x128xf32>
    %774 = arith.mulf %773, %772 : vector<8x128xf32>
    %775 = arith.addf %771, %774 : vector<8x128xf32>
    %776 = arith.mulf %61, %74 : vector<8x128xf32>
    %cst_310 = arith.constant -0.0484985225 : f32
    %777 = vector.broadcast %cst_310 : f32 to vector<8x128xf32>
    %778 = arith.mulf %777, %776 : vector<8x128xf32>
    %779 = arith.addf %775, %778 : vector<8x128xf32>
    %780 = arith.mulf %61, %77 : vector<8x128xf32>
    %cst_311 = arith.constant 0.181015372 : f32
    %781 = vector.broadcast %cst_311 : f32 to vector<8x128xf32>
    %782 = arith.mulf %781, %780 : vector<8x128xf32>
    %783 = arith.addf %779, %782 : vector<8x128xf32>
    %784 = arith.mulf %61, %80 : vector<8x128xf32>
    %cst_312 = arith.constant 0.623081862 : f32
    %785 = vector.broadcast %cst_312 : f32 to vector<8x128xf32>
    %786 = arith.mulf %785, %784 : vector<8x128xf32>
    %787 = arith.addf %783, %786 : vector<8x128xf32>
    %788 = arith.mulf %61, %83 : vector<8x128xf32>
    %cst_313 = arith.constant 0.247870594 : f32
    %789 = vector.broadcast %cst_313 : f32 to vector<8x128xf32>
    %790 = arith.mulf %789, %788 : vector<8x128xf32>
    %791 = arith.addf %787, %790 : vector<8x128xf32>
    %792 = arith.mulf %61, %86 : vector<8x128xf32>
    %cst_314 = arith.constant -0.0696379393 : f32
    %793 = vector.broadcast %cst_314 : f32 to vector<8x128xf32>
    %794 = arith.mulf %793, %792 : vector<8x128xf32>
    %795 = arith.addf %791, %794 : vector<8x128xf32>
    %c12_315 = arith.constant 12 : index
    %c0_316 = arith.constant 0 : index
    %c0_317 = arith.constant 0 : index
    %796 = vector.load %arg5[%c12_315, %c0_316, %c0_317] : memref<18x128x128xf32, #tpu.memory_space<vmem>>, vector<1x128x128xf32>
    %797 = vector.shape_cast %796 : vector<1x128x128xf32> to vector<128x128xf32>
    %cst_318 = arith.constant dense<0.000000e+00> : vector<8x128xf32>
    %798 = tpu.matmul %795, %797, %cst_318 {dimension_numbers = #tpu.dot_dimension_numbers<[1], [0], [0], [1], [0, 0, 1, 1], [], []>} : vector<8x128xf32>, vector<128x128xf32>, vector<8x128xf32> -> vector<8x128xf32>
    %799 = arith.addf %736, %798 : vector<8x128xf32>
    %800 = arith.mulf %74, %74 : vector<8x128xf32>
    %cst_319 = arith.constant -0.117078289 : f32
    %801 = vector.broadcast %cst_319 : f32 to vector<8x128xf32>
    %802 = arith.mulf %801, %800 : vector<8x128xf32>
    %803 = arith.mulf %74, %77 : vector<8x128xf32>
    %cst_320 = arith.constant 0.636248231 : f32
    %804 = vector.broadcast %cst_320 : f32 to vector<8x128xf32>
    %805 = arith.mulf %804, %803 : vector<8x128xf32>
    %806 = arith.addf %802, %805 : vector<8x128xf32>
    %807 = arith.mulf %74, %80 : vector<8x128xf32>
    %cst_321 = arith.constant 0.132256806 : f32
    %808 = vector.broadcast %cst_321 : f32 to vector<8x128xf32>
    %809 = arith.mulf %808, %807 : vector<8x128xf32>
    %810 = arith.addf %806, %809 : vector<8x128xf32>
    %811 = arith.mulf %74, %83 : vector<8x128xf32>
    %cst_322 = arith.constant -0.417702675 : f32
    %812 = vector.broadcast %cst_322 : f32 to vector<8x128xf32>
    %813 = arith.mulf %812, %811 : vector<8x128xf32>
    %814 = arith.addf %810, %813 : vector<8x128xf32>
    %815 = arith.mulf %74, %86 : vector<8x128xf32>
    %cst_323 = arith.constant 0.248653844 : f32
    %816 = vector.broadcast %cst_323 : f32 to vector<8x128xf32>
    %817 = arith.mulf %816, %815 : vector<8x128xf32>
    %818 = arith.addf %814, %817 : vector<8x128xf32>
    %819 = arith.mulf %77, %74 : vector<8x128xf32>
    %cst_324 = arith.constant -0.00398528297 : f32
    %820 = vector.broadcast %cst_324 : f32 to vector<8x128xf32>
    %821 = arith.mulf %820, %819 : vector<8x128xf32>
    %822 = arith.addf %818, %821 : vector<8x128xf32>
    %823 = arith.mulf %77, %77 : vector<8x128xf32>
    %cst_325 = arith.constant 0.188400865 : f32
    %824 = vector.broadcast %cst_325 : f32 to vector<8x128xf32>
    %825 = arith.mulf %824, %823 : vector<8x128xf32>
    %826 = arith.addf %822, %825 : vector<8x128xf32>
    %827 = arith.mulf %77, %80 : vector<8x128xf32>
    %cst_326 = arith.constant -0.0342525132 : f32
    %828 = vector.broadcast %cst_326 : f32 to vector<8x128xf32>
    %829 = arith.mulf %828, %827 : vector<8x128xf32>
    %830 = arith.addf %826, %829 : vector<8x128xf32>
    %831 = arith.mulf %77, %83 : vector<8x128xf32>
    %cst_327 = arith.constant 0.203807548 : f32
    %832 = vector.broadcast %cst_327 : f32 to vector<8x128xf32>
    %833 = arith.mulf %832, %831 : vector<8x128xf32>
    %834 = arith.addf %830, %833 : vector<8x128xf32>
    %835 = arith.mulf %77, %86 : vector<8x128xf32>
    %cst_328 = arith.constant -0.216003463 : f32
    %836 = vector.broadcast %cst_328 : f32 to vector<8x128xf32>
    %837 = arith.mulf %836, %835 : vector<8x128xf32>
    %838 = arith.addf %834, %837 : vector<8x128xf32>
    %839 = arith.mulf %80, %74 : vector<8x128xf32>
    %cst_329 = arith.constant 0.10621389 : f32
    %840 = vector.broadcast %cst_329 : f32 to vector<8x128xf32>
    %841 = arith.mulf %840, %839 : vector<8x128xf32>
    %842 = arith.addf %838, %841 : vector<8x128xf32>
    %843 = arith.mulf %80, %77 : vector<8x128xf32>
    %cst_330 = arith.constant -0.0427689143 : f32
    %844 = vector.broadcast %cst_330 : f32 to vector<8x128xf32>
    %845 = arith.mulf %844, %843 : vector<8x128xf32>
    %846 = arith.addf %842, %845 : vector<8x128xf32>
    %847 = arith.mulf %80, %80 : vector<8x128xf32>
    %cst_331 = arith.constant -0.0441714823 : f32
    %848 = vector.broadcast %cst_331 : f32 to vector<8x128xf32>
    %849 = arith.mulf %848, %847 : vector<8x128xf32>
    %850 = arith.addf %846, %849 : vector<8x128xf32>
    %851 = arith.mulf %80, %83 : vector<8x128xf32>
    %cst_332 = arith.constant 0.0288743619 : f32
    %852 = vector.broadcast %cst_332 : f32 to vector<8x128xf32>
    %853 = arith.mulf %852, %851 : vector<8x128xf32>
    %854 = arith.addf %850, %853 : vector<8x128xf32>
    %855 = arith.mulf %80, %86 : vector<8x128xf32>
    %cst_333 = arith.constant -0.114081427 : f32
    %856 = vector.broadcast %cst_333 : f32 to vector<8x128xf32>
    %857 = arith.mulf %856, %855 : vector<8x128xf32>
    %858 = arith.addf %854, %857 : vector<8x128xf32>
    %859 = arith.mulf %83, %74 : vector<8x128xf32>
    %cst_334 = arith.constant 0.0580141656 : f32
    %860 = vector.broadcast %cst_334 : f32 to vector<8x128xf32>
    %861 = arith.mulf %860, %859 : vector<8x128xf32>
    %862 = arith.addf %858, %861 : vector<8x128xf32>
    %863 = arith.mulf %83, %77 : vector<8x128xf32>
    %cst_335 = arith.constant -0.175293729 : f32
    %864 = vector.broadcast %cst_335 : f32 to vector<8x128xf32>
    %865 = arith.mulf %864, %863 : vector<8x128xf32>
    %866 = arith.addf %862, %865 : vector<8x128xf32>
    %867 = arith.mulf %83, %80 : vector<8x128xf32>
    %cst_336 = arith.constant -0.219926804 : f32
    %868 = vector.broadcast %cst_336 : f32 to vector<8x128xf32>
    %869 = arith.mulf %868, %867 : vector<8x128xf32>
    %870 = arith.addf %866, %869 : vector<8x128xf32>
    %871 = arith.mulf %83, %83 : vector<8x128xf32>
    %cst_337 = arith.constant -0.191758886 : f32
    %872 = vector.broadcast %cst_337 : f32 to vector<8x128xf32>
    %873 = arith.mulf %872, %871 : vector<8x128xf32>
    %874 = arith.addf %870, %873 : vector<8x128xf32>
    %875 = arith.mulf %83, %86 : vector<8x128xf32>
    %cst_338 = arith.constant 0.316855967 : f32
    %876 = vector.broadcast %cst_338 : f32 to vector<8x128xf32>
    %877 = arith.mulf %876, %875 : vector<8x128xf32>
    %878 = arith.addf %874, %877 : vector<8x128xf32>
    %879 = arith.mulf %86, %74 : vector<8x128xf32>
    %cst_339 = arith.constant 0.169330478 : f32
    %880 = vector.broadcast %cst_339 : f32 to vector<8x128xf32>
    %881 = arith.mulf %880, %879 : vector<8x128xf32>
    %882 = arith.addf %878, %881 : vector<8x128xf32>
    %883 = arith.mulf %86, %77 : vector<8x128xf32>
    %cst_340 = arith.constant -0.290528864 : f32
    %884 = vector.broadcast %cst_340 : f32 to vector<8x128xf32>
    %885 = arith.mulf %884, %883 : vector<8x128xf32>
    %886 = arith.addf %882, %885 : vector<8x128xf32>
    %887 = arith.mulf %86, %80 : vector<8x128xf32>
    %cst_341 = arith.constant -0.126383334 : f32
    %888 = vector.broadcast %cst_341 : f32 to vector<8x128xf32>
    %889 = arith.mulf %888, %887 : vector<8x128xf32>
    %890 = arith.addf %886, %889 : vector<8x128xf32>
    %891 = arith.mulf %86, %83 : vector<8x128xf32>
    %cst_342 = arith.constant -0.235035494 : f32
    %892 = vector.broadcast %cst_342 : f32 to vector<8x128xf32>
    %893 = arith.mulf %892, %891 : vector<8x128xf32>
    %894 = arith.addf %890, %893 : vector<8x128xf32>
    %895 = arith.mulf %86, %86 : vector<8x128xf32>
    %cst_343 = arith.constant -0.143015474 : f32
    %896 = vector.broadcast %cst_343 : f32 to vector<8x128xf32>
    %897 = arith.mulf %896, %895 : vector<8x128xf32>
    %898 = arith.addf %894, %897 : vector<8x128xf32>
    %c13_344 = arith.constant 13 : index
    %c0_345 = arith.constant 0 : index
    %c0_346 = arith.constant 0 : index
    %899 = vector.load %arg5[%c13_344, %c0_345, %c0_346] : memref<18x128x128xf32, #tpu.memory_space<vmem>>, vector<1x128x128xf32>
    %900 = vector.shape_cast %899 : vector<1x128x128xf32> to vector<128x128xf32>
    %cst_347 = arith.constant dense<0.000000e+00> : vector<8x128xf32>
    %901 = tpu.matmul %898, %900, %cst_347 {dimension_numbers = #tpu.dot_dimension_numbers<[1], [0], [0], [1], [0, 0, 1, 1], [], []>} : vector<8x128xf32>, vector<128x128xf32>, vector<8x128xf32> -> vector<8x128xf32>
    %902 = arith.addf %799, %901 : vector<8x128xf32>
    %903 = arith.addf %239, %34 : vector<8x128xf32>
    %904 = arith.addf %460, %47 : vector<8x128xf32>
    %905 = arith.addf %681, %54 : vector<8x128xf32>
    %906 = arith.addf %902, %61 : vector<8x128xf32>
    %cst_348 = arith.constant 0.000000e+00 : f32
    %907 = vector.broadcast %cst_348 : f32 to vector<8x128xf32>
    %908 = arith.mulf %903, %903 : vector<8x128xf32>
    %cst_349 = arith.constant -0.953165113 : f32
    %909 = vector.broadcast %cst_349 : f32 to vector<8x128xf32>
    %910 = arith.mulf %909, %908 : vector<8x128xf32>
    %c14 = arith.constant 14 : index
    %c0_350 = arith.constant 0 : index
    %c0_351 = arith.constant 0 : index
    %911 = vector.load %arg5[%c14, %c0_350, %c0_351] : memref<18x128x128xf32, #tpu.memory_space<vmem>>, vector<1x128x128xf32>
    %912 = vector.shape_cast %911 : vector<1x128x128xf32> to vector<128x128xf32>
    %cst_352 = arith.constant dense<0.000000e+00> : vector<8x128xf32>
    %913 = tpu.matmul %910, %912, %cst_352 {dimension_numbers = #tpu.dot_dimension_numbers<[1], [0], [0], [1], [0, 0, 1, 1], [], []>} : vector<8x128xf32>, vector<128x128xf32>, vector<8x128xf32> -> vector<8x128xf32>
    %914 = arith.addf %907, %913 : vector<8x128xf32>
    %915 = arith.mulf %904, %904 : vector<8x128xf32>
    %cst_353 = arith.constant 0.169371247 : f32
    %916 = vector.broadcast %cst_353 : f32 to vector<8x128xf32>
    %917 = arith.mulf %916, %915 : vector<8x128xf32>
    %918 = arith.mulf %904, %905 : vector<8x128xf32>
    %cst_354 = arith.constant 0.137970462 : f32
    %919 = vector.broadcast %cst_354 : f32 to vector<8x128xf32>
    %920 = arith.mulf %919, %918 : vector<8x128xf32>
    %921 = arith.addf %917, %920 : vector<8x128xf32>
    %922 = arith.mulf %904, %906 : vector<8x128xf32>
    %cst_355 = arith.constant 0.165783718 : f32
    %923 = vector.broadcast %cst_355 : f32 to vector<8x128xf32>
    %924 = arith.mulf %923, %922 : vector<8x128xf32>
    %925 = arith.addf %921, %924 : vector<8x128xf32>
    %926 = arith.mulf %905, %904 : vector<8x128xf32>
    %cst_356 = arith.constant 0.240564331 : f32
    %927 = vector.broadcast %cst_356 : f32 to vector<8x128xf32>
    %928 = arith.mulf %927, %926 : vector<8x128xf32>
    %929 = arith.addf %925, %928 : vector<8x128xf32>
    %930 = arith.mulf %905, %905 : vector<8x128xf32>
    %cst_357 = arith.constant 0.203870535 : f32
    %931 = vector.broadcast %cst_357 : f32 to vector<8x128xf32>
    %932 = arith.mulf %931, %930 : vector<8x128xf32>
    %933 = arith.addf %929, %932 : vector<8x128xf32>
    %934 = arith.mulf %905, %906 : vector<8x128xf32>
    %cst_358 = arith.constant -0.237153694 : f32
    %935 = vector.broadcast %cst_358 : f32 to vector<8x128xf32>
    %936 = arith.mulf %935, %934 : vector<8x128xf32>
    %937 = arith.addf %933, %936 : vector<8x128xf32>
    %938 = arith.mulf %906, %904 : vector<8x128xf32>
    %cst_359 = arith.constant 0.425187081 : f32
    %939 = vector.broadcast %cst_359 : f32 to vector<8x128xf32>
    %940 = arith.mulf %939, %938 : vector<8x128xf32>
    %941 = arith.addf %937, %940 : vector<8x128xf32>
    %942 = arith.mulf %906, %905 : vector<8x128xf32>
    %cst_360 = arith.constant 0.117993794 : f32
    %943 = vector.broadcast %cst_360 : f32 to vector<8x128xf32>
    %944 = arith.mulf %943, %942 : vector<8x128xf32>
    %945 = arith.addf %941, %944 : vector<8x128xf32>
    %946 = arith.mulf %906, %906 : vector<8x128xf32>
    %cst_361 = arith.constant -0.478820801 : f32
    %947 = vector.broadcast %cst_361 : f32 to vector<8x128xf32>
    %948 = arith.mulf %947, %946 : vector<8x128xf32>
    %949 = arith.addf %945, %948 : vector<8x128xf32>
    %c15 = arith.constant 15 : index
    %c0_362 = arith.constant 0 : index
    %c0_363 = arith.constant 0 : index
    %950 = vector.load %arg5[%c15, %c0_362, %c0_363] : memref<18x128x128xf32, #tpu.memory_space<vmem>>, vector<1x128x128xf32>
    %951 = vector.shape_cast %950 : vector<1x128x128xf32> to vector<128x128xf32>
    %cst_364 = arith.constant dense<0.000000e+00> : vector<8x128xf32>
    %952 = tpu.matmul %949, %951, %cst_364 {dimension_numbers = #tpu.dot_dimension_numbers<[1], [0], [0], [1], [0, 0, 1, 1], [], []>} : vector<8x128xf32>, vector<128x128xf32>, vector<8x128xf32> -> vector<8x128xf32>
    %953 = arith.addf %914, %952 : vector<8x128xf32>
    %954 = vector.extract_strided_slice %0 {offsets = [3, 0], sizes = [1, 128], strides = [1, 1]} : vector<8x128xf32> to vector<1x128xf32>
    %955 = vector.broadcast %954 : vector<1x128xf32> to vector<8x128xf32>
    %956 = arith.addf %953, %955 : vector<8x128xf32>
    %957 = arith.addf %956, %903 : vector<8x128xf32>
    %c16 = arith.constant 16 : index
    %c0_365 = arith.constant 0 : index
    %c0_366 = arith.constant 0 : index
    %958 = vector.load %arg5[%c16, %c0_365, %c0_366] : memref<18x128x128xf32, #tpu.memory_space<vmem>>, vector<1x128x128xf32>
    %959 = vector.shape_cast %958 : vector<1x128x128xf32> to vector<128x128xf32>
    %cst_367 = arith.constant dense<0.000000e+00> : vector<8x128xf32>
    %960 = tpu.matmul %957, %959, %cst_367 {dimension_numbers = #tpu.dot_dimension_numbers<[1], [0], [0], [1], [0, 0, 1, 1], [], []>} : vector<8x128xf32>, vector<128x128xf32>, vector<8x128xf32> -> vector<8x128xf32>
    %961 = vector.extract_strided_slice %0 {offsets = [4, 0], sizes = [1, 128], strides = [1, 1]} : vector<8x128xf32> to vector<1x128xf32>
    %962 = vector.broadcast %961 : vector<1x128xf32> to vector<8x128xf32>
    %963 = arith.addf %960, %962 : vector<8x128xf32>
    %cst_368 = arith.constant 0.000000e+00 : f32
    %964 = vector.broadcast %cst_368 : f32 to vector<8x128xf32>
    %965 = arith.maximumf %963, %964 : vector<8x128xf32>
    %c17 = arith.constant 17 : index
    %c0_369 = arith.constant 0 : index
    %c0_370 = arith.constant 0 : index
    %966 = vector.load %arg5[%c17, %c0_369, %c0_370] : memref<18x128x128xf32, #tpu.memory_space<vmem>>, vector<1x128x128xf32>
    %967 = vector.shape_cast %966 : vector<1x128x128xf32> to vector<128x128xf32>
    %cst_371 = arith.constant dense<0.000000e+00> : vector<8x128xf32>
    %968 = tpu.matmul %965, %967, %cst_371 {dimension_numbers = #tpu.dot_dimension_numbers<[1], [0], [0], [1], [0, 0, 1, 1], [], []>} : vector<8x128xf32>, vector<128x128xf32>, vector<8x128xf32> -> vector<8x128xf32>
    %969 = vector.extract_strided_slice %0 {offsets = [5, 0], sizes = [1, 128], strides = [1, 1]} : vector<8x128xf32> to vector<1x128xf32>
    %970 = vector.broadcast %969 : vector<1x128xf32> to vector<8x128xf32>
    %971 = arith.addf %968, %970 : vector<8x128xf32>
    %c0_372 = arith.constant 0 : index
    %c0_373 = arith.constant 0 : index
    %972 = vector.load %arg7[%c0_372, %c0_373] : memref<8x128xf32, #tpu.memory_space<vmem>>, vector<8x128xf32>
    tpu.vector_store %arg7[%c0_372, %c0_373], %971 {strides = array<i32>} : memref<8x128xf32, #tpu.memory_space<vmem>>, vector<8x128xf32>,
    return
  }
}

</mosaic_0001>

<bundles_post_ra>
// kernel: forward.1
= control target key start
LH: loop header
LB: loop body
LE: loop exit
PB: predicated region body
PF: predicated region fallthrough
CT: control target
= control target key end

     0   :  { %12 = vsyncpa [#allocation3], 0  ;;  %s2794_s0 = inlined_call_operand.vmem [shape: f32[1,8,128], index: 0, kind: input, shape index: {}]   ;;  %s2795_s1 = inlined_call_operand.vmem [shape: f32[3,8,128], index: 1, kind: input, shape index: {}]   ;;  %s2796_s2 = inlined_call_operand.vmem [shape: f32[5,8,128], index: 2, kind: input, shape index: {}]   ;;  %s2797_s3 = inlined_call_operand.vmem [shape: f32[8,128], index: 3, kind: input, shape index: {}]   ;;  %s2798_s4 = inlined_call_operand.vmem [shape: f32[3,8,128], index: 4, kind: input, shape index: {}]   ;;  %s2799_s5 = inlined_call_operand.hbm [shape: f32[18,128,128], index: 5, kind: input, shape index: {}]   ;;  %s2800_s6 = inlined_call_operand.hbm [shape: f32[8,128], index: 6, kind: input, shape index: {}]   ;;  %s2801_s7 = inlined_call_operand.vmem [shape: f32[8,128], index: 7, kind: output, shape index: {}]  }
   0x1   :  { %s28_s26 = sshll.u32 %s2799_s5, 4  ;;  %s29_s26 = int_to_ptr.hbm [resolvable:$true] %s28_s26 }
   0x2   :  { %13 = vsyncpa [#allocation5], 0  ;;  %s1629_s27 = smov [#allocation2]   ;;  %s42_s8 = sshll.u32 %s2800_s6, 4  ;;  %s43_s8 = int_to_ptr.hbm [resolvable:$true] %s42_s8 }
   0x3   :  { %s30_s28 = sshll.u32 %s1629_s27, 4  ;;  %s1630_s9 = smov 128   ;;  %s31_s28 = int_to_ptr.vmem [resolvable:$true] %s30_s28 }
   0x4   :  { %s1631_s10 = smov 8   ;;  %s1632_s11 = smov [#allocation4]  }
   0x5   :  { %36 = dma.hbm_to_vmem [thread:$0]  %s29_s26, 36864, %s31_s28, [#allocation3], %s1630_s9, %s1630_s9, %s1631_s10  }
   0x6   :  { %s44_s12 = sshll.u32 %s1632_s11, 4  ;;  %s45_s12 = int_to_ptr.vmem [resolvable:$true] %s44_s12 }
   0x7   :  { %47 = dma.hbm_to_vmem [thread:$0]  %s43_s8, 128, %s45_s12, [#allocation5]  }
   0x8   :  { %1625 = dma.done.wait [#allocation3], 36864  }
   0x9   :  { %1626 = vsyncadd [#allocation3], 4294930432 }
   0xa   :  { %1627 = dma.done.wait [#allocation5], 128  }
   0xb   :  { %1628 = vsyncadd [#allocation5], 4294967168  ;;  %v73_v0 = vld [vmem:[#allocation2 + $0x78] sm:$0xff]  ;;  %v72_v2 = vld [vmem:[#allocation2 + $0x70] sm:$0xff] }
   0xc   :  { %v112_v1 = vld [vmem:[#allocation2 + $0xf8] sm:$0xff]  ;;  %75 = vmatpush.msra.mxu0 %v73_v0  ;;  %v111_v3 = vld [vmem:[#allocation2 + $0xf0] sm:$0xff]  ;;  %v71_v4 = vld [vmem:[#allocation2 + $0x68] sm:$0xff] }
   0xd   :  { %113 = vmatpush.msra.mxu1 %v112_v1  ;;  %157 = vmatpush.msra.mxu3 %v112_v1  ;;  %v110_v5 = vld [vmem:[#allocation2 + $0xe8] sm:$0xff]  ;;  %v70_v6 = vld [vmem:[#allocation2 + $0x60] sm:$0xff]  ;;  %v69_v8 = vld [vmem:[#allocation2 + $0x58] sm:$0xff] }
   0xe   :  { %135 = vmatpush.msra.mxu2 %v112_v1  ;;  %76 = vmatpush.msra.mxu0 %v72_v2  ;;  %v109_v7 = vld [vmem:[#allocation2 + $0xe0] sm:$0xff]  ;;  %v108_v9 = vld [vmem:[#allocation2 + $0xd8] sm:$0xff]  ;;  %v68_v10 = vld [vmem:[#allocation2 + $0x50] sm:$0xff] }
   0xf   :  { %114 = vmatpush.msra.mxu1 %v111_v3  ;;  %158 = vmatpush.msra.mxu3 %v111_v3  ;;  %v107_v11 = vld [vmem:[#allocation2 + $0xd0] sm:$0xff]  ;;  %v67_v12 = vld [vmem:[#allocation2 + $0x48] sm:$0xff]  ;;  %v66_v14 = vld [vmem:[#allocation2 + $0x40] sm:$0xff] }
  0x10   :  { %136 = vmatpush.msra.mxu2 %v111_v3  ;;  %77 = vmatpush.msra.mxu0 %v71_v4  ;;  %v106_v13 = vld [vmem:[#allocation2 + $0xc8] sm:$0xff]  ;;  %v105_v15 = vld [vmem:[#allocation2 + $0xc0] sm:$0xff]  ;;  %v65_v16 = vld [vmem:[#allocation2 + $0x38] sm:$0xff] }
  0x11   :  { %115 = vmatpush.msra.mxu1 %v110_v5  ;;  %159 = vmatpush.msra.mxu3 %v110_v5  ;;  %v104_v17 = vld [vmem:[#allocation2 + $0xb8] sm:$0xff]  ;;  %v64_v18 = vld [vmem:[#allocation2 + $0x30] sm:$0xff]  ;;  %v63_v20 = vld [vmem:[#allocation2 + $0x28] sm:$0xff] }
  0x12   :  { %137 = vmatpush.msra.mxu2 %v110_v5  ;;  %78 = vmatpush.msra.mxu0 %v70_v6  ;;  %v103_v19 = vld [vmem:[#allocation2 + $0xb0] sm:$0xff]  ;;  %v102_v21 = vld [vmem:[#allocation2 + $0xa8] sm:$0xff]  ;;  %v62_v22 = vld [vmem:[#allocation2 + $0x20] sm:$0xff] }
  0x13   :  { %116 = vmatpush.msra.mxu1 %v109_v7  ;;  %160 = vmatpush.msra.mxu3 %v109_v7  ;;  %v101_v23 = vld [vmem:[#allocation2 + $0xa0] sm:$0xff]  ;;  %v61_v24 = vld [vmem:[#allocation2 + $0x18] sm:$0xff]  ;;  %v60_v26 = vld [vmem:[#allocation2 + $0x10] sm:$0xff] }
  0x14   :  { %138 = vmatpush.msra.mxu2 %v109_v7  ;;  %79 = vmatpush.msra.mxu0 %v69_v8  ;;  %v100_v25 = vld [vmem:[#allocation2 + $0x98] sm:$0xff]  ;;  %v99_v27 = vld [vmem:[#allocation2 + $0x90] sm:$0xff]  ;;  %v59_v28 = vld [vmem:[#allocation2 + $0x8] sm:$0xff] }
  0x15   :  { %117 = vmatpush.msra.mxu1 %v108_v9  ;;  %161 = vmatpush.msra.mxu3 %v108_v9  ;;  %v98_v29 = vld [vmem:[#allocation2 + $0x88] sm:$0xff]  ;;  %v58_v30 = vld [vmem:[#allocation2] sm:$0xff]  ;;  %v1565_v34 = vld [vmem:[%s2798_s4 + $0x10] sm:$0xff] }
  0x16   :  { %139 = vmatpush.msra.mxu2 %v108_v9  ;;  %80 = vmatpush.msra.mxu0 %v68_v10  ;;  %v97_v31 = vld [vmem:[#allocation2 + $0x80] sm:$0xff]  ;;  %v1564_v35 = vld [vmem:[%s2798_s4 + $0x8] sm:$0xff]  ;;  %v1691_v36 = vld [vmem:[#allocation2 + $0x278] sm:$0xff] }
  0x17   :  { %118 = vmatpush.msra.mxu1 %v107_v11  ;;  %162 = vmatpush.msra.mxu3 %v107_v11  ;;  %v57_v32 = vld [vmem:[%s2797_s3] sm:$0xff]  ;;  %v194_v37 = vld [vmem:[#allocation2 + $0x178] sm:$0xff]  ;;  %v1695_v40 = vld [vmem:[#allocation2 + $0x270] sm:$0xff] }
  0x18   :  { %140 = vmatpush.msra.mxu2 %v107_v11  ;;  %81 = vmatpush.msra.mxu0 %v67_v12  ;;  %v95_v33 = vld [vmem:[%s2798_s4] sm:$0xff]  ;;  %v1693_v38 = vld [vmem:[#allocation2 + $0x2f8] sm:$0xff]  ;;  %v193_v41 = vld [vmem:[#allocation2 + $0x170] sm:$0xff] }
  0x19   :  { %119 = vmatpush.msra.mxu1 %v106_v13  ;;  %163 = vmatpush.msra.mxu3 %v106_v13  ;;  %v211_v39 = vld [vmem:[#allocation2 + $0x1f8] sm:$0xff]  ;;  %v1698_v42 = vld [vmem:[#allocation2 + $0x2f0] sm:$0xff]  ;;  %v1700_v44 = vld [vmem:[#allocation2 + $0x268] sm:$0xff] }
  0x1a   :  { %141 = vmatpush.msra.mxu2 %v106_v13  ;;  %82 = vmatpush.msra.mxu0 %v66_v14  ;;  %v210_v43 = vld [vmem:[#allocation2 + $0x1f0] sm:$0xff]  ;;  %v192_v45 = vld [vmem:[#allocation2 + $0x168] sm:$0xff]  ;;  %v1706_v48 = vld [vmem:[#allocation2 + $0x260] sm:$0xff] }
  0x1b   :  { %120 = vmatpush.msra.mxu1 %v105_v15  ;;  %164 = vmatpush.msra.mxu3 %v105_v15  ;;  %v1704_v46 = vld [vmem:[#allocation2 + $0x2e8] sm:$0xff]  ;;  %v191_v49 = vld [vmem:[#allocation2 + $0x160] sm:$0xff]  ;;  %v1712_v52 = vld [vmem:[#allocation2 + $0x258] sm:$0xff] }
  0x1c   :  { %142 = vmatpush.msra.mxu2 %v105_v15  ;;  %83 = vmatpush.msra.mxu0 %v65_v16  ;;  %v209_v47 = vld [vmem:[#allocation2 + $0x1e8] sm:$0xff]  ;;  %v1710_v50 = vld [vmem:[#allocation2 + $0x2e0] sm:$0xff]  ;;  %v190_v53 = vld [vmem:[#allocation2 + $0x158] sm:$0xff] }
  0x1d   :  { %121 = vmatpush.msra.mxu1 %v104_v17  ;;  %165 = vmatpush.msra.mxu3 %v104_v17  ;;  %v208_v51 = vld [vmem:[#allocation2 + $0x1e0] sm:$0xff]  ;;  %v1716_v54 = vld [vmem:[#allocation2 + $0x2d8] sm:$0xff]  ;;  %v1718_v56 = vld [vmem:[#allocation2 + $0x250] sm:$0xff] }
  0x1e   :  { %143 = vmatpush.msra.mxu2 %v104_v17  ;;  %84 = vmatpush.msra.mxu0 %v64_v18  ;;  %v207_v55 = vld [vmem:[#allocation2 + $0x1d8] sm:$0xff]  ;;  %v189_v57 = vld [vmem:[#allocation2 + $0x150] sm:$0xff]  ;;  %v1724_v60 = vld [vmem:[#allocation2 + $0x248] sm:$0xff] }
  0x1f   :  { %122 = vmatpush.msra.mxu1 %v103_v19  ;;  %166 = vmatpush.msra.mxu3 %v103_v19  ;;  %v1722_v58 = vld [vmem:[#allocation2 + $0x2d0] sm:$0xff]  ;;  %v188_v61 = vld [vmem:[#allocation2 + $0x148] sm:$0xff]  ;;  %v1730_v0 = vld [vmem:[#allocation2 + $0x240] sm:$0xff] }
  0x20   :  { %144 = vmatpush.msra.mxu2 %v103_v19  ;;  %85 = vmatpush.msra.mxu0 %v63_v20  ;;  %v206_v59 = vld [vmem:[#allocation2 + $0x1d0] sm:$0xff]  ;;  %v1728_v62 = vld [vmem:[#allocation2 + $0x2c8] sm:$0xff]  ;;  %v187_v1 = vld [vmem:[#allocation2 + $0x140] sm:$0xff] }
  0x21   :  { %123 = vmatpush.msra.mxu1 %v102_v21  ;;  %167 = vmatpush.msra.mxu3 %v102_v21  ;;  %v205_v63 = vld [vmem:[#allocation2 + $0x1c8] sm:$0xff]  ;;  %v1734_v2 = vld [vmem:[#allocation2 + $0x2c0] sm:$0xff]  ;;  %v1736_v4 = vld [vmem:[#allocation2 + $0x238] sm:$0xff] }
  0x22   :  { %145 = vmatpush.msra.mxu2 %v102_v21  ;;  %86 = vmatpush.msra.mxu0 %v62_v22  ;;  %v204_v3 = vld [vmem:[#allocation2 + $0x1c0] sm:$0xff]  ;;  %v186_v5 = vld [vmem:[#allocation2 + $0x138] sm:$0xff]  ;;  %v1742_v8 = vld [vmem:[#allocation2 + $0x230] sm:$0xff] }
  0x23   :  { %124 = vmatpush.msra.mxu1 %v101_v23  ;;  %168 = vmatpush.msra.mxu3 %v101_v23  ;;  %v1740_v6 = vld [vmem:[#allocation2 + $0x2b8] sm:$0xff]  ;;  %v185_v9 = vld [vmem:[#allocation2 + $0x130] sm:$0xff]  ;;  %v1748_v12 = vld [vmem:[#allocation2 + $0x228] sm:$0xff] }
  0x24   :  { %146 = vmatpush.msra.mxu2 %v101_v23  ;;  %87 = vmatpush.msra.mxu0 %v61_v24  ;;  %v203_v7 = vld [vmem:[#allocation2 + $0x1b8] sm:$0xff]  ;;  %v1746_v10 = vld [vmem:[#allocation2 + $0x2b0] sm:$0xff]  ;;  %v184_v13 = vld [vmem:[#allocation2 + $0x128] sm:$0xff] }
  0x25   :  { %125 = vmatpush.msra.mxu1 %v100_v25  ;;  %169 = vmatpush.msra.mxu3 %v100_v25  ;;  %v202_v11 = vld [vmem:[#allocation2 + $0x1b0] sm:$0xff]  ;;  %v1752_v14 = vld [vmem:[#allocation2 + $0x2a8] sm:$0xff]  ;;  %v1754_v16 = vld [vmem:[#allocation2 + $0x220] sm:$0xff] }
  0x26   :  { %147 = vmatpush.msra.mxu2 %v100_v25  ;;  %88 = vmatpush.msra.mxu0 %v60_v26  ;;  %v201_v15 = vld [vmem:[#allocation2 + $0x1a8] sm:$0xff]  ;;  %v183_v17 = vld [vmem:[#allocation2 + $0x120] sm:$0xff]  ;;  %v1760_v20 = vld [vmem:[#allocation2 + $0x218] sm:$0xff] }
  0x27   :  { %126 = vmatpush.msra.mxu1 %v99_v27  ;;  %170 = vmatpush.msra.mxu3 %v99_v27  ;;  %v1758_v18 = vld [vmem:[#allocation2 + $0x2a0] sm:$0xff]  ;;  %v182_v21 = vld [vmem:[#allocation2 + $0x118] sm:$0xff]  ;;  %v1766_v24 = vld [vmem:[#allocation2 + $0x210] sm:$0xff] }
  0x28   :  { %148 = vmatpush.msra.mxu2 %v99_v27  ;;  %89 = vmatpush.msra.mxu0 %v59_v28  ;;  %v200_v19 = vld [vmem:[#allocation2 + $0x1a0] sm:$0xff]  ;;  %v1764_v22 = vld [vmem:[#allocation2 + $0x298] sm:$0xff]  ;;  %v181_v25 = vld [vmem:[#allocation2 + $0x110] sm:$0xff] }
  0x29   :  { %127 = vmatpush.msra.mxu1 %v98_v29  ;;  %171 = vmatpush.msra.mxu3 %v98_v29  ;;  %v199_v23 = vld [vmem:[#allocation2 + $0x198] sm:$0xff]  ;;  %v1770_v26 = vld [vmem:[#allocation2 + $0x290] sm:$0xff]  ;;  %v1772_v28 = vld [vmem:[#allocation2 + $0x208] sm:$0xff] }
  0x2a   :  { %149 = vmatpush.msra.mxu2 %v98_v29  ;;  %90 = vmatpush.msra.mxu0 %v58_v30  ;;  %v198_v27 = vld [vmem:[#allocation2 + $0x190] sm:$0xff]  ;;  %v180_v29 = vld [vmem:[#allocation2 + $0x108] sm:$0xff] }
  0x2b   :  { %128 = vmatpush.msra.mxu1 %v97_v31  ;;  %91 = vmatmul.f32.vlgmr.msra.gmra.mxu0 %v57_v32  ;;  %v1776_v30 = vld [vmem:[#allocation2 + $0x288] sm:$0xff]  ;;  %v1778_v32 = vld [vmem:[#allocation2 + $0x200] sm:$0xff] }
  0x2c   :  { %129 = vmatmul.f32.vlgmr.msra.gmra.mxu1 %v95_v33  ;;  %172 = vmatpush.msra.mxu3 %v97_v31  ;;  %v179_v33 = vld [vmem:[#allocation2 + $0x100] sm:$0xff] }
  0x2d   :  { %150 = vmatpush.msra.mxu2 %v97_v31  ;;  %173 = vmatmul.f32.vlgmr.msra.gmra.mxu3 %v1565_v34  ;;  %v197_v31 = vld [vmem:[#allocation2 + $0x188] sm:$0xff]  ;;  %v1782_v34 = vld [vmem:[#allocation2 + $0x280] sm:$0xff] }
  0x2e   :  { %151 = vmatmul.f32.vlgmr.msra.gmra.mxu2 %v1564_v35  ;;  %313 = vmatpush.msrb.mxu3 %v1691_v36  ;;  %v196_v35 = vld [vmem:[#allocation2 + $0x180] sm:$0xff] }
  0x2f   :  { %232 = vmatpush.msrb.mxu1 %v194_v37  ;;  %293 = vmatpush.msrb.mxu2 %v1693_v38  ;;  %v1844_v37 = vld [vmem:[#allocation2 + $0x378] sm:$0xff] }
  0x30   :  { %212 = vmatpush.msrb.mxu0 %v211_v39  ;;  %314 = vmatpush.msrb.mxu3 %v1695_v40  ;;  %v1855_v39 = vld [vmem:[#allocation2 + $0x368] sm:$0xff] }
  0x31   :  { %233 = vmatpush.msrb.mxu1 %v193_v41  ;;  %294 = vmatpush.msrb.mxu2 %v1698_v42  ;;  %v1866_v41 = vld [vmem:[#allocation2 + $0x360] sm:$0xff] }
  0x32   :  { %213 = vmatpush.msrb.mxu0 %v210_v43  ;;  %315 = vmatpush.msrb.mxu3 %v1700_v44  ;;  %v1874_v43 = vld [vmem:[#allocation2 + $0x350] sm:$0xff] }
  0x33   :  { %234 = vmatpush.msrb.mxu1 %v192_v45  ;;  %295 = vmatpush.msrb.mxu2 %v1704_v46  ;;  %v1567_v45 = vld [vmem:[%s2795_s1 + $0x10] sm:$0xff] }
  0x34   :  { %214 = vmatpush.msrb.mxu0 %v209_v47  ;;  %316 = vmatpush.msrb.mxu3 %v1706_v48  ;;  %v1566_v47 = vld [vmem:[%s2795_s1 + $0x8] sm:$0xff] }
  0x35   :  { %235 = vmatpush.msrb.mxu1 %v191_v49  ;;  %296 = vmatpush.msrb.mxu2 %v1710_v50  ;;  %v1896_v49 = vld [vmem:[#allocation2 + $0x330] sm:$0xff] }
  0x36   :  { %215 = vmatpush.msrb.mxu0 %v208_v51  ;;  %317 = vmatpush.msrb.mxu3 %v1712_v52  ;;  %v1904_v51 = vld [vmem:[#allocation2 + $0x320] sm:$0xff] }
  0x37   :  { %236 = vmatpush.msrb.mxu1 %v190_v53  ;;  %297 = vmatpush.msrb.mxu2 %v1716_v54  ;;  %v1912_v53 = vld [vmem:[#allocation2 + $0x310] sm:$0xff] }
  0x38   :  { %216 = vmatpush.msrb.mxu0 %v207_v55  ;;  %318 = vmatpush.msrb.mxu3 %v1718_v56  ;;  %v1920_v55 = vld [vmem:[#allocation2 + $0x300] sm:$0xff] }
  0x39   :  { %237 = vmatpush.msrb.mxu1 %v189_v57  ;;  %298 = vmatpush.msrb.mxu2 %v1722_v58  ;;  %v1570_v57 = vld [vmem:[%s2796_s2 + $0x18] sm:$0xff] }
  0x3a   :  { %217 = vmatpush.msrb.mxu0 %v206_v59  ;;  %319 = vmatpush.msrb.mxu3 %v1724_v60 }
  0x3b   :  { %238 = vmatpush.msrb.mxu1 %v188_v61  ;;  %299 = vmatpush.msrb.mxu2 %v1728_v62  ;;  %v1568_v61 = vld [vmem:[%s2796_s2 + $0x8] sm:$0xff] }
  0x3c   :  { %218 = vmatpush.msrb.mxu0 %v205_v63  ;;  %320 = vmatpush.msrb.mxu3 %v1730_v0 }
  0x3d   :  { %239 = vmatpush.msrb.mxu1 %v187_v1  ;;  %300 = vmatpush.msrb.mxu2 %v1734_v2  ;;  %v1569_v1 = vld [vmem:[%s2796_s2 + $0x10] sm:$0xff] }
  0x3e   :  { %219 = vmatpush.msrb.mxu0 %v204_v3  ;;  %321 = vmatpush.msrb.mxu3 %v1736_v4  ;;  %v597_v3 = vld [vmem:[#allocation2 + $0x478] sm:$0xff] }
  0x3f   :  { %240 = vmatpush.msrb.mxu1 %v186_v5  ;;  %301 = vmatpush.msrb.mxu2 %v1740_v6  ;;  %v595_v5 = vld [vmem:[#allocation2 + $0x468] sm:$0xff] }
  0x40   :  { %220 = vmatpush.msrb.mxu0 %v203_v7  ;;  %322 = vmatpush.msrb.mxu3 %v1742_v8  ;;  %v557_v7 = vld [vmem:[#allocation2 + $0x3f8] sm:$0xff] }
  0x41   :  { %241 = vmatpush.msrb.mxu1 %v185_v9  ;;  %302 = vmatpush.msrb.mxu2 %v1746_v10  ;;  %v556_v9 = vld [vmem:[#allocation2 + $0x3f0] sm:$0xff] }
  0x42   :  { %221 = vmatpush.msrb.mxu0 %v202_v11  ;;  %323 = vmatpush.msrb.mxu3 %v1748_v12  ;;  %v555_v11 = vld [vmem:[#allocation2 + $0x3e8] sm:$0xff] }
  0x43   :  { %242 = vmatpush.msrb.mxu1 %v184_v13  ;;  %303 = vmatpush.msrb.mxu2 %v1752_v14  ;;  %v554_v13 = vld [vmem:[#allocation2 + $0x3e0] sm:$0xff] }
  0x44   :  { %222 = vmatpush.msrb.mxu0 %v201_v15  ;;  %324 = vmatpush.msrb.mxu3 %v1754_v16  ;;  %v553_v15 = vld [vmem:[#allocation2 + $0x3d8] sm:$0xff] }
  0x45   :  { %243 = vmatpush.msrb.mxu1 %v183_v17  ;;  %304 = vmatpush.msrb.mxu2 %v1758_v18  ;;  %v552_v17 = vld [vmem:[#allocation2 + $0x3d0] sm:$0xff] }
  0x46   :  { %223 = vmatpush.msrb.mxu0 %v200_v19  ;;  %325 = vmatpush.msrb.mxu3 %v1760_v20  ;;  %v551_v19 = vld [vmem:[#allocation2 + $0x3c8] sm:$0xff] }
  0x47   :  { %244 = vmatpush.msrb.mxu1 %v182_v21  ;;  %305 = vmatpush.msrb.mxu2 %v1764_v22  ;;  %v550_v21 = vld [vmem:[#allocation2 + $0x3c0] sm:$0xff] }
  0x48   :  { %224 = vmatpush.msrb.mxu0 %v199_v23  ;;  %326 = vmatpush.msrb.mxu3 %v1766_v24  ;;  %v549_v23 = vld [vmem:[#allocation2 + $0x3b8] sm:$0xff] }
  0x49   :  { %245 = vmatpush.msrb.mxu1 %v181_v25  ;;  %306 = vmatpush.msrb.mxu2 %v1770_v26  ;;  %v548_v25 = vld [vmem:[#allocation2 + $0x3b0] sm:$0xff] }
  0x4a   :  { %225 = vmatpush.msrb.mxu0 %v198_v27  ;;  %327 = vmatpush.msrb.mxu3 %v1772_v28  ;;  %v547_v27 = vld [vmem:[#allocation2 + $0x3a8] sm:$0xff] }
  0x4b   :  { %246 = vmatpush.msrb.mxu1 %v180_v29  ;;  %307 = vmatpush.msrb.mxu2 %v1776_v30  ;;  %v1571_v29 = vld [vmem:[%s2796_s2 + $0x20] sm:$0xff] }
  0x4c   :  { %226 = vmatpush.msrb.mxu0 %v197_v31  ;;  %328 = vmatpush.msrb.mxu3 %v1778_v32  ;;  %v1995_v31 = vld [vmem:[#allocation2 + $0x5f0] sm:$0xff] }
  0x4d   :  { %247 = vmatpush.msrb.mxu1 %v179_v33  ;;  %308 = vmatpush.msrb.mxu2 %v1782_v34  ;;  %v2001_v33 = vld [vmem:[#allocation2 + $0x5e0] sm:$0xff] }
  0x4e   :  { %393 = vmatpush.msra.mxu3 %v1691_v36  ;;  %227 = vmatpush.msrb.mxu0 %v196_v35  ;;  %v2007_v35 = vld [vmem:[#allocation2 + $0x5d0] sm:$0xff] }
  0x4f   :  { %353 = vmatpush.msra.mxu1 %v1691_v36  ;;  %373 = vmatpush.msra.mxu2 %v1693_v38  ;;  %v254_v36 = vld [vmem:[%s2795_s1] sm:$0xff] }
  0x50   :  { %394 = vmatpush.msra.mxu3 %v1695_v40  ;;  %333 = vmatpush.msra.mxu0 %v1693_v38  ;;  %v1850_v38 = vld [vmem:[#allocation2 + $0x370] sm:$0xff] }
  0x51   :  { %354 = vmatpush.msra.mxu1 %v1695_v40  ;;  %374 = vmatpush.msra.mxu2 %v1698_v42  ;;  %v177_v40 = vld [vmem:[%s2794_s0] sm:$0xff] }
  0x52   :  { %395 = vmatpush.msra.mxu3 %v1700_v44  ;;  %334 = vmatpush.msra.mxu0 %v1698_v42  ;;  %v1870_v42 = vld [vmem:[#allocation2 + $0x358] sm:$0xff] }
  0x53   :  { %355 = vmatpush.msra.mxu1 %v1700_v44  ;;  %375 = vmatpush.msra.mxu2 %v1704_v46  ;;  %v1878_v44 = vld [vmem:[#allocation2 + $0x348] sm:$0xff] }
  0x54   :  { %396 = vmatpush.msra.mxu3 %v1706_v48  ;;  %335 = vmatpush.msra.mxu0 %v1704_v46  ;;  %v1885_v46 = vld [vmem:[#allocation2 + $0x340] sm:$0xff] }
  0x55   :  { %356 = vmatpush.msra.mxu1 %v1706_v48  ;;  %376 = vmatpush.msra.mxu2 %v1710_v50  ;;  %v1892_v48 = vld [vmem:[#allocation2 + $0x338] sm:$0xff] }
  0x56   :  { %397 = vmatpush.msra.mxu3 %v1712_v52  ;;  %336 = vmatpush.msra.mxu0 %v1710_v50  ;;  %v1900_v50 = vld [vmem:[#allocation2 + $0x328] sm:$0xff] }
  0x57   :  { %357 = vmatpush.msra.mxu1 %v1712_v52  ;;  %377 = vmatpush.msra.mxu2 %v1716_v54  ;;  %v1908_v52 = vld [vmem:[#allocation2 + $0x318] sm:$0xff] }
  0x58   :  { %398 = vmatpush.msra.mxu3 %v1718_v56  ;;  %337 = vmatpush.msra.mxu0 %v1716_v54  ;;  %v1916_v54 = vld [vmem:[#allocation2 + $0x308] sm:$0xff] }
  0x59   :  { %358 = vmatpush.msra.mxu1 %v1718_v56  ;;  %378 = vmatpush.msra.mxu2 %v1722_v58  ;;  %v1922_v56 = vld [vmem:[#allocation4] sm:$0xff] }
  0x5a   :  { %399 = vmatpush.msra.mxu3 %v1724_v60  ;;  %338 = vmatpush.msra.mxu0 %v1722_v58  ;;  %v74_v58 = vperm.slane %v1922_v56, 0 }
  0x5b   :  { %359 = vmatpush.msra.mxu1 %v1724_v60  ;;  %379 = vmatpush.msra.mxu2 %v1728_v62 }
  0x5c   :  { %400 = vmatpush.msra.mxu3 %v1730_v0  ;;  %339 = vmatpush.msra.mxu0 %v1728_v62 }
  0x5d   :  { %360 = vmatpush.msra.mxu1 %v1730_v0  ;;  %380 = vmatpush.msra.mxu2 %v1734_v2 }
  0x5e   :  { %401 = vmatpush.msra.mxu3 %v1736_v4  ;;  %340 = vmatpush.msra.mxu0 %v1734_v2  ;;  %v413_v2 = vld [vmem:[%s2796_s2] sm:$0xff] }
  0x5f   :  { %361 = vmatpush.msra.mxu1 %v1736_v4  ;;  %381 = vmatpush.msra.mxu2 %v1740_v6  ;;  %v596_v4 = vld [vmem:[#allocation2 + $0x470] sm:$0xff] }
  0x60   :  { %402 = vmatpush.msra.mxu3 %v1742_v8  ;;  %341 = vmatpush.msra.mxu0 %v1740_v6  ;;  %v594_v6 = vld [vmem:[#allocation2 + $0x460] sm:$0xff] }
  0x61   :  { %362 = vmatpush.msra.mxu1 %v1742_v8  ;;  %382 = vmatpush.msra.mxu2 %v1746_v10  ;;  %v593_v8 = vld [vmem:[#allocation2 + $0x458] sm:$0xff] }
  0x62   :  { %403 = vmatpush.msra.mxu3 %v1748_v12  ;;  %342 = vmatpush.msra.mxu0 %v1746_v10  ;;  %v592_v10 = vld [vmem:[#allocation2 + $0x450] sm:$0xff] }
  0x63   :  { %363 = vmatpush.msra.mxu1 %v1748_v12  ;;  %383 = vmatpush.msra.mxu2 %v1752_v14  ;;  %v591_v12 = vld [vmem:[#allocation2 + $0x448] sm:$0xff] }
  0x64   :  { %404 = vmatpush.msra.mxu3 %v1754_v16  ;;  %343 = vmatpush.msra.mxu0 %v1752_v14  ;;  %v590_v14 = vld [vmem:[#allocation2 + $0x440] sm:$0xff] }
  0x65   :  { %364 = vmatpush.msra.mxu1 %v1754_v16  ;;  %384 = vmatpush.msra.mxu2 %v1758_v18  ;;  %v589_v16 = vld [vmem:[#allocation2 + $0x438] sm:$0xff] }
  0x66   :  { %405 = vmatpush.msra.mxu3 %v1760_v20  ;;  %344 = vmatpush.msra.mxu0 %v1758_v18  ;;  %v588_v18 = vld [vmem:[#allocation2 + $0x430] sm:$0xff] }
  0x67   :  { %365 = vmatpush.msra.mxu1 %v1760_v20  ;;  %385 = vmatpush.msra.mxu2 %v1764_v22  ;;  %v587_v20 = vld [vmem:[#allocation2 + $0x428] sm:$0xff] }
  0x68   :  { %406 = vmatpush.msra.mxu3 %v1766_v24  ;;  %345 = vmatpush.msra.mxu0 %v1764_v22  ;;  %v586_v22 = vld [vmem:[#allocation2 + $0x420] sm:$0xff] }
  0x69   :  { %329 = vmatmul.f32.vlgmr.msrb.gmra.mxu3 %v254_v36  ;;  %366 = vmatpush.msra.mxu1 %v1766_v24  ;;  %v585_v24 = vld [vmem:[#allocation2 + $0x418] sm:$0xff]  ;;  %v2010_v36 = vld [vmem:[#allocation2 + $0x5c8] sm:$0xff] }
  0x6a   :  { %407 = vmatpush.msra.mxu3 %v1772_v28  ;;  %386 = vmatpush.msra.mxu2 %v1770_v26 }
  0x6b   :  { %346 = vmatpush.msra.mxu0 %v1770_v26  ;;  %367 = vmatpush.msra.mxu1 %v1772_v28  ;;  %v584_v26 = vld [vmem:[#allocation2 + $0x410] sm:$0xff]  ;;  %v583_v28 = vld [vmem:[#allocation2 + $0x408] sm:$0xff] }
  0x6c   :  { %408 = vmatpush.msra.mxu3 %v1778_v32  ;;  %387 = vmatpush.msra.mxu2 %v1776_v30 }
  0x6d   :  { %347 = vmatpush.msra.mxu0 %v1776_v30  ;;  %368 = vmatpush.msra.mxu1 %v1778_v32  ;;  %v1992_v30 = vld [vmem:[#allocation2 + $0x5f8] sm:$0xff]  ;;  %v1998_v32 = vld [vmem:[#allocation2 + $0x5e8] sm:$0xff] }
  0x6e   :  { %499 = vmatpush.msrb.mxu3 %v1844_v37  ;;  %388 = vmatpush.msra.mxu2 %v1782_v34 }
  0x6f   :  { %348 = vmatpush.msra.mxu0 %v1782_v34  ;;  %248 = vmatmul.f32.vlgmr.msrb.gmra.mxu1 %v177_v40  ;;  %v2004_v34 = vld [vmem:[#allocation2 + $0x5d8] sm:$0xff]  ;;  %v2022_v40 = vld [vmem:[#allocation2 + $0x5a8] sm:$0xff] }
  0x70   :  { %500 = vmatpush.msrb.mxu3 %v1850_v38  ;;  %459 = vmatpush.msrb.mxu1 %v1844_v37 }
  0x71   :  { %409 = vmatmul.f32.vlgmr.msra.gmra.mxu3 %v1567_v45  ;;  %v546_v45 = vld [vmem:[#allocation2 + $0x3a0] sm:$0xff] }
  0x72   :  { %501 = vmatpush.msrb.mxu3 %v1855_v39  ;;  %460 = vmatpush.msrb.mxu1 %v1850_v38 }
  0x74   :  { %502 = vmatpush.msrb.mxu3 %v1866_v41  ;;  %461 = vmatpush.msrb.mxu1 %v1855_v39 }
  0x76   :  { %503 = vmatpush.msrb.mxu3 %v1870_v42  ;;  %462 = vmatpush.msrb.mxu1 %v1866_v41 }
  0x77   :  { %369 = vmatmul.f32.vlgmr.msra.gmra.mxu1 %v1566_v47  ;;  %v2038_v47 = vld [vmem:[#allocation2 + $0x580] sm:$0xff] }
  0x78   :  { %504 = vmatpush.msrb.mxu3 %v1874_v43  ;;  %463 = vmatpush.msrb.mxu1 %v1870_v42  ;;  %2872 = vst [vmem:[#allocation12_spill] sm:$0xff] %v2038_v47 }
  0x7a   :  { %505 = vmatpush.msrb.mxu3 %v1878_v44  ;;  %464 = vmatpush.msrb.mxu1 %v1874_v43 }
  0x7c   :  { %506 = vmatpush.msrb.mxu3 %v1885_v46  ;;  %465 = vmatpush.msrb.mxu1 %v1878_v44 }
  0x7e   :  { %507 = vmatpush.msrb.mxu3 %v1892_v48  ;;  %466 = vmatpush.msrb.mxu1 %v1885_v46 }
  0x80   :  { %508 = vmatpush.msrb.mxu3 %v1896_v49  ;;  %467 = vmatpush.msrb.mxu1 %v1892_v48 }
  0x82   :  { %509 = vmatpush.msrb.mxu3 %v1900_v50  ;;  %468 = vmatpush.msrb.mxu1 %v1896_v49 }
  0x84   :  { %510 = vmatpush.msrb.mxu3 %v1904_v51  ;;  %469 = vmatpush.msrb.mxu1 %v1900_v50 }
  0x86   :  { %511 = vmatpush.msrb.mxu3 %v1908_v52  ;;  %470 = vmatpush.msrb.mxu1 %v1904_v51 }
  0x88   :  { %512 = vmatpush.msrb.mxu3 %v1912_v53  ;;  %471 = vmatpush.msrb.mxu1 %v1908_v52 }
  0x8a   :  { %513 = vmatpush.msrb.mxu3 %v1916_v54  ;;  %472 = vmatpush.msrb.mxu1 %v1912_v53 }
  0x8c   :  { %514 = vmatpush.msrb.mxu3 %v1920_v55  ;;  %473 = vmatpush.msrb.mxu1 %v1916_v54 }
  0x8d   :  { %515 = vmatmul.f32.vlgmr.msrb.gmra.mxu3 %v1570_v57  ;;  %v2057_v57 = vld [vmem:[#allocation2 + $0x558] sm:$0xff] }
  0x8e   :  { %474 = vmatpush.msrb.mxu1 %v1920_v55  ;;  %2873 = vst [vmem:[#allocation13_spill] sm:$0xff] %v2057_v57 }
  0x8f   :  { %475 = vmatmul.f32.vlgmr.msrb.gmra.mxu1 %v1568_v61  ;;  %v2069_v61 = vld [vmem:[#allocation2 + $0x678] sm:$0xff] }
  0x90   :  { %598 = vmatpush.msra.mxu1 %v597_v3  ;;  %2877 = vst [vmem:[#allocation17_spill] sm:$0xff] %v2069_v61  ;;  %v2093_v3 = vld [vmem:[#allocation2 + $0x518] sm:$0xff] }
  0x91   :  { %2883 = vst [vmem:[#allocation23_spill] sm:$0xff] %v2093_v3 }
  0x92   :  { %599 = vmatpush.msra.mxu1 %v596_v4  ;;  %v2097_v4 = vld [vmem:[#allocation2 + $0x510] sm:$0xff] }
  0x93   :  { %2884 = vst [vmem:[#allocation24_spill] sm:$0xff] %v2097_v4 }
  0x94   :  { %600 = vmatpush.msra.mxu1 %v595_v5 }
  0x96   :  { %601 = vmatpush.msra.mxu1 %v594_v6  ;;  %v2101_v6 = vld [vmem:[#allocation2 + $0x508] sm:$0xff] }
  0x97   :  { %2885 = vst [vmem:[#allocation25_spill] sm:$0xff] %v2101_v6 }
  0x98   :  { %602 = vmatpush.msra.mxu1 %v593_v8 }
  0x9a   :  { %603 = vmatpush.msra.mxu1 %v592_v10 }
  0x9c   :  { %604 = vmatpush.msra.mxu1 %v591_v12  ;;  %v2110_v12 = vld [vmem:[#allocation2 + $0x668] sm:$0xff] }
  0x9d   :  { %2887 = vst [vmem:[#allocation27_spill] sm:$0xff] %v2110_v12 }
  0x9e   :  { %605 = vmatpush.msra.mxu1 %v590_v14 }
  0xa0   :  { %606 = vmatpush.msra.mxu1 %v589_v16 }
  0xa2   :  { %607 = vmatpush.msra.mxu1 %v588_v18 }
  0xa4   :  { %608 = vmatpush.msra.mxu1 %v587_v20 }
  0xa6   :  { %609 = vmatpush.msra.mxu1 %v586_v22 }
  0xa8   :  { %v92_v59 = vpop.f32.mrf.mxu0  ;;  %610 = vmatpush.msra.mxu1 %v585_v24 }
  0xa9   :  { %v130_v60 = vpop.f32.mrf.mxu1  ;;  %v93_v62 = vadd.f32 %v92_v59, %v74_v58  ;;  %v2061_v58 = vld [vmem:[#allocation2 + $0x550] sm:$0xff]  ;;  %v2063_v59 = vld [vmem:[#allocation2 + $0x548] sm:$0xff] }
  0xaa   :  { %309 = vmatmul.f32.vlgmr.msrb.gmra.mxu2 %v130_v60  ;;  %611 = vmatpush.msra.mxu1 %v584_v26  ;;  %2874 = vst [vmem:[#allocation14_spill] sm:$0xff] %v2061_v58  ;;  %v2067_v60 = vld [vmem:[#allocation2 + $0x540] sm:$0xff] }
  0xab   :  { %479 = vmatpush.msrb.mxu2 %v1844_v37  ;;  %228 = vmatmul.f32.vlgmr.msrb.gmra.mxu0 %v93_v62  ;;  %2875 = vst [vmem:[#allocation15_spill] sm:$0xff] %v2063_v59  ;;  %v2073_v62 = vld [vmem:[#allocation2 + $0x670] sm:$0xff] }
  0xac   :  { %439 = vmatpush.msrb.mxu0 %v1844_v37  ;;  %612 = vmatpush.msra.mxu1 %v583_v28  ;;  %2876 = vst [vmem:[#allocation16_spill] sm:$0xff] %v2067_v60  ;;  %v2141_v28 = vld [vmem:[#allocation2 + $0x648] sm:$0xff] }
  0xad   :  { %480 = vmatpush.msrb.mxu2 %v1850_v38  ;;  %2878 = vst [vmem:[#allocation18_spill] sm:$0xff] %v2073_v62 }
  0xae   :  { %440 = vmatpush.msrb.mxu0 %v1850_v38  ;;  %2894 = vst [vmem:[#allocation34_spill] sm:$0xff] %v2141_v28 }
  0xaf   :  { %481 = vmatpush.msrb.mxu2 %v1855_v39 }
  0xb0   :  { %441 = vmatpush.msrb.mxu0 %v1855_v39  ;;  %v174_v63 = vpop.f32.mrf.mxu3 }
  0xb1   :  { %482 = vmatpush.msrb.mxu2 %v1866_v41  ;;  %v152_v0 = vpop.f32.mrf.mxu2 }
  0xb2   :  { %389 = vmatmul.f32.vlgmr.msra.gmra.mxu2 %v174_v63  ;;  %442 = vmatpush.msrb.mxu0 %v1866_v41  ;;  %v2076_v63 = vld [vmem:[#allocation2 + $0x538] sm:$0xff] }
  0xb3   :  { %483 = vmatpush.msrb.mxu2 %v1870_v42  ;;  %349 = vmatmul.f32.vlgmr.msra.gmra.mxu0 %v152_v0  ;;  %2879 = vst [vmem:[#allocation19_spill] sm:$0xff] %v2076_v63  ;;  %v2081_v0 = vld [vmem:[#allocation2 + $0x530] sm:$0xff] }
  0xb4   :  { %443 = vmatpush.msrb.mxu0 %v1870_v42  ;;  %2880 = vst [vmem:[#allocation20_spill] sm:$0xff] %v2081_v0 }
  0xb5   :  { %484 = vmatpush.msrb.mxu2 %v1874_v43 }
  0xb6   :  { %444 = vmatpush.msrb.mxu0 %v1874_v43 }
  0xb7   :  { %485 = vmatpush.msrb.mxu2 %v1878_v44 }
  0xb8   :  { %445 = vmatpush.msrb.mxu0 %v1878_v44 }
  0xb9   :  { %486 = vmatpush.msrb.mxu2 %v1885_v46 }
  0xba   :  { %446 = vmatpush.msrb.mxu0 %v1885_v46 }
  0xbb   :  { %487 = vmatpush.msrb.mxu2 %v1892_v48 }
  0xbc   :  { %447 = vmatpush.msrb.mxu0 %v1892_v48 }
  0xbd   :  { %488 = vmatpush.msrb.mxu2 %v1896_v49 }
  0xbe   :  { %448 = vmatpush.msrb.mxu0 %v1896_v49 }
  0xbf   :  { %489 = vmatpush.msrb.mxu2 %v1900_v50 }
  0xc0   :  { %449 = vmatpush.msrb.mxu0 %v1900_v50 }
  0xc1   :  { %490 = vmatpush.msrb.mxu2 %v1904_v51 }
  0xc2   :  { %450 = vmatpush.msrb.mxu0 %v1904_v51 }
  0xc3   :  { %491 = vmatpush.msrb.mxu2 %v1908_v52 }
  0xc4   :  { %451 = vmatpush.msrb.mxu0 %v1908_v52 }
  0xc5   :  { %492 = vmatpush.msrb.mxu2 %v1912_v53 }
  0xc6   :  { %452 = vmatpush.msrb.mxu0 %v1912_v53 }
  0xc7   :  { %493 = vmatpush.msrb.mxu2 %v1916_v54 }
  0xc8   :  { %453 = vmatpush.msrb.mxu0 %v1916_v54 }
  0xc9   :  { %494 = vmatpush.msrb.mxu2 %v1920_v55 }
  0xca   :  { %495 = vmatmul.f32.vlgmr.msrb.gmra.mxu2 %v1569_v1  ;;  %454 = vmatpush.msrb.mxu0 %v1920_v55  ;;  %v2085_v1 = vld [vmem:[#allocation2 + $0x528] sm:$0xff] }
  0xcb   :  { %455 = vmatmul.f32.vlgmr.msrb.gmra.mxu0 %v413_v2  ;;  %618 = vmatpush.msra.mxu2 %v557_v7  ;;  %2881 = vst [vmem:[#allocation21_spill] sm:$0xff] %v2085_v1  ;;  %v2089_v2 = vld [vmem:[#allocation2 + $0x520] sm:$0xff]  ;;  %v252_v7 = vperm.slane %v1922_v56, 1 }
  0xcc   :  { %519 = vmatpush.msra.mxu0 %v1844_v37  ;;  %v2013_v37 = vld [vmem:[#allocation2 + $0x5c0] sm:$0xff]  ;;  %2882 = vst [vmem:[#allocation22_spill] sm:$0xff] %v2089_v2 }
  0xcd   :  { %619 = vmatpush.msra.mxu2 %v556_v9  ;;  %v2117_v56 = vld [vmem:[#allocation2 + $0x660] sm:$0xff] }
  0xce   :  { %520 = vmatpush.msra.mxu0 %v1850_v38  ;;  %v2016_v38 = vld [vmem:[#allocation2 + $0x5b8] sm:$0xff]  ;;  %2889 = vst [vmem:[#allocation29_spill] sm:$0xff] %v2117_v56 }
  0xcf   :  { %620 = vmatpush.msra.mxu2 %v555_v11 }
  0xd0   :  { %521 = vmatpush.msra.mxu0 %v1855_v39  ;;  %v2019_v39 = vld [vmem:[#allocation2 + $0x5b0] sm:$0xff] }
  0xd1   :  { %621 = vmatpush.msra.mxu2 %v554_v13  ;;  %v2112_v13 = vld [vmem:[#allocation2 + $0x500] sm:$0xff] }
  0xd2   :  { %522 = vmatpush.msra.mxu0 %v1866_v41  ;;  %v2025_v41 = vld [vmem:[#allocation2 + $0x5a0] sm:$0xff]  ;;  %2888 = vst [vmem:[#allocation28_spill] sm:$0xff] %v2112_v13 }
  0xd3   :  { %622 = vmatpush.msra.mxu2 %v553_v15  ;;  %2868 = vst [vmem:[#allocation8_spill] sm:$0xff] %v2025_v41 }
  0xd4   :  { %523 = vmatpush.msra.mxu0 %v1870_v42  ;;  %v2028_v42 = vld [vmem:[#allocation2 + $0x598] sm:$0xff] }
  0xd5   :  { %623 = vmatpush.msra.mxu2 %v552_v17  ;;  %2869 = vst [vmem:[#allocation9_spill] sm:$0xff] %v2028_v42 }
  0xd6   :  { %524 = vmatpush.msra.mxu0 %v1874_v43  ;;  %v2031_v43 = vld [vmem:[#allocation2 + $0x590] sm:$0xff] }
  0xd7   :  { %624 = vmatpush.msra.mxu2 %v551_v19  ;;  %2870 = vst [vmem:[#allocation10_spill] sm:$0xff] %v2031_v43 }
  0xd8   :  { %525 = vmatpush.msra.mxu0 %v1878_v44  ;;  %v2034_v44 = vld [vmem:[#allocation2 + $0x588] sm:$0xff] }
  0xd9   :  { %625 = vmatpush.msra.mxu2 %v550_v21  ;;  %2871 = vst [vmem:[#allocation11_spill] sm:$0xff] %v2034_v44  ;;  %v2128_v21 = vld [vmem:[#allocation2 + $0x658] sm:$0xff] }
  0xda   :  { %526 = vmatpush.msra.mxu0 %v1885_v46  ;;  %v582_v46 = vld [vmem:[#allocation2 + $0x400] sm:$0xff]  ;;  %2891 = vst [vmem:[#allocation31_spill] sm:$0xff] %v2128_v21 }
  0xdb   :  { %626 = vmatpush.msra.mxu2 %v549_v23  ;;  %613 = vmatpush.msra.mxu1 %v582_v46 }
  0xdc   :  { %527 = vmatpush.msra.mxu0 %v1892_v48  ;;  %v545_v48 = vld [vmem:[#allocation2 + $0x398] sm:$0xff] }
  0xdd   :  { %627 = vmatpush.msra.mxu2 %v548_v25  ;;  %v2137_v25 = vld [vmem:[#allocation2 + $0x650] sm:$0xff] }
  0xde   :  { %528 = vmatpush.msra.mxu0 %v1896_v49  ;;  %v2041_v49 = vld [vmem:[#allocation2 + $0x578] sm:$0xff]  ;;  %2893 = vst [vmem:[#allocation33_spill] sm:$0xff] %v2137_v25 }
  0xdf   :  { %628 = vmatpush.msra.mxu2 %v547_v27  ;;  %821 = vmatpush.msrb.mxu1 %v2041_v49 }
  0xe0   :  { %529 = vmatpush.msra.mxu0 %v1900_v50  ;;  %v544_v50 = vld [vmem:[#allocation2 + $0x390] sm:$0xff] }
  0xe1   :  { %629 = vmatpush.msra.mxu2 %v546_v45 }
  0xe2   :  { %530 = vmatpush.msra.mxu0 %v1904_v51  ;;  %v2045_v51 = vld [vmem:[#allocation2 + $0x570] sm:$0xff] }
  0xe3   :  { %630 = vmatpush.msra.mxu2 %v545_v48  ;;  %822 = vmatpush.msrb.mxu1 %v2045_v51 }
  0xe4   :  { %531 = vmatpush.msra.mxu0 %v1908_v52  ;;  %v543_v52 = vld [vmem:[#allocation2 + $0x388] sm:$0xff] }
  0xe5   :  { %631 = vmatpush.msra.mxu2 %v544_v50 }
  0xe6   :  { %532 = vmatpush.msra.mxu0 %v1912_v53  ;;  %v2048_v53 = vld [vmem:[#allocation2 + $0x568] sm:$0xff] }
  0xe7   :  { %632 = vmatpush.msra.mxu2 %v543_v52  ;;  %823 = vmatpush.msrb.mxu1 %v2048_v53  ;;  %v2156_v52 = vld [vmem:[#allocation2 + $0x640] sm:$0xff] }
  0xe8   :  { %533 = vmatpush.msra.mxu0 %v1916_v54  ;;  %v542_v54 = vld [vmem:[#allocation2 + $0x380] sm:$0xff]  ;;  %2896 = vst [vmem:[#allocation36_spill] sm:$0xff] %v2156_v52 }
  0xe9   :  { %633 = vmatpush.msra.mxu2 %v542_v54  ;;  %v2158_v54 = vld [vmem:[#allocation2 + $0x638] sm:$0xff] }
  0xea   :  { %534 = vmatpush.msra.mxu0 %v1920_v55  ;;  %v2053_v55 = vld [vmem:[#allocation2 + $0x560] sm:$0xff]  ;;  %2897 = vst [vmem:[#allocation37_spill] sm:$0xff] %v2158_v54 }
  0xeb   :  { %535 = vmatmul.f32.vlgmr.msra.gmra.mxu0 %v1571_v29  ;;  %824 = vmatpush.msrb.mxu1 %v2053_v55 }
  0xec   :  { %801 = vmatpush.msrb.mxu0 %v1992_v30  ;;  %902 = vmatpush.msrb.mxu2 %v2069_v61  ;;  %v249_v5 = vpop.f32.mrf.mxu1  ;;  %v330_v9 = vpop.f32.mrf.mxu3 }
  0xed   :  { %825 = vmatpush.msrb.mxu1 %v2057_v57 }
  0xee   :  { %802 = vmatpush.msrb.mxu0 %v1995_v31  ;;  %903 = vmatpush.msrb.mxu2 %v2073_v62 }
  0xef   :  { %826 = vmatpush.msrb.mxu1 %v2061_v58 }
  0xf0   :  { %803 = vmatpush.msrb.mxu0 %v1998_v32  ;;  %904 = vmatpush.msrb.mxu2 %v2110_v12 }
  0xf1   :  { %827 = vmatpush.msrb.mxu1 %v2063_v59 }
  0xf2   :  { %804 = vmatpush.msrb.mxu0 %v2001_v33  ;;  %905 = vmatpush.msrb.mxu2 %v2117_v56 }
  0xf3   :  { %828 = vmatpush.msrb.mxu1 %v2067_v60 }
  0xf4   :  { %805 = vmatpush.msrb.mxu0 %v2004_v34  ;;  %v370_v17 = vpop.f32.mrf.mxu1  ;;  %v410_v23 = vpop.f32.mrf.mxu3  ;;  %906 = vmatpush.msrb.mxu2 %v2128_v21 }
  0xf5   :  { %829 = vmatpush.msrb.mxu1 %v2076_v63 }
  0xf6   :  { %806 = vmatpush.msrb.mxu0 %v2007_v35  ;;  %907 = vmatpush.msrb.mxu2 %v2137_v25 }
  0xf7   :  { %830 = vmatpush.msrb.mxu1 %v2081_v0 }
  0xf8   :  { %807 = vmatpush.msrb.mxu0 %v2010_v36  ;;  %908 = vmatpush.msrb.mxu2 %v2141_v28 }
  0xf9   :  { %831 = vmatpush.msrb.mxu1 %v2085_v1 }
  0xfa   :  { %808 = vmatpush.msrb.mxu0 %v2013_v37  ;;  %909 = vmatpush.msrb.mxu2 %v2156_v52 }
  0xfb   :  { %832 = vmatpush.msrb.mxu1 %v2089_v2  ;;  %v2199_v2 = vld [vmem:[#allocation2 + $0x610] sm:$0xff] }
  0xfc   :  { %809 = vmatpush.msrb.mxu0 %v2016_v38  ;;  %910 = vmatpush.msrb.mxu2 %v2158_v54 }
  0xfd   :  { %833 = vmatpush.msrb.mxu1 %v2093_v3 }
  0xfe   :  { %810 = vmatpush.msrb.mxu0 %v2019_v39 }
  0xff   :  { %834 = vmatpush.msrb.mxu1 %v2097_v4  ;;  %v717_v4 = vld [vmem:[#allocation2 + $0x4f0] sm:$0xff] }
 0x100   :  { %811 = vmatpush.msrb.mxu0 %v2022_v40 }
 0x101   :  { %835 = vmatpush.msrb.mxu1 %v2101_v6  ;;  %v718_v6 = vld [vmem:[#allocation2 + $0x4f8] sm:$0xff] }
 0x102   :  { %812 = vmatpush.msrb.mxu0 %v2025_v41  ;;  %719 = vmatpush.msra.mxu3 %v718_v6 }
 0x103   :  { %836 = vmatpush.msrb.mxu1 %v2112_v13 }
 0x104   :  { %813 = vmatpush.msrb.mxu0 %v2028_v42  ;;  %720 = vmatpush.msra.mxu3 %v717_v4 }
 0x106   :  { %814 = vmatpush.msrb.mxu0 %v2031_v43 }
 0x108   :  { %815 = vmatpush.msrb.mxu0 %v2034_v44 }
 0x10a   :  { %816 = vmatpush.msrb.mxu0 %v2038_v47 }
 0x10c   :  { %1032 = vmatpush.msra.mxu0 %v1992_v30 }
 0x10e   :  { %1033 = vmatpush.msra.mxu0 %v1995_v31 }
 0x110   :  { %1034 = vmatpush.msra.mxu0 %v1998_v32 }
 0x112   :  { %1035 = vmatpush.msra.mxu0 %v2001_v33 }
 0x114   :  { %1036 = vmatpush.msra.mxu0 %v2004_v34 }
 0x116   :  { %1037 = vmatpush.msra.mxu0 %v2007_v35 }
 0x118   :  { %1038 = vmatpush.msra.mxu0 %v2010_v36 }
 0x11a   :  { %1039 = vmatpush.msra.mxu0 %v2013_v37 }
 0x11c   :  { %1040 = vmatpush.msra.mxu0 %v2016_v38 }
 0x11e   :  { %1041 = vmatpush.msra.mxu0 %v2019_v39 }
 0x120   :  { %1042 = vmatpush.msra.mxu0 %v2022_v40 }
 0x122   :  { %1043 = vmatpush.msra.mxu0 %v2025_v41 }
 0x124   :  { %1044 = vmatpush.msra.mxu0 %v2028_v42  ;;  %v2190_v42 = vld [vmem:[#allocation2 + $0x620] sm:$0xff] }
 0x125   :  { %2900 = vst [vmem:[#allocation40_spill] sm:$0xff] %v2190_v42 }
 0x126   :  { %1045 = vmatpush.msra.mxu0 %v2031_v43 }
 0x128   :  { %v229_v8 = vpop.f32.mrf.mxu0  ;;  %1046 = vmatpush.msra.mxu0 %v2034_v44 }
 0x129   :  { %v250_v10 = vadd.f32 %v249_v5, %v229_v8 }
 0x12a   :  { %1047 = vmatpush.msra.mxu0 %v2038_v47 }
 0x12b   :  { %v2108_v11 = vadd.f32 %v252_v7, %v250_v10 }
 0x12d   :  { %2886 = vst [vmem:[#allocation26_spill] sm:$0xff] %v2108_v11  ;;  %v310_v14 = vpop.f32.mrf.mxu2  ;;  %v539_v15 = vmul.f32 %v2108_v11, %v2108_v11 }
 0x12e   :  { %v2121_v16 = vadd.f32 %v330_v9, %v310_v14  ;;  %v2168_v14 = vld [vmem:[#allocation2 + $0x630] sm:$0xff] }
 0x12f   :  { %v540_v18 = vmul.f32 -0.9531651, %v539_v15  ;;  %2898 = vst [vmem:[#allocation38_spill] sm:$0xff] %v2168_v14  ;;  %911 = vmatpush.msrb.mxu2 %v2168_v14  ;;  %v2193_v14 = vld [vmem:[#allocation2 + $0x618] sm:$0xff] }
 0x130   :  { %2890 = vst [vmem:[#allocation30_spill] sm:$0xff] %v2121_v16  ;;  %v350_v19 = vpop.f32.mrf.mxu0  ;;  %v2126_v20 = vmul.f32 %v2121_v16, %v2121_v16 }
 0x131   :  { %v2130_v22 = vadd.f32 %v370_v17, %v350_v19  ;;  %634 = vmatmul.f32.vlgmr.msra.gmra.mxu2 %v540_v18  ;;  %2901 = vst [vmem:[#allocation41_spill] sm:$0xff] %v2193_v14 }
 0x132   :  { %v559_v27 = vmul.f32 0.16937125, %v2126_v20  ;;  %v767_v46 = vmul.f32 -0.15758306, %v2126_v20  ;;  %v1015_v13 = vmul.f32 -0.5744955, %v2126_v20 }
 0x133   :  { %2892 = vst [vmem:[#allocation32_spill] sm:$0xff] %v2130_v22  ;;  %v2135_v24 = vmul.f32 %v2130_v22, %v2121_v16  ;;  %v2154_v50 = vmul.f32 %v2130_v22, %v2130_v22 }
 0x135   :  { %v390_v26 = vpop.f32.mrf.mxu2  ;;  %v561_v45 = vmul.f32 0.13797046, %v2135_v24  ;;  %v768_v8 = vmul.f32 0.0153199, %v2135_v24  ;;  %v566_v10 = vmul.f32 0.24056433, %v2135_v24 }
 0x136   :  { %v2143_v29 = vadd.f32 %v410_v23, %v390_v26  ;;  %v772_v18 = vmul.f32 0.14930941, %v2135_v24  ;;  %v569_v23 = vmul.f32 0.20387053, %v2154_v50 }
 0x137   :  { %v562_v5 = vadd.f32 %v561_v45, %v559_v27  ;;  %v769_v15 = vadd.f32 %v768_v8, %v767_v46  ;;  %v774_v45 = vmul.f32 -0.35167086, %v2154_v50  ;;  %v1016_v46 = vmul.f32 -0.2175159, %v2135_v24 }
 0x138   :  { %2895 = vst [vmem:[#allocation35_spill] sm:$0xff] %v2143_v29  ;;  %v2150_v48 = vmul.f32 %v2143_v29, %v2121_v16  ;;  %v2162_v7 = vmul.f32 %v2143_v29, %v2130_v22  ;;  %v2182_v44 = vmul.f32 %v2143_v29, %v2143_v29 }
 0x13a   :  { %v564_v9 = vmul.f32 0.16578372, %v2150_v48  ;;  %v770_v17 = vmul.f32 0.04645136, %v2150_v48  ;;  %v572_v26 = vmul.f32 -0.2371537, %v2162_v7 }
 0x13b   :  { %v1018_v8 = vmul.f32 -0.11432606, %v2150_v48  ;;  %v574_v43 = vmul.f32 0.42518708, %v2150_v48  ;;  %v782_v4 = vmul.f32 -0.00606383, %v2182_v44 }
 0x13c   :  { %v565_v19 = vadd.f32 %v564_v9, %v562_v5  ;;  %v771_v27 = vadd.f32 %v770_v17, %v769_v15  ;;  %v776_v9 = vmul.f32 0.19383584, %v2162_v7  ;;  %v2185_v15 = vld [vmem:[#allocation2 + $0x628] sm:$0xff] }
 0x13d   :  { %2899 = vst [vmem:[#allocation39_spill] sm:$0xff] %v2185_v15  ;;  %912 = vmatpush.msrb.mxu2 %v2185_v15  ;;  %v715_v15 = vld [vmem:[#allocation2 + $0x4e0] sm:$0xff] }
 0x13e   :  { %v567_v47 = vadd.f32 %v566_v10, %v565_v19  ;;  %v773_v5 = vadd.f32 %v772_v18, %v771_v27  ;;  %v1017_v10 = vadd.f32 %v1016_v46, %v1015_v13  ;;  %v1020_v19 = vmul.f32 0.25764325, %v2135_v24  ;;  %v716_v27 = vld [vmem:[#allocation2 + $0x4e8] sm:$0xff] }
 0x13f   :  { %v778_v18 = vmul.f32 0.37665915, %v2150_v48  ;;  %v1022_v13 = vmul.f32 -0.10840609, %v2154_v50  ;;  %913 = vmatpush.msrb.mxu2 %v2190_v42  ;;  %v780_v46 = vmul.f32 -0.58682317, %v2162_v7  ;;  %721 = vmatpush.msra.mxu3 %v716_v27 }
 0x140   :  { %v570_v17 = vadd.f32 %v569_v23, %v567_v47  ;;  %v775_v3 = vadd.f32 %v774_v45, %v773_v5  ;;  %v576_v47 = vmul.f32 0.117993794, %v2162_v7  ;;  %v1019_v23 = vadd.f32 %v1018_v8, %v1017_v10  ;;  %v2205_v10 = vld [vmem:[#allocation2 + $0x608] sm:$0xff] }
 0x141   :  { %v579_v5 = vmul.f32 -0.4788208, %v2182_v44  ;;  %914 = vmatpush.msrb.mxu2 %v2193_v14  ;;  %722 = vmatpush.msra.mxu3 %v715_v15  ;;  %v713_v15 = vld [vmem:[#allocation2 + $0x4d0] sm:$0xff] }
 0x142   :  { %v573_v41 = vadd.f32 %v572_v26, %v570_v17  ;;  %v777_v6 = vadd.f32 %v776_v9, %v775_v3  ;;  %v1021_v54 = vadd.f32 %v1020_v19, %v1019_v23  ;;  %v1024_v26 = vmul.f32 -0.38707125, %v2162_v7  ;;  %v714_v17 = vld [vmem:[#allocation2 + $0x4d8] sm:$0xff] }
 0x143   :  { %915 = vmatpush.msrb.mxu2 %v2199_v2  ;;  %v1026_v23 = vmul.f32 0.19430725, %v2150_v48  ;;  %723 = vmatpush.msra.mxu3 %v714_v17  ;;  %v2234_v17 = vpop.f32.mrf.mxu1 }
 0x144   :  { %v575_v45 = vadd.f32 %v574_v43, %v573_v41  ;;  %v779_v8 = vadd.f32 %v778_v18, %v777_v6  ;;  %v1023_v9 = vadd.f32 %v1022_v13, %v1021_v54  ;;  %v2210_v43 = vmul.f32 %v2130_v22, %v2108_v11  ;;  %v2222_v13 = vld [vmem:[#allocation2 + $0x600] sm:$0xff] }
 0x145   :  { %916 = vmatpush.msrb.mxu2 %v2205_v10  ;;  %v2220_v54 = vmul.f32 %v2143_v29, %v2108_v11  ;;  %2902 = vst [vmem:[#allocation42_spill] sm:$0xff] %v2222_v13  ;;  %v1197_v6 = vmul.f32 0.2173739, %v2126_v20  ;;  %724 = vmatpush.msra.mxu3 %v713_v15 }
 0x146   :  { %v577_v3 = vadd.f32 %v576_v47, %v575_v45  ;;  %v781_v41 = vadd.f32 %v780_v46, %v779_v8  ;;  %v1025_v27 = vadd.f32 %v1024_v26, %v1023_v9  ;;  %v2216_v47 = vmul.f32 %v2121_v16, %v2108_v11  ;;  %v712_v8 = vld [vmem:[#allocation2 + $0x4c8] sm:$0xff] }
 0x147   :  { %v1198_v46 = vmul.f32 0.17033947, %v2135_v24  ;;  %v745_v45 = vmul.f32 0.6460065, %v2210_v43  ;;  %v1028_v26 = vmul.f32 -0.1441102, %v2162_v7  ;;  %917 = vmatpush.msrb.mxu2 %v2222_v13  ;;  %v654_v9 = vmul.f32 %v2234_v17, %v2234_v17  ;;  %725 = vmatpush.msra.mxu3 %v712_v8 }
 0x148   :  { %v580_v19 = vadd.f32 %v579_v5, %v577_v3  ;;  %v783_v18 = vadd.f32 %v782_v4, %v781_v41  ;;  %v1027_v5 = vadd.f32 %v1026_v23, %v1025_v27  ;;  %v743_v4 = vmul.f32 0.33659542, %v2216_v47  ;;  %v2241_v41 = vpop.f32.mrf.mxu3 }
 0x149   :  { %v748_v20 = vmul.f32 -0.1045733, %v2220_v54  ;;  %1101 = vmatpush.msra.mxu2 %v2069_v61  ;;  %v1200_v3 = vmul.f32 -0.094596565, %v2150_v48  ;;  %v1030_v23 = vmul.f32 0.5899862, %v2182_v44  ;;  %v858_v8 = vmul.f32 %v2234_v17, %v2130_v22 }
 0x14a   :  { %614 = vmatmul.f32.vlgmr.msra.gmra.mxu1 %v580_v19  ;;  %817 = vmatmul.f32.vlgmr.msrb.gmra.mxu0 %v783_v18  ;;  %v746_v19 = vadd.f32 %v745_v45, %v743_v4  ;;  %v1029_v27 = vadd.f32 %v1028_v26, %v1027_v5  ;;  %v843_v18 = vmul.f32 %v2234_v17, %v2121_v16  ;;  %v2254_v5 = vmul.f32 0.2259345, %v654_v9 }
 0x14b   :  { %1052 = vmatpush.msra.mxu1 %v2041_v49  ;;  %1214 = vmatpush.msrb.mxu0 %v1992_v30  ;;  %v1199_v30 = vadd.f32 %v1198_v46, %v1197_v6  ;;  %v849_v6 = vmul.f32 %v2241_v41, %v2121_v16  ;;  %v710_v46 = vld [vmem:[#allocation2 + $0x4b8] sm:$0xff]  ;;  %v2256_v26 = vmul.f32 0.05595941, %v654_v9  ;;  %v2260_v4 = vmul.f32 -0.14530455, %v654_v9 }
 0x14c   :  { %1102 = vmatpush.msra.mxu2 %v2073_v62  ;;  %v749_v15 = vadd.f32 %v748_v20, %v746_v19  ;;  %2903 = vst [vmem:[#allocation43_spill] sm:$0xff] %v2254_v5  ;;  %v2262_v20 = vmul.f32 0.18840086, %v654_v9  ;;  %v1031_v19 = vadd.f32 %v1030_v23, %v1029_v27  ;;  %v1204_v27 = vmul.f32 0.11579043, %v2154_v50  ;;  %v706_v62 = vld [vmem:[#allocation2 + $0x498] sm:$0xff] }
 0x14d   :  { %1053 = vmatpush.msra.mxu1 %v2045_v51  ;;  %1215 = vmatpush.msrb.mxu0 %v1995_v31  ;;  %v711_v31 = vld [vmem:[#allocation2 + $0x4c0] sm:$0xff]  ;;  %v1201_v45 = vadd.f32 %v1200_v3, %v1199_v30  ;;  %2904 = vst [vmem:[#allocation44_spill] sm:$0xff] %v2256_v26  ;;  %v709_v30 = vld [vmem:[#allocation2 + $0x4b0] sm:$0xff]  ;;  %v2271_v3 = vmul.f32 0.21689682, %v843_v18  ;;  %v2293_v50 = vmul.f32 %v2241_v41, %v2130_v22  ;;  %v704_v26 = vld [vmem:[#allocation2 + $0x488] sm:$0xff] }
 0x14e   :  { %726 = vmatpush.msra.mxu3 %v711_v31  ;;  %2905 = vst [vmem:[#allocation45_spill] sm:$0xff] %v2260_v4  ;;  %1103 = vmatpush.msra.mxu2 %v2110_v12  ;;  %v2273_v31 = vmul.f32 -0.028844362, %v849_v6  ;;  %v2277_v23 = vmul.f32 -0.25606397, %v849_v6  ;;  %v2311_v4 = vpop.f32.mrf.mxu2  ;;  %v2321_v61 = vmul.f32 %v2241_v41, %v2234_v17  ;;  %v2375_v5 = vld [vmem:[#allocation2 + $0x6f8] sm:$0xff] }
 0x14f   :  { %1054 = vmatpush.msra.mxu1 %v2048_v53  ;;  %1216 = vmatpush.msrb.mxu0 %v1998_v32  ;;  %v1202_v32 = vmul.f32 0.46354845, %v2135_v24  ;;  %2906 = vst [vmem:[#allocation46_spill] sm:$0xff] %v2262_v20  ;;  %v2268_v24 = vmul.f32 0.060530353, %v843_v18 }
 0x150   :  { %727 = vmatpush.msra.mxu3 %v710_v46  ;;  %1104 = vmatpush.msra.mxu2 %v2117_v56  ;;  %v2285_v46 = vmul.f32 -0.020165801, %v858_v8  ;;  %v2287_v11 = vmul.f32 0.41811246, %v858_v8  ;;  %v1206_v12 = vmul.f32 0.4418876, %v2162_v7 }
 0x151   :  { %1055 = vmatpush.msra.mxu1 %v2053_v55  ;;  %1217 = vmatpush.msrb.mxu0 %v2001_v33  ;;  %v2266_v33 = vmul.f32 -0.111093506, %v843_v18  ;;  %v1203_v9 = vadd.f32 %v1202_v32, %v1201_v45  ;;  %v708_v18 = vld [vmem:[#allocation2 + $0x4a8] sm:$0xff]  ;;  %v1010_v45 = vmul.f32 -0.12703146, %v2216_v47  ;;  %2909 = vst [vmem:[#allocation49_spill] sm:$0xff] %v2321_v61 }
 0x152   :  { %837 = vmatmul.f32.vlgmr.msrb.gmra.mxu1 %v749_v15  ;;  %1048 = vmatmul.f32.vlgmr.msra.gmra.mxu0 %v1031_v19  ;;  %v2281_v15 = vpop.f32.mrf.mxu0  ;;  %2907 = vst [vmem:[#allocation47_spill] sm:$0xff] %v2287_v11  ;;  %v2289_v19 = vmul.f32 -0.08928603, %v858_v8  ;;  %v1011_v32 = vmul.f32 0.5875785, %v2210_v43  ;;  %v707_v8 = vld [vmem:[#allocation2 + $0x4a0] sm:$0xff] }
 0x153   :  { %1056 = vmatpush.msra.mxu1 %v2057_v57  ;;  %1218 = vmatpush.msrb.mxu0 %v2004_v34  ;;  %v2279_v34 = vmul.f32 -0.260206, %v849_v6  ;;  %v638_v6 = vmul.f32 %v2281_v15, %v2281_v15  ;;  %v841_v20 = vmul.f32 %v2281_v15, %v2121_v16  ;;  %v1205_v56 = vadd.f32 %v1204_v27, %v1203_v9 }
 0x154   :  { %2908 = vst [vmem:[#allocation48_spill] sm:$0xff] %v2289_v19  ;;  %728 = vmatpush.msra.mxu3 %v709_v30  ;;  %1105 = vmatpush.msra.mxu2 %v2128_v21  ;;  %v1013_v30 = vmul.f32 0.45848176, %v2220_v54  ;;  %v2316_v21 = vmul.f32 0.18408044, %v2162_v7  ;;  %v2335_v7 = vmul.f32 %v2241_v41, %v2241_v41 }
 0x155   :  { %1057 = vmatpush.msra.mxu1 %v2061_v58  ;;  %1219 = vmatpush.msrb.mxu0 %v2007_v35  ;;  %v2300_v35 = vmul.f32 %v2234_v17, %v2281_v15  ;;  %v2325_v9 = vmul.f32 0.09033596, %v2182_v44  ;;  %v639_v27 = vmul.f32 -0.12046716, %v638_v6  ;;  %v705_v44 = vld [vmem:[#allocation2 + $0x490] sm:$0xff]  ;;  %v2917_v58 = vld [vmem:[#allocation38_spill] sm:$0xff] }
 0x156   :  { %729 = vmatpush.msra.mxu3 %v708_v18  ;;  %1106 = vmatpush.msra.mxu2 %v2137_v25  ;;  %2912 = vst [vmem:[#allocation52_spill] sm:$0xff] %v2335_v7  ;;  %v855_v25 = vmul.f32 %v2281_v15, %v2130_v22  ;;  %v923_v19 = vmul.f32 -0.0467848, %v638_v6  ;;  %v2349_v7 = vmul.f32 %v2234_v17, %v2143_v29  ;;  %v1304_v61 = vmul.f32 -0.11707829, %v638_v6 }
 0x157   :  { %1058 = vmatpush.msra.mxu1 %v2063_v59  ;;  %1220 = vmatpush.msrb.mxu0 %v2010_v36  ;;  %v1208_v36 = vmul.f32 -0.3180661, %v2150_v48  ;;  %v2331_v48 = vmul.f32 0.2754538, %v2216_v47  ;;  %v641_v18 = vmul.f32 -0.035743967, %v2300_v35  ;;  %v2344_v47 = vmul.f32 %v2311_v4, %v2121_v16 }
 0x158   :  { %730 = vmatpush.msra.mxu3 %v707_v8  ;;  %1107 = vmatpush.msra.mxu2 %v2141_v28  ;;  %v842_v8 = vmul.f32 -0.12924515, %v841_v20  ;;  %v1012_v28 = vadd.f32 %v1011_v32, %v1010_v45  ;;  %v1305_v59 = vmul.f32 0.63624823, %v2300_v35  ;;  %v703_v32 = vld [vmem:[#allocation2 + $0x480] sm:$0xff] }
 0x159   :  { %1059 = vmatpush.msra.mxu1 %v2067_v60  ;;  %1221 = vmatpush.msrb.mxu0 %v2013_v37  ;;  %v2328_v37 = vmul.f32 0.31484693, %v2293_v50  ;;  %2911 = vst [vmem:[#allocation51_spill] sm:$0xff] %v2331_v48  ;;  %v1207_v48 = vadd.f32 %v1206_v12, %v1205_v56  ;;  %v1122_v60 = vmul.f32 -0.022947587, %v638_v6  ;;  %v2362_v12 = vmul.f32 %v2241_v41, %v2281_v15  ;;  %v2913_v6 = vld [vmem:[#allocation37_spill] sm:$0xff] }
 0x15a   :  { %731 = vmatpush.msra.mxu3 %v706_v62  ;;  %1108 = vmatpush.msra.mxu2 %v2156_v52  ;;  %v2357_v62 = vmul.f32 %v2311_v4, %v2281_v15  ;;  %v1254_v56 = vmul.f32 0.02861003, %v841_v20  ;;  %v1014_v45 = vadd.f32 %v1013_v30, %v1012_v28  ;;  %v2367_v52 = vmul.f32 0.021897573, %v855_v25 }
 0x15b   :  { %1060 = vmatpush.msra.mxu1 %v2076_v63  ;;  %2910 = vst [vmem:[#allocation50_spill] sm:$0xff] %v2328_v37  ;;  %1222 = vmatpush.msrb.mxu0 %v2016_v38  ;;  %v924_v63 = vmul.f32 0.1450086, %v2300_v35  ;;  %v1072_v38 = vmul.f32 0.13101818, %v841_v20  ;;  %v1209_v37 = vadd.f32 %v1208_v36, %v1207_v48  ;;  %v642_v20 = vadd.f32 %v641_v18, %v639_v27  ;;  %v2919_v48 = vld [vmem:[#allocation23_spill] sm:$0xff] }
 0x15c   :  { %732 = vmatpush.msra.mxu3 %v705_v44  ;;  %1109 = vmatpush.msra.mxu2 %v2913_v6  ;;  %v847_v44 = vmul.f32 -0.52489024, %v2344_v47  ;;  %v2380_v30 = vmul.f32 0.006453097, %v855_v25  ;;  %v2916_v6 = vld [vmem:[#allocation8_spill] sm:$0xff]  ;;  %v1306_v11 = vadd.f32 %v1305_v59, %v1304_v61  ;;  %v2387_v36 = vmul.f32 %v2311_v4, %v2311_v4  ;;  %v2921_v61 = vld [vmem:[#allocation9_spill] sm:$0xff] }
 0x15d   :  { %1061 = vmatpush.msra.mxu1 %v2081_v0  ;;  %1223 = vmatpush.msrb.mxu0 %v2019_v39  ;;  %v1123_v39 = vmul.f32 -0.2554023, %v2300_v35  ;;  %v2371_v0 = vmul.f32 %v2281_v15, %v2143_v29  ;;  %v2378_v28 = vadd.f32 %v924_v63, %v923_v19  ;;  %v1074_v57 = vadd.f32 %v2268_v24, %v1072_v38  ;;  %v2391_v63 = vld [vmem:[#allocation2 + $0x6f0] sm:$0xff]  ;;  %v2923_v38 = vld [vmem:[#allocation39_spill] sm:$0xff] }
 0x15e   :  { %733 = vmatpush.msra.mxu3 %v704_v26  ;;  %1110 = vmatpush.msra.mxu2 %v2917_v58  ;;  %2918 = vst [vmem:[#allocation8_spill] sm:$0xff] %v2387_v36  ;;  %v1307_v26 = vmul.f32 0.1322568, %v2357_v62  ;;  %v1256_v19 = vadd.f32 %v2271_v3, %v1254_v56  ;;  %v861_v27 = vmul.f32 %v2311_v4, %v2130_v22  ;;  %v1075_v59 = vmul.f32 0.107709095, %v2344_v47  ;;  %v2928_v58 = vld [vmem:[#allocation11_spill] sm:$0xff] }
 0x15f   :  { %1062 = vmatpush.msra.mxu1 %v2085_v1  ;;  %1224 = vmatpush.msrb.mxu0 %v2022_v40  ;;  %v2914_v1 = vld [vmem:[#allocation22_spill] sm:$0xff]  ;;  %v845_v40 = vadd.f32 %v2266_v33, %v842_v8  ;;  %2920 = vst [vmem:[#allocation53_spill] sm:$0xff] %v2391_v63  ;;  %v2393_v33 = vadd.f32 %v1123_v39, %v1122_v60  ;;  %v2401_v24 = vmul.f32 0.07117736, %v855_v25  ;;  %v2922_v60 = vld [vmem:[#allocation24_spill] sm:$0xff] }
 0x160   :  { %2915 = vst [vmem:[#allocation22_spill] sm:$0xff] %v2375_v5  ;;  %734 = vmatpush.msra.mxu3 %v703_v32  ;;  %v2405_v18 = vmul.f32 %v2311_v4, %v2234_v17  ;;  %v1211_v3 = vadd.f32 %v2316_v21, %v1209_v37  ;;  %1111 = vmatpush.msra.mxu2 %v2923_v38  ;;  %v2410_v39 = vld [vmem:[#allocation2 + $0x6e8] sm:$0xff]  ;;  %v644_v56 = vmul.f32 0.095904656, %v2357_v62  ;;  %v2925_v32 = vld [vmem:[#allocation10_spill] sm:$0xff] }
 0x161   :  { %1063 = vmatpush.msra.mxu1 %v2914_v1  ;;  %1225 = vmatpush.msrb.mxu0 %v2916_v6  ;;  %v848_v8 = vadd.f32 %v847_v44, %v845_v40  ;;  %2924 = vst [vmem:[#allocation9_spill] sm:$0xff] %v2410_v39  ;;  %v926_v6 = vmul.f32 -0.08058299, %v2357_v62  ;;  %v2418_v25 = vmul.f32 %v2311_v4, %v2143_v29  ;;  %v2425_v21 = vmul.f32 -0.12389381, %v2387_v36 }
 0x162   :  { %989 = vmatpush.msrb.mxu3 %v2375_v5  ;;  %v2422_v44 = vmul.f32 %v2241_v41, %v2143_v29  ;;  %v2428_v37 = vmul.f32 0.0035886571, %v2387_v36  ;;  %v2431_v40 = vmul.f32 -0.107773855, %v2357_v62  ;;  %1112 = vmatpush.msra.mxu2 %v2190_v42  ;;  %v2438_v5 = vmul.f32 0.269216, %v2387_v36 }
 0x163   :  { %1064 = vmatpush.msra.mxu1 %v2919_v48  ;;  %1226 = vmatpush.msrb.mxu0 %v2921_v61  ;;  %v2927_v61 = vld [vmem:[#allocation25_spill] sm:$0xff]  ;;  %v1257_v38 = vmul.f32 0.3906018, %v2344_v47  ;;  %v2929_v48 = vld [vmem:[#allocation28_spill] sm:$0xff]  ;;  %v2456_v47 = vmul.f32 0.45882064, %v2349_v7 }
 0x164   :  { %990 = vmatpush.msrb.mxu3 %v2391_v63  ;;  %2926 = vst [vmem:[#allocation10_spill] sm:$0xff] %v2428_v37  ;;  %v1076_v63 = vadd.f32 %v1075_v59, %v1074_v57  ;;  %v2445_v37 = vmul.f32 -0.10042314, %v861_v27  ;;  %v2450_v57 = vld [vmem:[#allocation2 + $0x6e0] sm:$0xff]  ;;  %v2931_v59 = vld [vmem:[#allocation12_spill] sm:$0xff]  ;;  %1113 = vmatpush.msra.mxu2 %v2193_v14 }
 0x165   :  { %1065 = vmatpush.msra.mxu1 %v2922_v60  ;;  %1227 = vmatpush.msrb.mxu0 %v2925_v32  ;;  %v2435_v32 = vadd.f32 %v1307_v26, %v1306_v11  ;;  %v1213_v11 = vadd.f32 %v2325_v9, %v1211_v3  ;;  %2930 = vst [vmem:[#allocation11_spill] sm:$0xff] %v2450_v57  ;;  %v2453_v26 = vmul.f32 -0.22468972, %v2371_v0  ;;  %v2467_v9 = vmul.f32 0.14366345, %v2422_v44 }
 0x166   :  { %991 = vmatpush.msrb.mxu3 %v2410_v39  ;;  %v647_v39 = vmul.f32 -0.39978328, %v2362_v12  ;;  %1114 = vmatpush.msra.mxu2 %v2199_v2  ;;  %v2504_v14 = vmul.f32 0.17994818, %v2293_v50 }
 0x167   :  { %1066 = vmatpush.msra.mxu1 %v2927_v61  ;;  %1228 = vmatpush.msrb.mxu0 %v2928_v58  ;;  %v851_v61 = vadd.f32 %v2273_v31, %v848_v8  ;;  %v2464_v31 = vmul.f32 0.13769905, %v2418_v25  ;;  %v2470_v8 = vmul.f32 -0.87190557, %v2210_v43  ;;  %v1078_v43 = vadd.f32 %v2277_v23, %v1076_v63 }
 0x168   :  { %v2442_v60 = vpop.f32.mrf.mxu0  ;;  %992 = vmatpush.msrb.mxu3 %v2450_v57  ;;  %v2501_v57 = vmul.f32 -0.1625407, %v2371_v0  ;;  %1115 = vmatpush.msra.mxu2 %v2205_v10 }
 0x169   :  { %1067 = vmatpush.msra.mxu1 %v2929_v48  ;;  %v2460_v58 = vmul.f32 %v2442_v60, %v2121_v16  ;;  %1229 = vmatpush.msrb.mxu0 %v2931_v59  ;;  %v2474_v3 = vmul.f32 %v2442_v60, %v2281_v15  ;;  %v2477_v16 = vld [vmem:[#allocation2 + $0x6d8] sm:$0xff]  ;;  %v645_v59 = vadd.f32 %v644_v56, %v642_v20  ;;  %v1085_v15 = vmul.f32 -0.039875668, %v861_v27  ;;  %v2493_v20 = vld [vmem:[#allocation2 + $0x6d0] sm:$0xff] }
 0x16a   :  { %1068 = vmatmul.f32.vlgmr.msra.gmra.mxu1 %v1014_v45  ;;  %1230 = vmatmul.f32.vlgmr.msrb.gmra.mxu0 %v1213_v11  ;;  %2932 = vst [vmem:[#allocation28_spill] sm:$0xff] %v2477_v16  ;;  %v2480_v45 = vmul.f32 -0.46926945, %v2220_v54  ;;  %v1258_v54 = vadd.f32 %v1257_v38, %v1256_v19  ;;  %v1087_v56 = vmul.f32 -0.15920807, %v2293_v50 }
 0x16b   :  { %1234 = vmatpush.msrb.mxu1 %v2041_v49  ;;  %v853_v36 = vmul.f32 -0.16022657, %v2460_v58  ;;  %v1079_v42 = vmul.f32 -0.4590444, %v2460_v58  ;;  %v2490_v49 = vmul.f32 %v2241_v41, %v2311_v4  ;;  %2933 = vst [vmem:[#allocation12_spill] sm:$0xff] %v2493_v20  ;;  %993 = vmatpush.msrb.mxu3 %v2477_v16  ;;  %v648_v19 = vadd.f32 %v647_v39, %v645_v59 }
 0x16c   :  { %v2496_v11 = vmul.f32 0.15211461, %v861_v27  ;;  %v650_v27 = vmul.f32 0.10666178, %v2474_v3  ;;  %v1260_v39 = vadd.f32 %v2279_v34, %v1258_v54  ;;  %1116 = vmatpush.msra.mxu2 %v2222_v13  ;;  %v2936_v34 = vld [vmem:[#allocation47_spill] sm:$0xff] }
 0x16d   :  { %1235 = vmatpush.msrb.mxu1 %v2045_v51  ;;  %v854_v23 = vadd.f32 %v853_v36, %v851_v61  ;;  %v1080_v63 = vadd.f32 %v1079_v42, %v1078_v43  ;;  %v2507_v51 = vld [vmem:[#allocation2 + $0x6c8] sm:$0xff]  ;;  %v927_v36 = vadd.f32 %v926_v6, %v2378_v28  ;;  %v928_v42 = vmul.f32 -0.0060913404, %v2362_v12  ;;  %994 = vmatpush.msrb.mxu3 %v2493_v20  ;;  %v2524_v28 = vld [vmem:[#allocation2 + $0x6c0] sm:$0xff] }
 0x16e   :  { %2934 = vst [vmem:[#allocation54_spill] sm:$0xff] %v2507_v51  ;;  %v2517_v61 = vmul.f32 -0.25625166, %v2349_v7  ;;  %v2527_v6 = vmul.f32 0.14432035, %v2422_v44  ;;  %v651_v59 = vadd.f32 %v650_v27, %v648_v19 }
 0x16f   :  { %1236 = vmatpush.msrb.mxu1 %v2048_v53  ;;  %v857_v38 = vadd.f32 %v2367_v52, %v854_v23  ;;  %v1082_v50 = vadd.f32 %v2380_v30, %v1080_v63  ;;  %v2520_v53 = vmul.f32 -0.029994834, %v2418_v25  ;;  %2935 = vst [vmem:[#allocation55_spill] sm:$0xff] %v2524_v28  ;;  %v652_v52 = vmul.f32 0.17244971, %v2300_v35  ;;  %995 = vmatpush.msrb.mxu3 %v2507_v51  ;;  %v2937_v23 = vld [vmem:[#allocation13_spill] sm:$0xff] }
 0x170   :  { %v2532_v30 = vmul.f32 %v2442_v60, %v2130_v22  ;;  %v2539_v54 = vmul.f32 -0.048498522, %v2371_v0  ;;  %v2542_v63 = vld [vmem:[#allocation2 + $0x6b8] sm:$0xff]  ;;  %v929_v27 = vadd.f32 %v928_v42, %v927_v36  ;;  %v930_v22 = vmul.f32 0.02310644, %v2474_v3  ;;  %v2566_v51 = vld [vmem:[#allocation2 + $0x6a8] sm:$0xff] }
 0x171   :  { %1237 = vmatpush.msrb.mxu1 %v2053_v55  ;;  %v860_v43 = vadd.f32 %v2285_v46, %v857_v38  ;;  %v1084_v55 = vadd.f32 %v2936_v34, %v1082_v50  ;;  %v653_v19 = vadd.f32 %v652_v52, %v651_v59  ;;  %v2546_v20 = vmul.f32 0.18101537, %v2349_v7  ;;  %996 = vmatpush.msrb.mxu3 %v2524_v28  ;;  %v2938_v42 = vld [vmem:[#allocation14_spill] sm:$0xff]  ;;  %v2558_v59 = vld [vmem:[#allocation2 + $0x6b0] sm:$0xff]  ;;  %v2939_v7 = vld [vmem:[#allocation43_spill] sm:$0xff] }
 0x172   :  { %v658_v50 = vmul.f32 0.37112632, %v2405_v18  ;;  %v932_v0 = vmul.f32 0.4609755, %v2300_v35  ;;  %v2554_v34 = vmul.f32 %v2442_v60, %v2234_v17  ;;  %v1261_v36 = vmul.f32 -0.161236, %v2460_v58 }
 0x173   :  { %1238 = vmatpush.msrb.mxu1 %v2937_v23  ;;  %v863_v46 = vadd.f32 %v2445_v37, %v860_v43  ;;  %v1086_v38 = vadd.f32 %v1085_v15, %v1084_v55  ;;  %v656_v52 = vadd.f32 %v2939_v7, %v653_v19  ;;  %v931_v37 = vadd.f32 %v930_v22, %v929_v27  ;;  %v2940_v43 = vld [vmem:[#allocation50_spill] sm:$0xff]  ;;  %v2941_v17 = vld [vmem:[#allocation15_spill] sm:$0xff] }
 0x174   :  { %v868_v15 = vmul.f32 0.19859903, %v2532_v30  ;;  %997 = vmatpush.msrb.mxu3 %v2542_v63  ;;  %v1089_v28 = vmul.f32 0.14244156, %v2532_v30  ;;  %v666_v13 = vmul.f32 0.084688894, %v2357_v62 }
 0x175   :  { %1239 = vmatpush.msrb.mxu1 %v2938_v42  ;;  %v866_v23 = vadd.f32 %v2940_v43, %v863_v46  ;;  %v1088_v55 = vadd.f32 %v1087_v56, %v1086_v38  ;;  %v659_v58 = vadd.f32 %v658_v50, %v656_v52  ;;  %v2942_v42 = vld [vmem:[#allocation49_spill] sm:$0xff]  ;;  %v933_v19 = vadd.f32 %v932_v0, %v931_v37  ;;  %v2943_v38 = vld [vmem:[#allocation16_spill] sm:$0xff]  ;;  %v2577_v7 = vld [vmem:[#allocation2 + $0x6a0] sm:$0xff] }
 0x176   :  { %v661_v16 = vmul.f32 0.21941571, %v2942_v42  ;;  %998 = vmatpush.msrb.mxu3 %v2558_v59  ;;  %v2572_v46 = vmul.f32 0.417794, %v2362_v12  ;;  %v1126_v56 = vadd.f32 %v2431_v40, %v2393_v33  ;;  %v664_v52 = vmul.f32 -0.0028176492, %v2554_v34 }
 0x177   :  { %1240 = vmatpush.msrb.mxu1 %v2941_v17  ;;  %v869_v22 = vadd.f32 %v868_v15, %v866_v23  ;;  %v1090_v27 = vadd.f32 %v1089_v28, %v1088_v55  ;;  %v2944_v43 = vld [vmem:[#allocation44_spill] sm:$0xff]  ;;  %v936_v0 = vmul.f32 -0.30398273, %v2405_v18  ;;  %v1262_v37 = vadd.f32 %v1261_v36, %v1260_v39  ;;  %v2945_v40 = vld [vmem:[#allocation19_spill] sm:$0xff]  ;;  %v2587_v15 = vld [vmem:[#allocation2 + $0x698] sm:$0xff] }
 0x178   :  { %v662_v50 = vadd.f32 %v661_v16, %v659_v58  ;;  %v935_v17 = vadd.f32 %v2944_v43, %v933_v19  ;;  %999 = vmatpush.msrb.mxu3 %v2566_v51  ;;  %v668_v33 = vmul.f32 -0.025605094, %v2405_v18  ;;  %2946 = vst [vmem:[#allocation47_spill] sm:$0xff] %v2587_v15  ;;  %v2590_v55 = vmul.f32 0.13578771, %v2942_v42 }
 0x179   :  { %1241 = vmatpush.msrb.mxu1 %v2943_v38  ;;  %v872_v28 = vadd.f32 %v2453_v26, %v869_v22  ;;  %v1092_v23 = vadd.f32 %v2501_v57, %v1090_v27  ;;  %v938_v19 = vmul.f32 0.08805375, %v2942_v42  ;;  %v2595_v26 = vmul.f32 %v2442_v60, %v2311_v4  ;;  %v2947_v22 = vld [vmem:[#allocation20_spill] sm:$0xff]  ;;  %v2608_v27 = vld [vmem:[#allocation2 + $0x690] sm:$0xff] }
 0x17a   :  { %v665_v16 = vadd.f32 %v664_v52, %v662_v50  ;;  %v937_v58 = vadd.f32 %v936_v0, %v935_v17  ;;  %v2599_v57 = vmul.f32 %v2442_v60, %v2241_v41  ;;  %v2604_v36 = vmul.f32 %v2442_v60, %v2143_v29  ;;  %1000 = vmatpush.msrb.mxu3 %v2577_v7  ;;  %v2949_v0 = vld [vmem:[#allocation21_spill] sm:$0xff]  ;;  %v2952_v29 = vld [vmem:[#allocation23_spill] sm:$0xff] }
 0x17b   :  { %1242 = vmatpush.msrb.mxu1 %v2945_v40  ;;  %v875_v39 = vadd.f32 %v2456_v47, %v872_v28  ;;  %2948 = vst [vmem:[#allocation13_spill] sm:$0xff] %v2608_v27  ;;  %v674_v4 = vmul.f32 -0.095456466, %v2490_v49  ;;  %v940_v52 = vmul.f32 -0.07553981, %v2554_v34  ;;  %v1094_v47 = vadd.f32 %v2517_v61, %v1092_v23  ;;  %v2620_v28 = vld [vmem:[#allocation2 + $0x688] sm:$0xff] }
 0x17c   :  { %v667_v38 = vadd.f32 %v666_v13, %v665_v16  ;;  %v939_v50 = vadd.f32 %v938_v19, %v937_v58  ;;  %1001 = vmatpush.msrb.mxu3 %v2587_v15  ;;  %v2616_v43 = vmul.f32 -0.15264514, %v2490_v49  ;;  %v1264_v17 = vadd.f32 %v2401_v24, %v1262_v37  ;;  %v2950_v23 = vld [vmem:[#allocation52_spill] sm:$0xff]  ;;  %v2632_v37 = vld [vmem:[#allocation2 + $0x680] sm:$0xff] }
 0x17d   :  { %1243 = vmatpush.msrb.mxu1 %v2947_v22  ;;  %v878_v41 = vadd.f32 %v2464_v31, %v875_v39  ;;  %v942_v16 = vmul.f32 0.3436084, %v2357_v62  ;;  %v1127_v58 = vmul.f32 -0.19881651, %v2362_v12  ;;  %v883_v61 = vmul.f32 0.26984265, %v2604_v36 }
 0x17e   :  { %v669_v13 = vadd.f32 %v668_v33, %v667_v38  ;;  %v941_v40 = vadd.f32 %v940_v52, %v939_v50  ;;  %1002 = vmatpush.msrb.mxu3 %v2608_v27  ;;  %v2628_v19 = vmul.f32 0.32895052, %v2950_v23  ;;  %v1129_v24 = vmul.f32 -0.23705038, %v2474_v3 }
 0x17f   :  { %1244 = vmatpush.msrb.mxu1 %v2949_v0  ;;  %v881_v31 = vadd.f32 %v2467_v9, %v878_v41  ;;  %v944_v22 = vmul.f32 0.3316603, %v2405_v18  ;;  %v1128_v38 = vadd.f32 %v1127_v58, %v1126_v56  ;;  %v1096_v50 = vadd.f32 %v2520_v53, %v1094_v47  ;;  %v2951_v41 = vld [vmem:[#allocation48_spill] sm:$0xff] }
 0x180   :  { %v672_v33 = vadd.f32 %v2425_v21, %v669_v13  ;;  %v943_v39 = vadd.f32 %v942_v16, %v941_v40  ;;  %1003 = vmatpush.msrb.mxu3 %v2620_v28  ;;  %v677_v52 = vmul.f32 -0.118265346, %v2595_v26  ;;  %v1266_v0 = vadd.f32 %v2951_v41, %v1264_v17  ;;  %v2953_v13 = vld [vmem:[#allocation51_spill] sm:$0xff]  ;;  %v2954_v17 = vld [vmem:[#allocation17_spill] sm:$0xff]  ;;  %v2956_v16 = vld [vmem:[#allocation10_spill] sm:$0xff] }
 0x181   :  { %1245 = vmatpush.msrb.mxu1 %v2914_v1  ;;  %v884_v9 = vadd.f32 %v883_v61, %v881_v31  ;;  %v1130_v15 = vadd.f32 %v1129_v24, %v1128_v38  ;;  %v1131_v21 = vmul.f32 -0.08664877, %v2300_v35  ;;  %v1194_v56 = vadd.f32 %v2470_v8, %v2953_v13  ;;  %v2958_v38 = vld [vmem:[#allocation25_spill] sm:$0xff] }
 0x182   :  { %v675_v1 = vadd.f32 %v674_v4, %v672_v33  ;;  %v945_v27 = vadd.f32 %v944_v22, %v943_v39  ;;  %v1099_v40 = vmul.f32 0.054937903, %v2604_v36  ;;  %1004 = vmatpush.msrb.mxu3 %v2632_v37  ;;  %v689_v53 = vmul.f32 -0.06256983, %v2599_v57  ;;  %v2957_v22 = vld [vmem:[#allocation18_spill] sm:$0xff]  ;;  %v2959_v41 = vld [vmem:[#allocation45_spill] sm:$0xff] }
 0x183   :  { %1246 = vmatpush.msrb.mxu1 %v2952_v29  ;;  %918 = vmatmul.f32.vlgmr.msrb.gmra.mxu2 %v884_v9  ;;  %v691_v47 = vmul.f32 -0.035703585, %v2474_v3  ;;  %v2955_v29 = vld [vmem:[#allocation24_spill] sm:$0xff]  ;;  %v948_v31 = vmul.f32 0.12543997, %v2490_v49  ;;  %v1132_v61 = vadd.f32 %v1131_v21, %v1130_v15  ;;  %v1098_v8 = vadd.f32 %v2527_v6, %v1096_v50 }
 0x184   :  { %1283 = vmatpush.msrb.mxu2 %v2954_v17  ;;  %v678_v4 = vadd.f32 %v677_v52, %v675_v1  ;;  %v947_v58 = vadd.f32 %v2956_v16, %v945_v27  ;;  %v693_v24 = vmul.f32 -0.049431946, %v2554_v34  ;;  %v950_v33 = vmul.f32 -0.11773354, %v2595_v26  ;;  %v2961_v16 = vld [vmem:[#allocation29_spill] sm:$0xff] }
 0x185   :  { %1247 = vmatpush.msrb.mxu1 %v2955_v29  ;;  %v1268_v39 = vadd.f32 %v2496_v11, %v1266_v0  ;;  %v1134_v27 = vadd.f32 %v2959_v41, %v1132_v61  ;;  %v1135_v1 = vmul.f32 -0.1325943, %v2405_v18  ;;  %v1196_v15 = vadd.f32 %v2480_v45, %v1194_v56  ;;  %v2960_v11 = vld [vmem:[#allocation27_spill] sm:$0xff] }
 0x186   :  { %1284 = vmatpush.msrb.mxu2 %v2957_v22  ;;  %v680_v9 = vadd.f32 %v2572_v46, %v678_v4  ;;  %v949_v52 = vadd.f32 %v948_v31, %v947_v58  ;;  %v695_v6 = vmul.f32 0.019890876, %v2595_v26  ;;  %v952_v50 = vmul.f32 0.21011476, %v2362_v12 }
 0x187   :  { %1248 = vmatpush.msrb.mxu1 %v2958_v38  ;;  %v954_v21 = vmul.f32 -0.010039189, %v2942_v42  ;;  %v1136_v13 = vadd.f32 %v1135_v1, %v1134_v27  ;;  %v1137_v17 = vmul.f32 -0.03711738, %v2942_v42  ;;  %v1100_v29 = vadd.f32 %v1099_v40, %v1098_v8 }
 0x188   :  { %1285 = vmatpush.msrb.mxu2 %v2960_v11  ;;  %v682_v0 = vadd.f32 %v2590_v55, %v680_v9  ;;  %v951_v46 = vadd.f32 %v950_v33, %v949_v52  ;;  %v956_v45 = vmul.f32 -0.069940224, %v2490_v49  ;;  %v1270_v56 = vadd.f32 %v2504_v14, %v1268_v39  ;;  %v2962_v33 = vld [vmem:[#allocation31_spill] sm:$0xff] }
 0x189   :  { %1249 = vmatpush.msrb.mxu1 %v2929_v48  ;;  %v1139_v4 = vmul.f32 -0.1380399, %v2554_v34  ;;  %v1138_v48 = vadd.f32 %v1137_v17, %v1136_v13  ;;  %v1309_v55 = vmul.f32 -0.41770267, %v2362_v12  ;;  %v2677_v61 = vmul.f32 %v2442_v60, %v2442_v60 }
 0x18a   :  { %1250 = vmatmul.f32.vlgmr.msrb.gmra.mxu1 %v1196_v15  ;;  %1286 = vmatpush.msrb.mxu2 %v2961_v16  ;;  %v684_v58 = vadd.f32 %v2616_v43, %v682_v0  ;;  %v953_v31 = vadd.f32 %v952_v50, %v951_v46  ;;  %v1271_v40 = vmul.f32 -0.3659476, %v2532_v30  ;;  %v1141_v8 = vmul.f32 -0.14964029, %v2357_v62  ;;  %v2963_v30 = vld [vmem:[#allocation33_spill] sm:$0xff] }
 0x18b   :  { %1117 = vmatmul.f32.vlgmr.msra.gmra.mxu2 %v1100_v29  ;;  %v1311_v14 = vmul.f32 0.24865384, %v2474_v3  ;;  %v1140_v22 = vadd.f32 %v1139_v4, %v1138_v48  ;;  %v1310_v38 = vadd.f32 %v1309_v55, %v2435_v32  ;;  %v958_v9 = vmul.f32 0.047933005, %v2950_v23  ;;  %v2964_v32 = vld [vmem:[#allocation34_spill] sm:$0xff] }
 0x18c   :  { %1287 = vmatpush.msrb.mxu2 %v2962_v33  ;;  %v687_v39 = vadd.f32 %v2628_v19, %v684_v58  ;;  %v955_v43 = vadd.f32 %v954_v21, %v953_v31  ;;  %v1272_v52 = vadd.f32 %v1271_v40, %v1270_v56  ;;  %v1143_v60 = vmul.f32 0.13982143, %v2405_v18  ;;  %v2965_v56 = vld [vmem:[#allocation36_spill] sm:$0xff]  ;;  %v2966_v31 = vld [vmem:[#allocation46_spill] sm:$0xff] }
 0x18d   :  { %v1313_v41 = vmul.f32 -0.003985283, %v2300_v35  ;;  %v1142_v15 = vadd.f32 %v1141_v8, %v1140_v22  ;;  %v1312_v50 = vadd.f32 %v1311_v14, %v1310_v38  ;;  %v697_v11 = vmul.f32 0.42646447, %v2599_v57  ;;  %v2967_v8 = vld [vmem:[#allocation37_spill] sm:$0xff]  ;;  %v2968_v38 = vld [vmem:[#allocation38_spill] sm:$0xff] }
 0x18e   :  { %1288 = vmatpush.msrb.mxu2 %v2963_v30  ;;  %v690_v27 = vadd.f32 %v689_v53, %v687_v39  ;;  %v957_v1 = vadd.f32 %v956_v45, %v955_v43  ;;  %v700_v19 = vmul.f32 0.15289095, %v2677_v61  ;;  %v960_v21 = vmul.f32 0.32211047, %v2599_v57 }
 0x18f   :  { %v1144_v13 = vadd.f32 %v1143_v60, %v1142_v15  ;;  %v1314_v17 = vadd.f32 %v1313_v41, %v1312_v50  ;;  %v962_v35 = vmul.f32 -0.031434953, %v2474_v3  ;;  %v1274_v29 = vadd.f32 %v2539_v54, %v1272_v52  ;;  %v2969_v15 = vld [vmem:[#allocation39_spill] sm:$0xff] }
 0x190   :  { %1289 = vmatpush.msrb.mxu2 %v2964_v32  ;;  %v692_v0 = vadd.f32 %v691_v47, %v690_v27  ;;  %v959_v46 = vadd.f32 %v958_v9, %v957_v1  ;;  %v1147_v53 = vmul.f32 0.13956393, %v2490_v49  ;;  %v1317_v45 = vmul.f32 -0.034252513, %v2405_v18 }
 0x191   :  { %v1146_v58 = vadd.f32 %v2438_v5, %v1144_v13  ;;  %v1316_v48 = vadd.f32 %v2966_v31, %v1314_v17  ;;  %v964_v47 = vmul.f32 0.30031306, %v2554_v34  ;;  %v1149_v55 = vmul.f32 0.07522769, %v2595_v26 }
 0x192   :  { %1290 = vmatpush.msrb.mxu2 %v2965_v56  ;;  %v694_v4 = vadd.f32 %v693_v24, %v692_v0  ;;  %v961_v16 = vadd.f32 %v960_v21, %v959_v46  ;;  %v1319_v40 = vmul.f32 0.20380755, %v2942_v42  ;;  %v966_v43 = vmul.f32 0.1049811, %v2595_v26 }
 0x193   :  { %v1148_v33 = vadd.f32 %v1147_v53, %v1146_v58  ;;  %v1318_v39 = vadd.f32 %v1317_v45, %v1316_v48  ;;  %v1276_v24 = vadd.f32 %v2546_v20, %v1274_v29  ;;  %v1151_v5 = vmul.f32 0.28039712, %v2362_v12  ;;  %v2973_v53 = vld [vmem:[#allocation41_spill] sm:$0xff] }
 0x194   :  { %1291 = vmatpush.msrb.mxu2 %v2967_v8  ;;  %v696_v54 = vadd.f32 %v695_v6, %v694_v4  ;;  %v963_v14 = vadd.f32 %v962_v35, %v961_v16  ;;  %v1321_v22 = vmul.f32 -0.21600346, %v2554_v34  ;;  %v1277_v30 = vmul.f32 0.62308186, %v2418_v25  ;;  %v2971_v35 = vld [vmem:[#allocation22_spill] sm:$0xff]  ;;  %v2974_v16 = vld [vmem:[#allocation53_spill] sm:$0xff] }
 0x195   :  { %v1150_v60 = vadd.f32 %v1149_v55, %v1148_v33  ;;  %v1320_v41 = vadd.f32 %v1319_v40, %v1318_v39  ;;  %v1153_v6 = vmul.f32 0.010612808, %v2942_v42  ;;  %v1323_v27 = vmul.f32 0.10621389, %v2357_v62  ;;  %v2976_v33 = vld [vmem:[#allocation11_spill] sm:$0xff]  ;;  %v2977_v39 = vld [vmem:[#allocation42_spill] sm:$0xff] }
 0x196   :  { %1292 = vmatpush.msrb.mxu2 %v2968_v38  ;;  %v698_v9 = vadd.f32 %v697_v11, %v696_v54  ;;  %v965_v52 = vadd.f32 %v964_v47, %v963_v14  ;;  %v968_v32 = vmul.f32 0.13053532, %v2599_v57  ;;  %v1278_v0 = vadd.f32 %v1277_v30, %v1276_v24  ;;  %v2970_v11 = vld [vmem:[#allocation40_spill] sm:$0xff]  ;;  %v2980_v30 = vld [vmem:[#allocation54_spill] sm:$0xff] }
 0x197   :  { %v1152_v50 = vadd.f32 %v1151_v5, %v1150_v60  ;;  %v1322_v21 = vadd.f32 %v1321_v22, %v1320_v41  ;;  %v1155_v13 = vmul.f32 -0.30521876, %v2490_v49  ;;  %v1325_v17 = vmul.f32 -0.042768914, %v2405_v18  ;;  %v2978_v22 = vld [vmem:[#allocation28_spill] sm:$0xff] }
 0x198   :  { %v701_v1 = vadd.f32 %v700_v19, %v698_v9  ;;  %1293 = vmatpush.msrb.mxu2 %v2969_v15  ;;  %v967_v20 = vadd.f32 %v966_v43, %v965_v52  ;;  %v1279_v62 = vmul.f32 0.2478706, %v2422_v44  ;;  %v2972_v19 = vld [vmem:[#allocation8_spill] sm:$0xff]  ;;  %v970_v31 = vmul.f32 -0.159779, %v2677_v61  ;;  %v2975_v44 = vld [vmem:[#allocation9_spill] sm:$0xff] }
 0x199   :  { %v1154_v46 = vadd.f32 %v1153_v6, %v1152_v50  ;;  %v1324_v25 = vadd.f32 %v1323_v27, %v1322_v21  ;;  %v1327_v29 = vmul.f32 -0.044171482, %v2972_v19  ;;  %v1157_v18 = vmul.f32 -0.29971376, %v2950_v23  ;;  %v2979_v9 = vld [vmem:[#allocation12_spill] sm:$0xff] }
 0x19a   :  { %735 = vmatmul.f32.vlgmr.msra.gmra.mxu3 %v701_v1  ;;  %1294 = vmatpush.msrb.mxu2 %v2970_v11  ;;  %v969_v45 = vadd.f32 %v968_v32, %v967_v20  ;;  %v1280_v58 = vadd.f32 %v1279_v62, %v1278_v0  ;;  %v1329_v47 = vmul.f32 0.028874362, %v2490_v49  ;;  %v1281_v55 = vmul.f32 -0.06963794, %v2604_v36  ;;  %v2981_v1 = vld [vmem:[#allocation55_spill] sm:$0xff] }
 0x19b   :  { %1171 = vmatpush.msra.mxu3 %v2971_v35  ;;  %v1156_v56 = vadd.f32 %v1155_v13, %v1154_v46  ;;  %v1326_v4 = vadd.f32 %v1325_v17, %v1324_v25  ;;  %v1331_v14 = vmul.f32 -0.11408143, %v2595_v26  ;;  %v1159_v43 = vmul.f32 0.03547969, %v2599_v57  ;;  %v2982_v62 = vld [vmem:[#allocation47_spill] sm:$0xff] }
 0x19c   :  { %1295 = vmatpush.msrb.mxu2 %v2973_v53  ;;  %v971_v40 = vadd.f32 %v970_v31, %v969_v45  ;;  %v1333_v5 = vmul.f32 0.058014166, %v2362_v12  ;;  %v1335_v38 = vmul.f32 -0.17529373, %v2942_v42  ;;  %v1161_v52 = vmul.f32 -0.12943032, %v2474_v3 }
 0x19d   :  { %1172 = vmatpush.msra.mxu3 %v2974_v16  ;;  %v1328_v48 = vadd.f32 %v1327_v29, %v1326_v4  ;;  %v1158_v8 = vadd.f32 %v1157_v18, %v1156_v56  ;;  %v1337_v41 = vmul.f32 -0.2199268, %v2490_v49  ;;  %v1339_v12 = vmul.f32 -0.19175889, %v2950_v23  ;;  %v1389_v4 = vld [vmem:[#allocation2 + $0x740] sm:$0xff]  ;;  %v1384_v31 = vld [vmem:[#allocation2 + $0x718] sm:$0xff] }
 0x19e   :  { %1296 = vmatpush.msrb.mxu2 %v2199_v2  ;;  %v1282_v2 = vadd.f32 %v1281_v55, %v1280_v58  ;;  %v1163_v15 = vmul.f32 -0.095677264, %v2554_v34  ;;  %v1341_v42 = vmul.f32 0.31685597, %v2599_v57  ;;  %v1343_v32 = vmul.f32 0.16933048, %v2474_v3 }
 0x19f   :  { %1173 = vmatpush.msra.mxu3 %v2975_v44  ;;  %v1330_v54 = vadd.f32 %v1329_v47, %v1328_v48  ;;  %v1160_v36 = vadd.f32 %v1159_v43, %v1158_v8  ;;  %v1165_v49 = vmul.f32 -0.3123936, %v2595_v26  ;;  %v1345_v23 = vmul.f32 -0.29052886, %v2554_v34  ;;  %v2983_v34 = vld [vmem:[#allocation13_spill] sm:$0xff]  ;;  %v1385_v58 = vld [vmem:[#allocation2 + $0x720] sm:$0xff] }
 0x1a0   :  { %1297 = vmatpush.msrb.mxu2 %v2205_v10  ;;  %v1347_v13 = vmul.f32 -0.12638333, %v2595_v26  ;;  %v1167_v25 = vmul.f32 -0.021742383, %v2599_v57  ;;  %v1349_v3 = vmul.f32 -0.2350355, %v2599_v57 }
 0x1a1   :  { %1174 = vmatpush.msra.mxu3 %v2976_v33  ;;  %v1332_v24 = vadd.f32 %v1331_v14, %v1330_v54  ;;  %v1162_v6 = vadd.f32 %v1161_v52, %v1160_v36  ;;  %v1351_v53 = vmul.f32 -0.14301547, %v2677_v61  ;;  %v1169_v45 = vmul.f32 -0.3597186, %v2677_v61  ;;  %v1396_v57 = vld [vmem:[#allocation2 + $0x778] sm:$0xff]  ;;  %v1395_v61 = vld [vmem:[#allocation2 + $0x770] sm:$0xff] }
 0x1a2   :  { %1005 = vmatmul.f32.vlgmr.msrb.gmra.mxu3 %v971_v40  ;;  %1298 = vmatpush.msrb.mxu2 %v2977_v39  ;;  %v1383_v18 = vld [vmem:[#allocation2 + $0x710] sm:$0xff]  ;;  %v1382_v48 = vld [vmem:[#allocation2 + $0x708] sm:$0xff]  ;;  %v1381_v47 = vld [vmem:[#allocation2 + $0x700] sm:$0xff] }
 0x1a3   :  { %1175 = vmatpush.msra.mxu3 %v2978_v22  ;;  %1299 = vmatmul.f32.vlgmr.msrb.gmra.mxu2 %v1282_v2  ;;  %v1334_v10 = vadd.f32 %v1333_v5, %v1332_v24  ;;  %v1164_v50 = vadd.f32 %v1163_v15, %v1162_v6  ;;  %v2776_v8 = vld [vmem:[#allocation4] sm:$0xff]  ;;  %v2984_v39 = vld [vmem:[#allocation26_spill] sm:$0xff]  ;;  %v1435_v36 = vld [vmem:[#allocation2 + $0x7f0] sm:$0xff] }
 0x1a4   :  { %1457 = vmatpush.msra.mxu1 %v1396_v57  ;;  %v740_v54 = vperm.slane %v2776_v8, 2  ;;  %v1432_v6 = vld [vmem:[#allocation2 + $0x7d8] sm:$0xff] }
 0x1a5   :  { %1176 = vmatpush.msra.mxu3 %v2979_v9  ;;  %v1336_v60 = vadd.f32 %v1335_v38, %v1334_v10  ;;  %v1166_v11 = vadd.f32 %v1165_v49, %v1164_v50  ;;  %v1434_v10 = vld [vmem:[#allocation2 + $0x7e8] sm:$0xff]  ;;  %v1433_v38 = vld [vmem:[#allocation2 + $0x7e0] sm:$0xff]  ;;  %v1424_v57 = vld [vmem:[#allocation2 + $0x798] sm:$0xff] }
 0x1a6   :  { %1458 = vmatpush.msra.mxu1 %v1395_v61 }
 0x1a7   :  { %1177 = vmatpush.msra.mxu3 %v2980_v30  ;;  %v1338_v27 = vadd.f32 %v1337_v41, %v1336_v60  ;;  %v1168_v19 = vadd.f32 %v1167_v25, %v1166_v11  ;;  %v2985_v25 = vld [vmem:[#allocation32_spill] sm:$0xff] }
 0x1a9   :  { %1178 = vmatpush.msra.mxu3 %v2981_v1  ;;  %v1340_v20 = vadd.f32 %v1339_v12, %v1338_v27  ;;  %v1170_v26 = vadd.f32 %v1169_v45, %v1168_v19  ;;  %v1431_v27 = vld [vmem:[#allocation2 + $0x7d0] sm:$0xff]  ;;  %v1425_v45 = vld [vmem:[#allocation2 + $0x7a0] sm:$0xff] }
 0x1ab   :  { %1179 = vmatpush.msra.mxu3 %v2542_v63  ;;  %v1342_v21 = vadd.f32 %v1341_v42, %v1340_v20  ;;  %v1430_v20 = vld [vmem:[#allocation2 + $0x7c8] sm:$0xff] }
 0x1ad   :  { %1180 = vmatpush.msra.mxu3 %v2558_v59  ;;  %v1344_v0 = vadd.f32 %v1343_v32, %v1342_v21  ;;  %v1429_v32 = vld [vmem:[#allocation2 + $0x7c0] sm:$0xff] }
 0x1af   :  { %1181 = vmatpush.msra.mxu3 %v2566_v51  ;;  %v1346_v46 = vadd.f32 %v1345_v23, %v1344_v0  ;;  %v1428_v23 = vld [vmem:[#allocation2 + $0x7b8] sm:$0xff] }
 0x1b1   :  { %1182 = vmatpush.msra.mxu3 %v2577_v7  ;;  %v1348_v17 = vadd.f32 %v1347_v13, %v1346_v46  ;;  %v1427_v46 = vld [vmem:[#allocation2 + $0x7b0] sm:$0xff] }
 0x1b3   :  { %1183 = vmatpush.msra.mxu3 %v2982_v62  ;;  %v1350_v29 = vadd.f32 %v1349_v3, %v1348_v17  ;;  %v1426_v3 = vld [vmem:[#allocation2 + $0x7a8] sm:$0xff] }
 0x1b4   :  { %v635_v55 = vpop.f32.mrf.mxu2 }
 0x1b5   :  { %1184 = vmatpush.msra.mxu3 %v2983_v34  ;;  %v1352_v56 = vadd.f32 %v1351_v53, %v1350_v29  ;;  %v2986_v53 = vld [vmem:[#allocation30_spill] sm:$0xff] }
 0x1b7   :  { %1185 = vmatpush.msra.mxu3 %v2620_v28 }
 0x1b9   :  { %1186 = vmatpush.msra.mxu3 %v2632_v37 }
 0x1ba   :  { %1187 = vmatmul.f32.vlgmr.msra.gmra.mxu3 %v1170_v26 }
 0x1bb   :  { %1353 = vmatpush.msrb.mxu3 %v2971_v35  ;;  %v1394_v35 = vld [vmem:[#allocation2 + $0x768] sm:$0xff] }
 0x1bc   :  { %1459 = vmatpush.msra.mxu1 %v1394_v35 }
 0x1bd   :  { %1354 = vmatpush.msrb.mxu3 %v2974_v16  ;;  %v1388_v16 = vld [vmem:[#allocation2 + $0x738] sm:$0xff] }
 0x1bf   :  { %1355 = vmatpush.msrb.mxu3 %v2975_v44 }
 0x1c1   :  { %1356 = vmatpush.msrb.mxu3 %v2976_v33 }
 0x1c3   :  { %1357 = vmatpush.msrb.mxu3 %v2978_v22  ;;  %v1436_v22 = vld [vmem:[#allocation2 + $0x7f8] sm:$0xff] }
 0x1c4   :  { %1437 = vmatpush.msra.mxu0 %v1436_v22 }
 0x1c5   :  { %1358 = vmatpush.msrb.mxu3 %v2979_v9 }
 0x1c6   :  { %1438 = vmatpush.msra.mxu0 %v1435_v36 }
 0x1c7   :  { %1359 = vmatpush.msrb.mxu3 %v2980_v30  ;;  %v615_v44 = vpop.f32.mrf.mxu1  ;;  %v818_v9 = vpop.f32.mrf.mxu0 }
 0x1c8   :  { %v636_v40 = vadd.f32 %v635_v55, %v615_v44  ;;  %1439 = vmatpush.msra.mxu0 %v1434_v10 }
 0x1c9   :  { %1360 = vmatpush.msrb.mxu3 %v2981_v1 }
 0x1ca   :  { %1440 = vmatpush.msra.mxu0 %v1433_v38 }
 0x1cb   :  { %1361 = vmatpush.msrb.mxu3 %v2542_v63  ;;  %v1393_v63 = vld [vmem:[#allocation2 + $0x760] sm:$0xff] }
 0x1cc   :  { %1460 = vmatpush.msra.mxu1 %v1393_v63  ;;  %1441 = vmatpush.msra.mxu0 %v1432_v6  ;;  %v1491_v6 = vld [vmem:[#allocation2 + $0x850] sm:$0xff] }
 0x1cd   :  { %1362 = vmatpush.msrb.mxu3 %v2558_v59  ;;  %v1391_v59 = vld [vmem:[#allocation2 + $0x750] sm:$0xff] }
 0x1ce   :  { %1442 = vmatpush.msra.mxu0 %v1431_v27  ;;  %v1490_v27 = vld [vmem:[#allocation2 + $0x848] sm:$0xff] }
 0x1cf   :  { %1363 = vmatpush.msrb.mxu3 %v2566_v51  ;;  %v1392_v51 = vld [vmem:[#allocation2 + $0x758] sm:$0xff]  ;;  %v838_v52 = vpop.f32.mrf.mxu1  ;;  %v1049_v12 = vpop.f32.mrf.mxu0 }
 0x1d0   :  { %1461 = vmatpush.msra.mxu1 %v1392_v51  ;;  %v839_v50 = vadd.f32 %v838_v52, %v818_v9  ;;  %1443 = vmatpush.msra.mxu0 %v1430_v20  ;;  %v1423_v51 = vld [vmem:[#allocation2 + $0x790] sm:$0xff]  ;;  %v1496_v9 = vld [vmem:[#allocation2 + $0x878] sm:$0xff]  ;;  %v1486_v20 = vld [vmem:[#allocation2 + $0x828] sm:$0xff] }
 0x1d1   :  { %1364 = vmatpush.msrb.mxu3 %v2577_v7  ;;  %v1390_v7 = vld [vmem:[#allocation2 + $0x748] sm:$0xff]  ;;  %v1495_v52 = vld [vmem:[#allocation2 + $0x870] sm:$0xff]  ;;  %1498 = vmatpush.msra.mxu2 %v1496_v9 }
 0x1d2   :  { %1462 = vmatpush.msra.mxu1 %v1391_v59  ;;  %1444 = vmatpush.msra.mxu0 %v1429_v32  ;;  %v1482_v32 = vld [vmem:[#allocation2 + $0x808] sm:$0xff] }
 0x1d3   :  { %1365 = vmatpush.msrb.mxu3 %v2982_v62  ;;  %1499 = vmatpush.msra.mxu2 %v1495_v52 }
 0x1d4   :  { %1463 = vmatpush.msra.mxu1 %v1390_v7  ;;  %1445 = vmatpush.msra.mxu0 %v1428_v23  ;;  %v2987_v7 = vld [vmem:[#allocation35_spill] sm:$0xff] }
 0x1d5   :  { %1366 = vmatpush.msrb.mxu3 %v2983_v34  ;;  %v1481_v23 = vld [vmem:[#allocation2 + $0x800] sm:$0xff] }
 0x1d6   :  { %1464 = vmatpush.msra.mxu1 %v1389_v4  ;;  %1446 = vmatpush.msra.mxu0 %v1427_v46  ;;  %v1532_v46 = vld [vmem:[#allocation2 + $0x8e0] sm:$0xff] }
 0x1d7   :  { %1367 = vmatpush.msrb.mxu3 %v2620_v28  ;;  %v1387_v28 = vld [vmem:[#allocation2 + $0x730] sm:$0xff] }
 0x1d8   :  { %1465 = vmatpush.msra.mxu1 %v1388_v16  ;;  %1447 = vmatpush.msra.mxu0 %v1426_v3  ;;  %v1422_v16 = vld [vmem:[#allocation2 + $0x788] sm:$0xff]  ;;  %v1528_v3 = vld [vmem:[#allocation2 + $0x8c0] sm:$0xff] }
 0x1d9   :  { %1368 = vmatpush.msrb.mxu3 %v2632_v37  ;;  %v1386_v37 = vld [vmem:[#allocation2 + $0x728] sm:$0xff] }
 0x1da   :  { %1369 = vmatmul.f32.vlgmr.msrb.gmra.mxu3 %v1352_v56  ;;  %1466 = vmatpush.msra.mxu1 %v1387_v28 }
 0x1db   :  { %1448 = vmatpush.msra.mxu0 %v1425_v45  ;;  %v1477_v45 = vperm.slane %v2776_v8, 3 }
 0x1dc   :  { %1467 = vmatpush.msra.mxu1 %v1386_v37 }
 0x1dd   :  { %1449 = vmatpush.msra.mxu0 %v1424_v57 }
 0x1de   :  { %1468 = vmatpush.msra.mxu1 %v1385_v58  ;;  %v1421_v58 = vld [vmem:[#allocation2 + $0x780] sm:$0xff] }
 0x1df   :  { %1450 = vmatpush.msra.mxu0 %v1423_v51  ;;  %v1521_v51 = vld [vmem:[#allocation2 + $0x888] sm:$0xff] }
 0x1e0   :  { %1469 = vmatpush.msra.mxu1 %v1384_v31 }
 0x1e1   :  { %1451 = vmatpush.msra.mxu0 %v1422_v16 }
 0x1e2   :  { %1470 = vmatpush.msra.mxu1 %v1383_v18 }
 0x1e3   :  { %1452 = vmatpush.msra.mxu0 %v1421_v58 }
 0x1e4   :  { %1471 = vmatpush.msra.mxu1 %v1382_v48 }
 0x1e6   :  { %1472 = vmatpush.msra.mxu1 %v1381_v47 }
 0x1e7   :  { %v1069_v30 = vpop.f32.mrf.mxu1  ;;  %v1231_v62 = vpop.f32.mrf.mxu0 }
 0x1e8   :  { %v1070_v15 = vadd.f32 %v1069_v30, %v1049_v12  ;;  %v1492_v30 = vld [vmem:[#allocation2 + $0x858] sm:$0xff]  ;;  %v1489_v12 = vld [vmem:[#allocation2 + $0x840] sm:$0xff] }
 0x206   :  { %v919_v60 = vpop.f32.mrf.mxu2 }
 0x207   :  { %v922_v49 = vadd.f32 %v919_v60, %v839_v50  ;;  %v1251_v13 = vpop.f32.mrf.mxu1  ;;  %v1494_v60 = vld [vmem:[#allocation2 + $0x868] sm:$0xff]  ;;  %v1484_v50 = vld [vmem:[#allocation2 + $0x818] sm:$0xff] }
 0x208   :  { %v1252_v29 = vadd.f32 %v1251_v13, %v1231_v62  ;;  %1500 = vmatpush.msra.mxu2 %v1494_v60  ;;  %v1531_v13 = vld [vmem:[#allocation2 + $0x8d8] sm:$0xff] }
 0x209   :  { %v1527_v62 = vld [vmem:[#allocation2 + $0x8b8] sm:$0xff] }
 0x20e   :  { %v1118_v1 = vpop.f32.mrf.mxu2 }
 0x20f   :  { %v1121_v21 = vadd.f32 %v1118_v1, %v1070_v15  ;;  %v1488_v1 = vld [vmem:[#allocation2 + $0x838] sm:$0xff]  ;;  %v1487_v15 = vld [vmem:[#allocation2 + $0x830] sm:$0xff] }
 0x21d   :  { %v736_v14 = vpop.f32.mrf.mxu3 }
 0x21e   :  { %v739_v33 = vadd.f32 %v736_v14, %v636_v40 }
 0x220   :  { %v741_v2 = vadd.f32 %v740_v54, %v739_v33 }
 0x222   :  { %v2780_v43 = vadd.f32 %v741_v2, %v2984_v39 }
 0x224   :  { %v1378_v24 = vmul.f32 %v2780_v43, %v2780_v43 }
 0x225   :  { %v1006_v41 = vpop.f32.mrf.mxu3 }
 0x226   :  { %v1379_v5 = vmul.f32 -0.9531651, %v1378_v24  ;;  %v1009_v11 = vadd.f32 %v1006_v41, %v922_v49  ;;  %v1300_v19 = vpop.f32.mrf.mxu2  ;;  %v1493_v41 = vld [vmem:[#allocation2 + $0x860] sm:$0xff]  ;;  %v1535_v49 = vld [vmem:[#allocation2 + $0x8f8] sm:$0xff] }
 0x227   :  { %v1303_v56 = vadd.f32 %v1300_v19, %v1252_v29  ;;  %1501 = vmatpush.msra.mxu2 %v1493_v41  ;;  %1537 = vmatpush.msra.mxu3 %v1535_v49  ;;  %v1526_v19 = vld [vmem:[#allocation2 + $0x8b0] sm:$0xff]  ;;  %v1525_v29 = vld [vmem:[#allocation2 + $0x8a8] sm:$0xff] }
 0x228   :  { %1473 = vmatmul.f32.vlgmr.msra.gmra.mxu1 %v1379_v5  ;;  %v1375_v34 = vadd.f32 %v1009_v11, %v2986_v53  ;;  %v1533_v11 = vld [vmem:[#allocation2 + $0x8e8] sm:$0xff]  ;;  %v1524_v53 = vld [vmem:[#allocation2 + $0x8a0] sm:$0xff] }
 0x229   :  { %1502 = vmatpush.msra.mxu2 %v1492_v30 }
 0x22a   :  { %v1397_v35 = vmul.f32 %v1375_v34, %v1375_v34 }
 0x22b   :  { %1503 = vmatpush.msra.mxu2 %v1491_v6 }
 0x22c   :  { %v1398_v28 = vmul.f32 0.16937125, %v1397_v35 }
 0x22d   :  { %1504 = vmatpush.msra.mxu2 %v1490_v27 }
 0x22f   :  { %1505 = vmatpush.msra.mxu2 %v1489_v12 }
 0x231   :  { %1506 = vmatpush.msra.mxu2 %v1488_v1 }
 0x233   :  { %1507 = vmatpush.msra.mxu2 %v1487_v15 }
 0x235   :  { %1508 = vmatpush.msra.mxu2 %v1486_v20 }
 0x23d   :  { %v1188_v42 = vpop.f32.mrf.mxu3 }
 0x23e   :  { %v1191_v0 = vadd.f32 %v1188_v42, %v1121_v21  ;;  %v1485_v42 = vld [vmem:[#allocation2 + $0x820] sm:$0xff]  ;;  %v1483_v21 = vld [vmem:[#allocation2 + $0x810] sm:$0xff] }
 0x23f   :  { %1509 = vmatpush.msra.mxu2 %v1485_v42 }
 0x240   :  { %v1376_v17 = vadd.f32 %v1191_v0, %v2985_v25  ;;  %v1534_v0 = vld [vmem:[#allocation2 + $0x8f0] sm:$0xff] }
 0x241   :  { %1510 = vmatpush.msra.mxu2 %v1484_v50  ;;  %1538 = vmatpush.msra.mxu3 %v1534_v0  ;;  %v1530_v25 = vld [vmem:[#allocation2 + $0x8d0] sm:$0xff] }
 0x242   :  { %v1399_v26 = vmul.f32 %v1376_v17, %v1375_v34  ;;  %v1407_v18 = vmul.f32 %v1376_v17, %v1376_v17 }
 0x243   :  { %1511 = vmatpush.msra.mxu2 %v1483_v21  ;;  %1539 = vmatpush.msra.mxu3 %v1533_v11 }
 0x244   :  { %v1400_v59 = vmul.f32 0.13797046, %v1399_v26  ;;  %v1405_v47 = vmul.f32 0.24056433, %v1399_v26  ;;  %v1408_v40 = vmul.f32 0.20387053, %v1407_v18 }
 0x245   :  { %1512 = vmatpush.msra.mxu2 %v1482_v32  ;;  %1540 = vmatpush.msra.mxu3 %v1532_v46 }
 0x246   :  { %v1401_v31 = vadd.f32 %v1400_v59, %v1398_v28  ;;  %v1520_v59 = vld [vmem:[#allocation2 + $0x880] sm:$0xff] }
 0x247   :  { %1513 = vmatpush.msra.mxu2 %v1481_v23  ;;  %1541 = vmatpush.msra.mxu3 %v1531_v13 }
 0x249   :  { %1542 = vmatpush.msra.mxu3 %v1530_v25 }
 0x25d   :  { %v1370_v61 = vpop.f32.mrf.mxu3 }
 0x25e   :  { %v1373_v63 = vadd.f32 %v1370_v61, %v1303_v56 }
 0x260   :  { %v1377_v4 = vadd.f32 %v1373_v63, %v2987_v7  ;;  %v1522_v63 = vld [vmem:[#allocation2 + $0x890] sm:$0xff]  ;;  %v1497_v7 = vperm.slane %v2776_v8, 4 }
 0x262   :  { %v1402_v37 = vmul.f32 %v1377_v4, %v1375_v34  ;;  %v1410_v55 = vmul.f32 %v1377_v4, %v1376_v17  ;;  %v1417_v24 = vmul.f32 %v1377_v4, %v1377_v4  ;;  %v1529_v17 = vld [vmem:[#allocation2 + $0x8c8] sm:$0xff]  ;;  %v1523_v34 = vld [vmem:[#allocation2 + $0x898] sm:$0xff] }
 0x263   :  { %1543 = vmatpush.msra.mxu3 %v1529_v17 }
 0x264   :  { %v1403_v48 = vmul.f32 0.16578372, %v1402_v37  ;;  %v1411_v33 = vmul.f32 -0.2371537, %v1410_v55  ;;  %v1413_v39 = vmul.f32 0.42518708, %v1402_v37 }
 0x265   :  { %v1415_v22 = vmul.f32 0.117993794, %v1410_v55  ;;  %v1418_v36 = vmul.f32 -0.4788208, %v1417_v24  ;;  %1544 = vmatpush.msra.mxu3 %v1528_v3  ;;  %v1536_v37 = vperm.slane %v2776_v8, 5 }
 0x266   :  { %v1404_v44 = vadd.f32 %v1403_v48, %v1401_v31 }
 0x267   :  { %1545 = vmatpush.msra.mxu3 %v1527_v62 }
 0x268   :  { %v1406_v54 = vadd.f32 %v1405_v47, %v1404_v44 }
 0x269   :  { %1546 = vmatpush.msra.mxu3 %v1526_v19 }
 0x26a   :  { %v1409_v14 = vadd.f32 %v1408_v40, %v1406_v54 }
 0x26b   :  { %1547 = vmatpush.msra.mxu3 %v1525_v29 }
 0x26c   :  { %v1412_v2 = vadd.f32 %v1411_v33, %v1409_v14 }
 0x26d   :  { %1548 = vmatpush.msra.mxu3 %v1524_v53 }
 0x26e   :  { %v1414_v5 = vadd.f32 %v1413_v39, %v1412_v2 }
 0x26f   :  { %1549 = vmatpush.msra.mxu3 %v1523_v34 }
 0x270   :  { %v1416_v10 = vadd.f32 %v1415_v22, %v1414_v5 }
 0x271   :  { %1550 = vmatpush.msra.mxu3 %v1522_v63 }
 0x272   :  { %v1419_v38 = vadd.f32 %v1418_v36, %v1416_v10 }
 0x273   :  { %1551 = vmatpush.msra.mxu3 %v1521_v51 }
 0x274   :  { %1453 = vmatmul.f32.vlgmr.msra.gmra.mxu0 %v1419_v38 }
 0x275   :  { %1552 = vmatpush.msra.mxu3 %v1520_v59 }
 0x2a5   :  { %v1474_v56 = vpop.f32.mrf.mxu1 }
 0x2f1   :  { %v1454_v26 = vpop.f32.mrf.mxu0 }
 0x2f2   :  { %v1475_v57 = vadd.f32 %v1474_v56, %v1454_v26 }
 0x2f4   :  { %v1478_v61 = vadd.f32 %v1477_v45, %v1475_v57 }
 0x2f6   :  { %v1479_v35 = vadd.f32 %v1478_v61, %v2780_v43 }
 0x2f8   :  { %1514 = vmatmul.f32.vlgmr.msra.gmra.mxu2 %v1479_v35 }
 0x37b   :  { %v1515_v4 = vpop.f32.mrf.mxu2 }
 0x37c   :  { %v1516_v16 = vadd.f32 %v1515_v4, %v1497_v7 }
 0x37e   :  { %v1518_v28 = vmax.f32 %v1516_v16, 0.0 }
 0x380   :  { %1553 = vmatmul.f32.vlgmr.msra.gmra.mxu3 %v1518_v28 }
 0x403   :  { %v1554_v58 = vpop.f32.mrf.mxu3 }
 0x404   :  { %v1555_v31 = vadd.f32 %v1554_v58, %v1536_v37 }
 0x406   :  { %1557 = vst [vmem:[%s2801_s7] sm:$0xff] %v1555_v31 }
 0x407   :  { %1562 = vsyncpa [#allocation3], 1 }
 0x408   :  { %1563 = vsyncpa [#allocation5], 1 }

</bundles_post_ra>
